<compile_context>
chip_gen: v7x
topology: tpu7x:2x2x1
jax: 0.10.0
libtpu: 0.0.40
codegen_flags: <defaults>
</compile_context>

<pallas_src>
import jax
import jax.numpy as jnp
from jax.experimental import pallas as pl
from jax.experimental.pallas import tpu as pltpu


# ----------------------------------------------------------------------------
# Fused kernel.
#
# Packed layouts (H = hidden size, H2 = 2H, G = 8H):
#   states        h, c            : (B, 2H)   = [fwd | bwd]
#   gate tensors  gates, g_in     : (B, 8H)   = [i_f i_b f_f f_b g_f g_b o_f o_b]
#   W_in_A (fwd)  : (Din, 8H)  fwd weights in fwd columns, zeros in bwd columns
#   W_in_B (bwd)  : (Din, 8H)  bwd weights in bwd columns, zeros in fwd columns
#   bias          : (1, 8H)    fused (b_ih + b_hh), per direction
#   W_hh packed   : (2H, 8H)   block-diagonal: rows 0:H -> fwd cols,
#                              rows H:2H -> bwd cols
# ----------------------------------------------------------------------------
def _fused_bilstm_kernel(x_ref,                                   # (T, B, Din)
                         wa0_ref, wb0_ref, b0_ref, whh0_ref,      # layer 0
                         wab1_ref, b1_ref, whh1_ref,              # layer 1
                         hpk_ref, cpk_ref,                        # (2, B, 2H)
                         w1t_ref, fb1_ref, w2t_ref, fb2_ref,      # fc head
                         out_ref):                                # (B, out)
    T, B, Din = x_ref.shape
    H2 = hpk_ref.shape[-1]          # 2H (both directions lane-stacked)
    H = H2 // 2
    G = 4 * H2                      # 8H: paired gate width
    f32 = jnp.float32

    def cell_step(g_in, h, c, whh_ref):
        # One fused fwd+bwd LSTM step; all slices are 128-lane aligned.
        gates = g_in + jnp.dot(h, whh_ref[...], preferred_element_type=f32)
        i_p = jax.nn.sigmoid(gates[:, 0 * H2:1 * H2])
        f_p = jax.nn.sigmoid(gates[:, 1 * H2:2 * H2])
        g_p = jnp.tanh(gates[:, 2 * H2:3 * H2])
        o_p = jax.nn.sigmoid(gates[:, 3 * H2:4 * H2])
        c_new = f_p * c + i_p * g_p
        h_new = o_p * jnp.tanh(c_new)
        return h_new, c_new

    # ---- Layer 0: per-timestep gate-input contributions (hoisted off the
    #      recurrent critical path). Din == 1 -> broadcast multiply, no MXU.
    x_all = x_ref[...].astype(f32)                     # (T, B, Din)
    wa0 = wa0_ref[...]
    wb0 = wb0_ref[...]
    b0 = b0_ref[...]
    if Din == 1:
        ga0 = [x_all[t] * wa0 + b0 for t in range(T)]  # (B, 8H) each
        gb0 = [x_all[t] * wb0 for t in range(T)]
    else:
        ga0 = [jnp.dot(x_all[t], wa0, preferred_element_type=f32) + b0
               for t in range(T)]
        gb0 = [jnp.dot(x_all[t], wb0, preferred_element_type=f32)
               for t in range(T)]

    # ---- Layer 0 recurrence: both directions advance in lockstep; the
    #      forward half consumes time t, the backward half time T-1-t.
    h = hpk_ref[0]
    c = cpk_ref[0]
    hf0 = [None] * T
    hb0 = [None] * T
    for t in range(T):
        g_in = ga0[t] + gb0[T - 1 - t]
        h, c = cell_step(g_in, h, c, whh0_ref)
        hf0[t] = h[:, 0:H]                 # fwd output at position t
        hb0[T - 1 - t] = h[:, H:H2]        # bwd output at position T-1-t

    # Layer-0 output sequence stays on-chip (registers / VMEM spills only).
    seq0 = [jnp.concatenate([hf0[t], hb0[t]], axis=-1) for t in range(T)]

    # ---- Layer 1: ONE batched input projection over all T*B rows.
    seq0_mat = jnp.concatenate(seq0, axis=0)                     # (T*B, 2H)
    g1_all = jnp.dot(seq0_mat, wab1_ref[...],
                     preferred_element_type=f32)                 # (T*B, 16H)
    b1 = b1_ref[...]
    ga1 = [g1_all[t * B:(t + 1) * B, 0:G] + b1 for t in range(T)]
    gb1 = [g1_all[t * B:(t + 1) * B, G:2 * G] for t in range(T)]

    # ---- Layer 1 recurrence (sequence output never materialized).
    h = hpk_ref[1]
    c = cpk_ref[1]
    h_bwd_last_pos = None
    for t in range(T):
        g_in = ga1[t] + gb1[T - 1 - t]
        h, c = cell_step(g_in, h, c, whh1_ref)
        if t == 0:
            # backward direction's first step == output at original time T-1
            h_bwd_last_pos = h[:, H:H2]
    h_fwd_last_pos = h[:, 0:H]

    # output[:, -1, :] of the bidirectional LSTM (fwd features first).
    feat = jnp.concatenate([h_fwd_last_pos, h_bwd_last_pos], axis=-1)

    # ---- fc1 -> ReLU -> fc2 head.
    z = jnp.dot(feat, w1t_ref[...], preferred_element_type=f32) + fb1_ref[...]
    z = jnp.maximum(z, 0.0)
    out_ref[...] = (jnp.dot(z, w2t_ref[...], preferred_element_type=f32)
                    + fb2_ref[...])


def _full_spec(shape):
    zeros = (0,) * len(shape)
    return pl.BlockSpec(shape, lambda *_: zeros)


@jax.jit
def lstm_forward(params, x, h0, c0):
    """x: (B, T, input_size) batch_first; h0, c0: (num_layers*2, B, H).
    Returns (B, output_size)."""
    B = x.shape[0]
    x_tbd = jnp.transpose(x, (1, 0, 2)).astype(jnp.float32)      # time-major
    # lane-stack (fwd, bwd) initial states per layer -> (num_layers, B, 2H)
    hpk = jnp.concatenate([h0[0::2], h0[1::2]], axis=-1).astype(jnp.float32)
    cpk = jnp.concatenate([c0[0::2], c0[1::2]], axis=-1).astype(jnp.float32)

    args = (x_tbd,
            params["wa0"], params["wb0"], params["b0"], params["whh0"],
            params["wab1"], params["b1"], params["whh1"],
            hpk, cpk,
            params["fc1_wt"], params["fc1_b"],
            params["fc2_wt"], params["fc2_b"])
    out_size = params["fc2_wt"].shape[1]

    return pl.pallas_call(
        _fused_bilstm_kernel,
        out_shape=jax.ShapeDtypeStruct((B, out_size), jnp.float32),
        grid=(),
        in_specs=[_full_spec(a.shape) for a in args],
        out_specs=_full_spec((B, out_size)),
        compiler_params=pltpu.CompilerParams(
            vmem_limit_bytes=32 * 1024 * 1024),
    )(*args)


# ----------------------------------------------------------------------------
# Parameter init (PyTorch-style uniform init) + packing into kernel layouts.
# ----------------------------------------------------------------------------
def init_params(key, input_size=1, hidden_size=64, num_layers=2, output_size=1):
    assert num_layers == 2, "packing below is written for the 2-layer module"
    H = hidden_size

    def u(k, shape, bound):
        return jax.random.uniform(k, shape, jnp.float32, -bound, bound)

    def scatter(w_t, direction):
        """w_t: (K, 4H), gate cols ordered [i f g o]. Place gate g's columns
        at paired position (2g + direction)*H of a (K, 8H) matrix."""
        K = w_t.shape[0]
        out = jnp.zeros((K, 8 * H), jnp.float32)
        for g in range(4):
            c0 = (2 * g + direction) * H
            out = out.at[:, c0:c0 + H].set(w_t[:, g * H:(g + 1) * H])
        return out

    bound = 1.0 / (H ** 0.5)
    raw = []
    for layer in range(num_layers):
        din = input_size if layer == 0 else 2 * H
        dirs = []
        for _d in range(2):
            key, k1, k2, k3, k4 = jax.random.split(key, 5)
            w_ih = u(k1, (4 * H, din), bound)      # torch rows: [i; f; g; o]
            w_hh = u(k2, (4 * H, H), bound)
            b_ih = u(k3, (4 * H,), bound)
            b_hh = u(k4, (4 * H,), bound)
            dirs.append((w_ih, w_hh, b_ih + b_hh))  # fuse biases
        raw.append(dirs)

    packed = []
    for layer in range(num_layers):
        (wif, whf, bf), (wib, whb, bb) = raw[layer]
        wa = scatter(wif.T, 0)                                     # (Din, 8H)
        wb = scatter(wib.T, 1)                                     # (Din, 8H)
        bias = (scatter(bf.reshape(1, -1), 0)
                + scatter(bb.reshape(1, -1), 1))                   # (1, 8H)
        whh = jnp.concatenate([scatter(whf.T, 0),
                               scatter(whb.T, 1)], axis=0)         # (2H, 8H)
        packed.append((wa, wb, bias, whh))

    params = {}
    params["wa0"], params["wb0"], params["b0"], params["whh0"] = packed[0]
    wa1, wb1, params["b1"], params["whh1"] = packed[1]
    params["wab1"] = jnp.concatenate([wa1, wb1], axis=1)           # (2H, 16H)

    kb1 = 1.0 / ((2 * H) ** 0.5)
    key, k1, k2 = jax.random.split(key, 3)
    fc1_w = u(k1, (H, 2 * H), kb1)
    fc1_b = u(k2, (H,), kb1)
    kb2 = 1.0 / (H ** 0.5)
    key, k1, k2 = jax.random.split(key, 3)
    fc2_w = u(k1, (output_size, H), kb2)
    fc2_b = u(k2, (output_size,), kb2)
    params["fc1_wt"] = fc1_w.T                      # (2H, H)
    params["fc1_b"] = fc1_b.reshape(1, H)
    params["fc2_wt"] = fc2_w.T                      # (H, out)
    params["fc2_b"] = fc2_b.reshape(1, output_size)
    return params


if __name__ == "__main__":
    B, T = 2, 8
    INPUT_SIZE, HIDDEN, NUM_LAYERS, OUT = 1, 64, 2, 1

    key = jax.random.PRNGKey(0)
    key, kp, kx, kh, kc = jax.random.split(key, 5)

    params = init_params(kp, INPUT_SIZE, HIDDEN, NUM_LAYERS, OUT)
    x = jax.random.normal(kx, (B, T, INPUT_SIZE), jnp.float32)
    h0 = jax.random.normal(kh, (2 * NUM_LAYERS, B, HIDDEN), jnp.float32)
    c0 = jax.random.normal(kc, (2 * NUM_LAYERS, B, HIDDEN), jnp.float32)

    out = lstm_forward(params, x, h0, c0)
    jax.block_until_ready(out)
    assert out.shape == (B, OUT), out.shape
    print("KERNEL_OK")
</pallas_src>

<mosaic_0001>
module attributes {stable_mosaic.version = 11 : i64} {
  func.func @_fused_bilstm_kernel(%arg0: memref<8x2x1xf32, #tpu.memory_space<vmem>>, %arg1: memref<1x512xf32, #tpu.memory_space<vmem>>, %arg2: memref<1x512xf32, #tpu.memory_space<vmem>>, %arg3: memref<1x512xf32, #tpu.memory_space<vmem>>, %arg4: memref<128x512xf32, #tpu.memory_space<vmem>>, %arg5: memref<128x1024xf32, #tpu.memory_space<vmem>>, %arg6: memref<1x512xf32, #tpu.memory_space<vmem>>, %arg7: memref<128x512xf32, #tpu.memory_space<vmem>>, %arg8: memref<2x2x128xf32, #tpu.memory_space<vmem>>, %arg9: memref<2x2x128xf32, #tpu.memory_space<vmem>>, %arg10: memref<128x64xf32, #tpu.memory_space<vmem>>, %arg11: memref<1x64xf32, #tpu.memory_space<vmem>>, %arg12: memref<64x1xf32, #tpu.memory_space<vmem>>, %arg13: memref<1x1xf32, #tpu.memory_space<vmem>>, %arg14: memref<2x1xf32, #tpu.memory_space<vmem>>) attributes {dimension_semantics = [], scalar_prefetch = 0 : i64, scratch_operands = 0 : i64, tpu.core_type = #tpu.core_type<tc>} {
    %c0 = arith.constant 0 : index
    %c0_0 = arith.constant 0 : index
    %c0_1 = arith.constant 0 : index
    %0 = vector.load %arg0[%c0, %c0_0, %c0_1] : memref<8x2x1xf32, #tpu.memory_space<vmem>>, vector<8x2x1xf32>
    %c0_2 = arith.constant 0 : index
    %c0_3 = arith.constant 0 : index
    %1 = vector.load %arg1[%c0_2, %c0_3] : memref<1x512xf32, #tpu.memory_space<vmem>>, vector<1x512xf32>
    %c0_4 = arith.constant 0 : index
    %c0_5 = arith.constant 0 : index
    %2 = vector.load %arg2[%c0_4, %c0_5] : memref<1x512xf32, #tpu.memory_space<vmem>>, vector<1x512xf32>
    %c0_6 = arith.constant 0 : index
    %c0_7 = arith.constant 0 : index
    %3 = vector.load %arg3[%c0_6, %c0_7] : memref<1x512xf32, #tpu.memory_space<vmem>>, vector<1x512xf32>
    %4 = vector.extract_strided_slice %0 {offsets = [0, 0, 0], sizes = [1, 2, 1], strides = [1, 1, 1]} : vector<8x2x1xf32> to vector<1x2x1xf32>
    %5 = vector.shape_cast %4 : vector<1x2x1xf32> to vector<2x1xf32>
    %6 = vector.broadcast %5 : vector<2x1xf32> to vector<2x512xf32>
    %7 = vector.broadcast %1 : vector<1x512xf32> to vector<2x512xf32>
    %8 = arith.mulf %6, %7 : vector<2x512xf32>
    %9 = vector.broadcast %3 : vector<1x512xf32> to vector<2x512xf32>
    %10 = arith.addf %8, %9 : vector<2x512xf32>
    %11 = vector.extract_strided_slice %0 {offsets = [1, 0, 0], sizes = [1, 2, 1], strides = [1, 1, 1]} : vector<8x2x1xf32> to vector<1x2x1xf32>
    %12 = vector.shape_cast %11 : vector<1x2x1xf32> to vector<2x1xf32>
    %13 = vector.broadcast %12 : vector<2x1xf32> to vector<2x512xf32>
    %14 = vector.broadcast %1 : vector<1x512xf32> to vector<2x512xf32>
    %15 = arith.mulf %13, %14 : vector<2x512xf32>
    %16 = vector.broadcast %3 : vector<1x512xf32> to vector<2x512xf32>
    %17 = arith.addf %15, %16 : vector<2x512xf32>
    %18 = vector.extract_strided_slice %0 {offsets = [2, 0, 0], sizes = [1, 2, 1], strides = [1, 1, 1]} : vector<8x2x1xf32> to vector<1x2x1xf32>
    %19 = vector.shape_cast %18 : vector<1x2x1xf32> to vector<2x1xf32>
    %20 = vector.broadcast %19 : vector<2x1xf32> to vector<2x512xf32>
    %21 = vector.broadcast %1 : vector<1x512xf32> to vector<2x512xf32>
    %22 = arith.mulf %20, %21 : vector<2x512xf32>
    %23 = vector.broadcast %3 : vector<1x512xf32> to vector<2x512xf32>
    %24 = arith.addf %22, %23 : vector<2x512xf32>
    %25 = vector.extract_strided_slice %0 {offsets = [3, 0, 0], sizes = [1, 2, 1], strides = [1, 1, 1]} : vector<8x2x1xf32> to vector<1x2x1xf32>
    %26 = vector.shape_cast %25 : vector<1x2x1xf32> to vector<2x1xf32>
    %27 = vector.broadcast %26 : vector<2x1xf32> to vector<2x512xf32>
    %28 = vector.broadcast %1 : vector<1x512xf32> to vector<2x512xf32>
    %29 = arith.mulf %27, %28 : vector<2x512xf32>
    %30 = vector.broadcast %3 : vector<1x512xf32> to vector<2x512xf32>
    %31 = arith.addf %29, %30 : vector<2x512xf32>
    %32 = vector.extract_strided_slice %0 {offsets = [4, 0, 0], sizes = [1, 2, 1], strides = [1, 1, 1]} : vector<8x2x1xf32> to vector<1x2x1xf32>
    %33 = vector.shape_cast %32 : vector<1x2x1xf32> to vector<2x1xf32>
    %34 = vector.broadcast %33 : vector<2x1xf32> to vector<2x512xf32>
    %35 = vector.broadcast %1 : vector<1x512xf32> to vector<2x512xf32>
    %36 = arith.mulf %34, %35 : vector<2x512xf32>
    %37 = vector.broadcast %3 : vector<1x512xf32> to vector<2x512xf32>
    %38 = arith.addf %36, %37 : vector<2x512xf32>
    %39 = vector.extract_strided_slice %0 {offsets = [5, 0, 0], sizes = [1, 2, 1], strides = [1, 1, 1]} : vector<8x2x1xf32> to vector<1x2x1xf32>
    %40 = vector.shape_cast %39 : vector<1x2x1xf32> to vector<2x1xf32>
    %41 = vector.broadcast %40 : vector<2x1xf32> to vector<2x512xf32>
    %42 = vector.broadcast %1 : vector<1x512xf32> to vector<2x512xf32>
    %43 = arith.mulf %41, %42 : vector<2x512xf32>
    %44 = vector.broadcast %3 : vector<1x512xf32> to vector<2x512xf32>
    %45 = arith.addf %43, %44 : vector<2x512xf32>
    %46 = vector.extract_strided_slice %0 {offsets = [6, 0, 0], sizes = [1, 2, 1], strides = [1, 1, 1]} : vector<8x2x1xf32> to vector<1x2x1xf32>
    %47 = vector.shape_cast %46 : vector<1x2x1xf32> to vector<2x1xf32>
    %48 = vector.broadcast %47 : vector<2x1xf32> to vector<2x512xf32>
    %49 = vector.broadcast %1 : vector<1x512xf32> to vector<2x512xf32>
    %50 = arith.mulf %48, %49 : vector<2x512xf32>
    %51 = vector.broadcast %3 : vector<1x512xf32> to vector<2x512xf32>
    %52 = arith.addf %50, %51 : vector<2x512xf32>
    %53 = vector.extract_strided_slice %0 {offsets = [7, 0, 0], sizes = [1, 2, 1], strides = [1, 1, 1]} : vector<8x2x1xf32> to vector<1x2x1xf32>
    %54 = vector.shape_cast %53 : vector<1x2x1xf32> to vector<2x1xf32>
    %55 = vector.broadcast %54 : vector<2x1xf32> to vector<2x512xf32>
    %56 = vector.broadcast %1 : vector<1x512xf32> to vector<2x512xf32>
    %57 = arith.mulf %55, %56 : vector<2x512xf32>
    %58 = vector.broadcast %3 : vector<1x512xf32> to vector<2x512xf32>
    %59 = arith.addf %57, %58 : vector<2x512xf32>
    %60 = vector.extract_strided_slice %0 {offsets = [0, 0, 0], sizes = [1, 2, 1], strides = [1, 1, 1]} : vector<8x2x1xf32> to vector<1x2x1xf32>
    %61 = vector.shape_cast %60 : vector<1x2x1xf32> to vector<2x1xf32>
    %62 = vector.broadcast %61 : vector<2x1xf32> to vector<2x512xf32>
    %63 = vector.broadcast %2 : vector<1x512xf32> to vector<2x512xf32>
    %64 = arith.mulf %62, %63 : vector<2x512xf32>
    %65 = vector.extract_strided_slice %0 {offsets = [1, 0, 0], sizes = [1, 2, 1], strides = [1, 1, 1]} : vector<8x2x1xf32> to vector<1x2x1xf32>
    %66 = vector.shape_cast %65 : vector<1x2x1xf32> to vector<2x1xf32>
    %67 = vector.broadcast %66 : vector<2x1xf32> to vector<2x512xf32>
    %68 = vector.broadcast %2 : vector<1x512xf32> to vector<2x512xf32>
    %69 = arith.mulf %67, %68 : vector<2x512xf32>
    %70 = vector.extract_strided_slice %0 {offsets = [2, 0, 0], sizes = [1, 2, 1], strides = [1, 1, 1]} : vector<8x2x1xf32> to vector<1x2x1xf32>
    %71 = vector.shape_cast %70 : vector<1x2x1xf32> to vector<2x1xf32>
    %72 = vector.broadcast %71 : vector<2x1xf32> to vector<2x512xf32>
    %73 = vector.broadcast %2 : vector<1x512xf32> to vector<2x512xf32>
    %74 = arith.mulf %72, %73 : vector<2x512xf32>
    %75 = vector.extract_strided_slice %0 {offsets = [3, 0, 0], sizes = [1, 2, 1], strides = [1, 1, 1]} : vector<8x2x1xf32> to vector<1x2x1xf32>
    %76 = vector.shape_cast %75 : vector<1x2x1xf32> to vector<2x1xf32>
    %77 = vector.broadcast %76 : vector<2x1xf32> to vector<2x512xf32>
    %78 = vector.broadcast %2 : vector<1x512xf32> to vector<2x512xf32>
    %79 = arith.mulf %77, %78 : vector<2x512xf32>
    %80 = vector.extract_strided_slice %0 {offsets = [4, 0, 0], sizes = [1, 2, 1], strides = [1, 1, 1]} : vector<8x2x1xf32> to vector<1x2x1xf32>
    %81 = vector.shape_cast %80 : vector<1x2x1xf32> to vector<2x1xf32>
    %82 = vector.broadcast %81 : vector<2x1xf32> to vector<2x512xf32>
    %83 = vector.broadcast %2 : vector<1x512xf32> to vector<2x512xf32>
    %84 = arith.mulf %82, %83 : vector<2x512xf32>
    %85 = vector.extract_strided_slice %0 {offsets = [5, 0, 0], sizes = [1, 2, 1], strides = [1, 1, 1]} : vector<8x2x1xf32> to vector<1x2x1xf32>
    %86 = vector.shape_cast %85 : vector<1x2x1xf32> to vector<2x1xf32>
    %87 = vector.broadcast %86 : vector<2x1xf32> to vector<2x512xf32>
    %88 = vector.broadcast %2 : vector<1x512xf32> to vector<2x512xf32>
    %89 = arith.mulf %87, %88 : vector<2x512xf32>
    %90 = vector.extract_strided_slice %0 {offsets = [6, 0, 0], sizes = [1, 2, 1], strides = [1, 1, 1]} : vector<8x2x1xf32> to vector<1x2x1xf32>
    %91 = vector.shape_cast %90 : vector<1x2x1xf32> to vector<2x1xf32>
    %92 = vector.broadcast %91 : vector<2x1xf32> to vector<2x512xf32>
    %93 = vector.broadcast %2 : vector<1x512xf32> to vector<2x512xf32>
    %94 = arith.mulf %92, %93 : vector<2x512xf32>
    %95 = vector.extract_strided_slice %0 {offsets = [7, 0, 0], sizes = [1, 2, 1], strides = [1, 1, 1]} : vector<8x2x1xf32> to vector<1x2x1xf32>
    %96 = vector.shape_cast %95 : vector<1x2x1xf32> to vector<2x1xf32>
    %97 = vector.broadcast %96 : vector<2x1xf32> to vector<2x512xf32>
    %98 = vector.broadcast %2 : vector<1x512xf32> to vector<2x512xf32>
    %99 = arith.mulf %97, %98 : vector<2x512xf32>
    %c0_8 = arith.constant 0 : index
    %c0_9 = arith.constant 0 : index
    %c0_10 = arith.constant 0 : index
    %100 = vector.load %arg8[%c0_8, %c0_9, %c0_10] : memref<2x2x128xf32, #tpu.memory_space<vmem>>, vector<1x2x128xf32>
    %101 = vector.shape_cast %100 : vector<1x2x128xf32> to vector<2x128xf32>
    %c0_11 = arith.constant 0 : index
    %c0_12 = arith.constant 0 : index
    %c0_13 = arith.constant 0 : index
    %102 = vector.load %arg9[%c0_11, %c0_12, %c0_13] : memref<2x2x128xf32, #tpu.memory_space<vmem>>, vector<1x2x128xf32>
    %103 = vector.shape_cast %102 : vector<1x2x128xf32> to vector<2x128xf32>
    %104 = arith.addf %10, %99 : vector<2x512xf32>
    %c0_14 = arith.constant 0 : index
    %c0_15 = arith.constant 0 : index
    %105 = vector.load %arg4[%c0_14, %c0_15] : memref<128x512xf32, #tpu.memory_space<vmem>>, vector<128x512xf32>
    %cst = arith.constant dense<0.000000e+00> : vector<2x512xf32>
    %106 = tpu.matmul %101, %105, %cst {dimension_numbers = #tpu.dot_dimension_numbers<[1], [0], [0], [1], [0, 0, 1, 1], [], []>} : vector<2x128xf32>, vector<128x512xf32>, vector<2x512xf32> -> vector<2x512xf32>
    %107 = arith.addf %104, %106 : vector<2x512xf32>
    %108 = vector.extract_strided_slice %107 {offsets = [0, 0], sizes = [2, 128], strides = [1, 1]} : vector<2x512xf32> to vector<2x128xf32>
    %109 = arith.negf %108 : vector<2x128xf32>
    %110 = math.exp %109 : vector<2x128xf32>
    %cst_16 = arith.constant 1.000000e+00 : f32
    %111 = vector.broadcast %cst_16 : f32 to vector<2x128xf32>
    %112 = arith.addf %111, %110 : vector<2x128xf32>
    %113 = arith.divf %111, %112 : vector<2x128xf32>
    %114 = vector.extract_strided_slice %107 {offsets = [0, 128], sizes = [2, 128], strides = [1, 1]} : vector<2x512xf32> to vector<2x128xf32>
    %115 = arith.negf %114 : vector<2x128xf32>
    %116 = math.exp %115 : vector<2x128xf32>
    %cst_17 = arith.constant 1.000000e+00 : f32
    %117 = vector.broadcast %cst_17 : f32 to vector<2x128xf32>
    %118 = arith.addf %117, %116 : vector<2x128xf32>
    %119 = arith.divf %117, %118 : vector<2x128xf32>
    %120 = vector.extract_strided_slice %107 {offsets = [0, 256], sizes = [2, 128], strides = [1, 1]} : vector<2x512xf32> to vector<2x128xf32>
    %121 = math.tanh %120 : vector<2x128xf32>
    %122 = vector.extract_strided_slice %107 {offsets = [0, 384], sizes = [2, 128], strides = [1, 1]} : vector<2x512xf32> to vector<2x128xf32>
    %123 = arith.negf %122 : vector<2x128xf32>
    %124 = math.exp %123 : vector<2x128xf32>
    %cst_18 = arith.constant 1.000000e+00 : f32
    %125 = vector.broadcast %cst_18 : f32 to vector<2x128xf32>
    %126 = arith.addf %125, %124 : vector<2x128xf32>
    %127 = arith.divf %125, %126 : vector<2x128xf32>
    %128 = arith.mulf %119, %103 : vector<2x128xf32>
    %129 = arith.mulf %113, %121 : vector<2x128xf32>
    %130 = arith.addf %128, %129 : vector<2x128xf32>
    %131 = math.tanh %130 : vector<2x128xf32>
    %132 = arith.mulf %127, %131 : vector<2x128xf32>
    %133 = vector.extract_strided_slice %132 {offsets = [0, 0], sizes = [2, 64], strides = [1, 1]} : vector<2x128xf32> to vector<2x64xf32>
    %134 = vector.extract_strided_slice %132 {offsets = [0, 64], sizes = [2, 64], strides = [1, 1]} : vector<2x128xf32> to vector<2x64xf32>
    %135 = arith.addf %17, %94 : vector<2x512xf32>
    %c0_19 = arith.constant 0 : index
    %c0_20 = arith.constant 0 : index
    %136 = vector.load %arg4[%c0_19, %c0_20] : memref<128x512xf32, #tpu.memory_space<vmem>>, vector<128x512xf32>
    %cst_21 = arith.constant dense<0.000000e+00> : vector<2x512xf32>
    %137 = tpu.matmul %132, %136, %cst_21 {dimension_numbers = #tpu.dot_dimension_numbers<[1], [0], [0], [1], [0, 0, 1, 1], [], []>} : vector<2x128xf32>, vector<128x512xf32>, vector<2x512xf32> -> vector<2x512xf32>
    %138 = arith.addf %135, %137 : vector<2x512xf32>
    %139 = vector.extract_strided_slice %138 {offsets = [0, 0], sizes = [2, 128], strides = [1, 1]} : vector<2x512xf32> to vector<2x128xf32>
    %140 = arith.negf %139 : vector<2x128xf32>
    %141 = math.exp %140 : vector<2x128xf32>
    %cst_22 = arith.constant 1.000000e+00 : f32
    %142 = vector.broadcast %cst_22 : f32 to vector<2x128xf32>
    %143 = arith.addf %142, %141 : vector<2x128xf32>
    %144 = arith.divf %142, %143 : vector<2x128xf32>
    %145 = vector.extract_strided_slice %138 {offsets = [0, 128], sizes = [2, 128], strides = [1, 1]} : vector<2x512xf32> to vector<2x128xf32>
    %146 = arith.negf %145 : vector<2x128xf32>
    %147 = math.exp %146 : vector<2x128xf32>
    %cst_23 = arith.constant 1.000000e+00 : f32
    %148 = vector.broadcast %cst_23 : f32 to vector<2x128xf32>
    %149 = arith.addf %148, %147 : vector<2x128xf32>
    %150 = arith.divf %148, %149 : vector<2x128xf32>
    %151 = vector.extract_strided_slice %138 {offsets = [0, 256], sizes = [2, 128], strides = [1, 1]} : vector<2x512xf32> to vector<2x128xf32>
    %152 = math.tanh %151 : vector<2x128xf32>
    %153 = vector.extract_strided_slice %138 {offsets = [0, 384], sizes = [2, 128], strides = [1, 1]} : vector<2x512xf32> to vector<2x128xf32>
    %154 = arith.negf %153 : vector<2x128xf32>
    %155 = math.exp %154 : vector<2x128xf32>
    %cst_24 = arith.constant 1.000000e+00 : f32
    %156 = vector.broadcast %cst_24 : f32 to vector<2x128xf32>
    %157 = arith.addf %156, %155 : vector<2x128xf32>
    %158 = arith.divf %156, %157 : vector<2x128xf32>
    %159 = arith.mulf %150, %130 : vector<2x128xf32>
    %160 = arith.mulf %144, %152 : vector<2x128xf32>
    %161 = arith.addf %159, %160 : vector<2x128xf32>
    %162 = math.tanh %161 : vector<2x128xf32>
    %163 = arith.mulf %158, %162 : vector<2x128xf32>
    %164 = vector.extract_strided_slice %163 {offsets = [0, 0], sizes = [2, 64], strides = [1, 1]} : vector<2x128xf32> to vector<2x64xf32>
    %165 = vector.extract_strided_slice %163 {offsets = [0, 64], sizes = [2, 64], strides = [1, 1]} : vector<2x128xf32> to vector<2x64xf32>
    %166 = arith.addf %24, %89 : vector<2x512xf32>
    %c0_25 = arith.constant 0 : index
    %c0_26 = arith.constant 0 : index
    %167 = vector.load %arg4[%c0_25, %c0_26] : memref<128x512xf32, #tpu.memory_space<vmem>>, vector<128x512xf32>
    %cst_27 = arith.constant dense<0.000000e+00> : vector<2x512xf32>
    %168 = tpu.matmul %163, %167, %cst_27 {dimension_numbers = #tpu.dot_dimension_numbers<[1], [0], [0], [1], [0, 0, 1, 1], [], []>} : vector<2x128xf32>, vector<128x512xf32>, vector<2x512xf32> -> vector<2x512xf32>
    %169 = arith.addf %166, %168 : vector<2x512xf32>
    %170 = vector.extract_strided_slice %169 {offsets = [0, 0], sizes = [2, 128], strides = [1, 1]} : vector<2x512xf32> to vector<2x128xf32>
    %171 = arith.negf %170 : vector<2x128xf32>
    %172 = math.exp %171 : vector<2x128xf32>
    %cst_28 = arith.constant 1.000000e+00 : f32
    %173 = vector.broadcast %cst_28 : f32 to vector<2x128xf32>
    %174 = arith.addf %173, %172 : vector<2x128xf32>
    %175 = arith.divf %173, %174 : vector<2x128xf32>
    %176 = vector.extract_strided_slice %169 {offsets = [0, 128], sizes = [2, 128], strides = [1, 1]} : vector<2x512xf32> to vector<2x128xf32>
    %177 = arith.negf %176 : vector<2x128xf32>
    %178 = math.exp %177 : vector<2x128xf32>
    %cst_29 = arith.constant 1.000000e+00 : f32
    %179 = vector.broadcast %cst_29 : f32 to vector<2x128xf32>
    %180 = arith.addf %179, %178 : vector<2x128xf32>
    %181 = arith.divf %179, %180 : vector<2x128xf32>
    %182 = vector.extract_strided_slice %169 {offsets = [0, 256], sizes = [2, 128], strides = [1, 1]} : vector<2x512xf32> to vector<2x128xf32>
    %183 = math.tanh %182 : vector<2x128xf32>
    %184 = vector.extract_strided_slice %169 {offsets = [0, 384], sizes = [2, 128], strides = [1, 1]} : vector<2x512xf32> to vector<2x128xf32>
    %185 = arith.negf %184 : vector<2x128xf32>
    %186 = math.exp %185 : vector<2x128xf32>
    %cst_30 = arith.constant 1.000000e+00 : f32
    %187 = vector.broadcast %cst_30 : f32 to vector<2x128xf32>
    %188 = arith.addf %187, %186 : vector<2x128xf32>
    %189 = arith.divf %187, %188 : vector<2x128xf32>
    %190 = arith.mulf %181, %161 : vector<2x128xf32>
    %191 = arith.mulf %175, %183 : vector<2x128xf32>
    %192 = arith.addf %190, %191 : vector<2x128xf32>
    %193 = math.tanh %192 : vector<2x128xf32>
    %194 = arith.mulf %189, %193 : vector<2x128xf32>
    %195 = vector.extract_strided_slice %194 {offsets = [0, 0], sizes = [2, 64], strides = [1, 1]} : vector<2x128xf32> to vector<2x64xf32>
    %196 = vector.extract_strided_slice %194 {offsets = [0, 64], sizes = [2, 64], strides = [1, 1]} : vector<2x128xf32> to vector<2x64xf32>
    %197 = arith.addf %31, %84 : vector<2x512xf32>
    %c0_31 = arith.constant 0 : index
    %c0_32 = arith.constant 0 : index
    %198 = vector.load %arg4[%c0_31, %c0_32] : memref<128x512xf32, #tpu.memory_space<vmem>>, vector<128x512xf32>
    %cst_33 = arith.constant dense<0.000000e+00> : vector<2x512xf32>
    %199 = tpu.matmul %194, %198, %cst_33 {dimension_numbers = #tpu.dot_dimension_numbers<[1], [0], [0], [1], [0, 0, 1, 1], [], []>} : vector<2x128xf32>, vector<128x512xf32>, vector<2x512xf32> -> vector<2x512xf32>
    %200 = arith.addf %197, %199 : vector<2x512xf32>
    %201 = vector.extract_strided_slice %200 {offsets = [0, 0], sizes = [2, 128], strides = [1, 1]} : vector<2x512xf32> to vector<2x128xf32>
    %202 = arith.negf %201 : vector<2x128xf32>
    %203 = math.exp %202 : vector<2x128xf32>
    %cst_34 = arith.constant 1.000000e+00 : f32
    %204 = vector.broadcast %cst_34 : f32 to vector<2x128xf32>
    %205 = arith.addf %204, %203 : vector<2x128xf32>
    %206 = arith.divf %204, %205 : vector<2x128xf32>
    %207 = vector.extract_strided_slice %200 {offsets = [0, 128], sizes = [2, 128], strides = [1, 1]} : vector<2x512xf32> to vector<2x128xf32>
    %208 = arith.negf %207 : vector<2x128xf32>
    %209 = math.exp %208 : vector<2x128xf32>
    %cst_35 = arith.constant 1.000000e+00 : f32
    %210 = vector.broadcast %cst_35 : f32 to vector<2x128xf32>
    %211 = arith.addf %210, %209 : vector<2x128xf32>
    %212 = arith.divf %210, %211 : vector<2x128xf32>
    %213 = vector.extract_strided_slice %200 {offsets = [0, 256], sizes = [2, 128], strides = [1, 1]} : vector<2x512xf32> to vector<2x128xf32>
    %214 = math.tanh %213 : vector<2x128xf32>
    %215 = vector.extract_strided_slice %200 {offsets = [0, 384], sizes = [2, 128], strides = [1, 1]} : vector<2x512xf32> to vector<2x128xf32>
    %216 = arith.negf %215 : vector<2x128xf32>
    %217 = math.exp %216 : vector<2x128xf32>
    %cst_36 = arith.constant 1.000000e+00 : f32
    %218 = vector.broadcast %cst_36 : f32 to vector<2x128xf32>
    %219 = arith.addf %218, %217 : vector<2x128xf32>
    %220 = arith.divf %218, %219 : vector<2x128xf32>
    %221 = arith.mulf %212, %192 : vector<2x128xf32>
    %222 = arith.mulf %206, %214 : vector<2x128xf32>
    %223 = arith.addf %221, %222 : vector<2x128xf32>
    %224 = math.tanh %223 : vector<2x128xf32>
    %225 = arith.mulf %220, %224 : vector<2x128xf32>
    %226 = vector.extract_strided_slice %225 {offsets = [0, 0], sizes = [2, 64], strides = [1, 1]} : vector<2x128xf32> to vector<2x64xf32>
    %227 = vector.extract_strided_slice %225 {offsets = [0, 64], sizes = [2, 64], strides = [1, 1]} : vector<2x128xf32> to vector<2x64xf32>
    %228 = arith.addf %38, %79 : vector<2x512xf32>
    %c0_37 = arith.constant 0 : index
    %c0_38 = arith.constant 0 : index
    %229 = vector.load %arg4[%c0_37, %c0_38] : memref<128x512xf32, #tpu.memory_space<vmem>>, vector<128x512xf32>
    %cst_39 = arith.constant dense<0.000000e+00> : vector<2x512xf32>
    %230 = tpu.matmul %225, %229, %cst_39 {dimension_numbers = #tpu.dot_dimension_numbers<[1], [0], [0], [1], [0, 0, 1, 1], [], []>} : vector<2x128xf32>, vector<128x512xf32>, vector<2x512xf32> -> vector<2x512xf32>
    %231 = arith.addf %228, %230 : vector<2x512xf32>
    %232 = vector.extract_strided_slice %231 {offsets = [0, 0], sizes = [2, 128], strides = [1, 1]} : vector<2x512xf32> to vector<2x128xf32>
    %233 = arith.negf %232 : vector<2x128xf32>
    %234 = math.exp %233 : vector<2x128xf32>
    %cst_40 = arith.constant 1.000000e+00 : f32
    %235 = vector.broadcast %cst_40 : f32 to vector<2x128xf32>
    %236 = arith.addf %235, %234 : vector<2x128xf32>
    %237 = arith.divf %235, %236 : vector<2x128xf32>
    %238 = vector.extract_strided_slice %231 {offsets = [0, 128], sizes = [2, 128], strides = [1, 1]} : vector<2x512xf32> to vector<2x128xf32>
    %239 = arith.negf %238 : vector<2x128xf32>
    %240 = math.exp %239 : vector<2x128xf32>
    %cst_41 = arith.constant 1.000000e+00 : f32
    %241 = vector.broadcast %cst_41 : f32 to vector<2x128xf32>
    %242 = arith.addf %241, %240 : vector<2x128xf32>
    %243 = arith.divf %241, %242 : vector<2x128xf32>
    %244 = vector.extract_strided_slice %231 {offsets = [0, 256], sizes = [2, 128], strides = [1, 1]} : vector<2x512xf32> to vector<2x128xf32>
    %245 = math.tanh %244 : vector<2x128xf32>
    %246 = vector.extract_strided_slice %231 {offsets = [0, 384], sizes = [2, 128], strides = [1, 1]} : vector<2x512xf32> to vector<2x128xf32>
    %247 = arith.negf %246 : vector<2x128xf32>
    %248 = math.exp %247 : vector<2x128xf32>
    %cst_42 = arith.constant 1.000000e+00 : f32
    %249 = vector.broadcast %cst_42 : f32 to vector<2x128xf32>
    %250 = arith.addf %249, %248 : vector<2x128xf32>
    %251 = arith.divf %249, %250 : vector<2x128xf32>
    %252 = arith.mulf %243, %223 : vector<2x128xf32>
    %253 = arith.mulf %237, %245 : vector<2x128xf32>
    %254 = arith.addf %252, %253 : vector<2x128xf32>
    %255 = math.tanh %254 : vector<2x128xf32>
    %256 = arith.mulf %251, %255 : vector<2x128xf32>
    %257 = vector.extract_strided_slice %256 {offsets = [0, 0], sizes = [2, 64], strides = [1, 1]} : vector<2x128xf32> to vector<2x64xf32>
    %258 = vector.extract_strided_slice %256 {offsets = [0, 64], sizes = [2, 64], strides = [1, 1]} : vector<2x128xf32> to vector<2x64xf32>
    %259 = arith.addf %45, %74 : vector<2x512xf32>
    %c0_43 = arith.constant 0 : index
    %c0_44 = arith.constant 0 : index
    %260 = vector.load %arg4[%c0_43, %c0_44] : memref<128x512xf32, #tpu.memory_space<vmem>>, vector<128x512xf32>
    %cst_45 = arith.constant dense<0.000000e+00> : vector<2x512xf32>
    %261 = tpu.matmul %256, %260, %cst_45 {dimension_numbers = #tpu.dot_dimension_numbers<[1], [0], [0], [1], [0, 0, 1, 1], [], []>} : vector<2x128xf32>, vector<128x512xf32>, vector<2x512xf32> -> vector<2x512xf32>
    %262 = arith.addf %259, %261 : vector<2x512xf32>
    %263 = vector.extract_strided_slice %262 {offsets = [0, 0], sizes = [2, 128], strides = [1, 1]} : vector<2x512xf32> to vector<2x128xf32>
    %264 = arith.negf %263 : vector<2x128xf32>
    %265 = math.exp %264 : vector<2x128xf32>
    %cst_46 = arith.constant 1.000000e+00 : f32
    %266 = vector.broadcast %cst_46 : f32 to vector<2x128xf32>
    %267 = arith.addf %266, %265 : vector<2x128xf32>
    %268 = arith.divf %266, %267 : vector<2x128xf32>
    %269 = vector.extract_strided_slice %262 {offsets = [0, 128], sizes = [2, 128], strides = [1, 1]} : vector<2x512xf32> to vector<2x128xf32>
    %270 = arith.negf %269 : vector<2x128xf32>
    %271 = math.exp %270 : vector<2x128xf32>
    %cst_47 = arith.constant 1.000000e+00 : f32
    %272 = vector.broadcast %cst_47 : f32 to vector<2x128xf32>
    %273 = arith.addf %272, %271 : vector<2x128xf32>
    %274 = arith.divf %272, %273 : vector<2x128xf32>
    %275 = vector.extract_strided_slice %262 {offsets = [0, 256], sizes = [2, 128], strides = [1, 1]} : vector<2x512xf32> to vector<2x128xf32>
    %276 = math.tanh %275 : vector<2x128xf32>
    %277 = vector.extract_strided_slice %262 {offsets = [0, 384], sizes = [2, 128], strides = [1, 1]} : vector<2x512xf32> to vector<2x128xf32>
    %278 = arith.negf %277 : vector<2x128xf32>
    %279 = math.exp %278 : vector<2x128xf32>
    %cst_48 = arith.constant 1.000000e+00 : f32
    %280 = vector.broadcast %cst_48 : f32 to vector<2x128xf32>
    %281 = arith.addf %280, %279 : vector<2x128xf32>
    %282 = arith.divf %280, %281 : vector<2x128xf32>
    %283 = arith.mulf %274, %254 : vector<2x128xf32>
    %284 = arith.mulf %268, %276 : vector<2x128xf32>
    %285 = arith.addf %283, %284 : vector<2x128xf32>
    %286 = math.tanh %285 : vector<2x128xf32>
    %287 = arith.mulf %282, %286 : vector<2x128xf32>
    %288 = vector.extract_strided_slice %287 {offsets = [0, 0], sizes = [2, 64], strides = [1, 1]} : vector<2x128xf32> to vector<2x64xf32>
    %289 = vector.extract_strided_slice %287 {offsets = [0, 64], sizes = [2, 64], strides = [1, 1]} : vector<2x128xf32> to vector<2x64xf32>
    %290 = arith.addf %52, %69 : vector<2x512xf32>
    %c0_49 = arith.constant 0 : index
    %c0_50 = arith.constant 0 : index
    %291 = vector.load %arg4[%c0_49, %c0_50] : memref<128x512xf32, #tpu.memory_space<vmem>>, vector<128x512xf32>
    %cst_51 = arith.constant dense<0.000000e+00> : vector<2x512xf32>
    %292 = tpu.matmul %287, %291, %cst_51 {dimension_numbers = #tpu.dot_dimension_numbers<[1], [0], [0], [1], [0, 0, 1, 1], [], []>} : vector<2x128xf32>, vector<128x512xf32>, vector<2x512xf32> -> vector<2x512xf32>
    %293 = arith.addf %290, %292 : vector<2x512xf32>
    %294 = vector.extract_strided_slice %293 {offsets = [0, 0], sizes = [2, 128], strides = [1, 1]} : vector<2x512xf32> to vector<2x128xf32>
    %295 = arith.negf %294 : vector<2x128xf32>
    %296 = math.exp %295 : vector<2x128xf32>
    %cst_52 = arith.constant 1.000000e+00 : f32
    %297 = vector.broadcast %cst_52 : f32 to vector<2x128xf32>
    %298 = arith.addf %297, %296 : vector<2x128xf32>
    %299 = arith.divf %297, %298 : vector<2x128xf32>
    %300 = vector.extract_strided_slice %293 {offsets = [0, 128], sizes = [2, 128], strides = [1, 1]} : vector<2x512xf32> to vector<2x128xf32>
    %301 = arith.negf %300 : vector<2x128xf32>
    %302 = math.exp %301 : vector<2x128xf32>
    %cst_53 = arith.constant 1.000000e+00 : f32
    %303 = vector.broadcast %cst_53 : f32 to vector<2x128xf32>
    %304 = arith.addf %303, %302 : vector<2x128xf32>
    %305 = arith.divf %303, %304 : vector<2x128xf32>
    %306 = vector.extract_strided_slice %293 {offsets = [0, 256], sizes = [2, 128], strides = [1, 1]} : vector<2x512xf32> to vector<2x128xf32>
    %307 = math.tanh %306 : vector<2x128xf32>
    %308 = vector.extract_strided_slice %293 {offsets = [0, 384], sizes = [2, 128], strides = [1, 1]} : vector<2x512xf32> to vector<2x128xf32>
    %309 = arith.negf %308 : vector<2x128xf32>
    %310 = math.exp %309 : vector<2x128xf32>
    %cst_54 = arith.constant 1.000000e+00 : f32
    %311 = vector.broadcast %cst_54 : f32 to vector<2x128xf32>
    %312 = arith.addf %311, %310 : vector<2x128xf32>
    %313 = arith.divf %311, %312 : vector<2x128xf32>
    %314 = arith.mulf %305, %285 : vector<2x128xf32>
    %315 = arith.mulf %299, %307 : vector<2x128xf32>
    %316 = arith.addf %314, %315 : vector<2x128xf32>
    %317 = math.tanh %316 : vector<2x128xf32>
    %318 = arith.mulf %313, %317 : vector<2x128xf32>
    %319 = vector.extract_strided_slice %318 {offsets = [0, 0], sizes = [2, 64], strides = [1, 1]} : vector<2x128xf32> to vector<2x64xf32>
    %320 = vector.extract_strided_slice %318 {offsets = [0, 64], sizes = [2, 64], strides = [1, 1]} : vector<2x128xf32> to vector<2x64xf32>
    %321 = arith.addf %59, %64 : vector<2x512xf32>
    %c0_55 = arith.constant 0 : index
    %c0_56 = arith.constant 0 : index
    %322 = vector.load %arg4[%c0_55, %c0_56] : memref<128x512xf32, #tpu.memory_space<vmem>>, vector<128x512xf32>
    %cst_57 = arith.constant dense<0.000000e+00> : vector<2x512xf32>
    %323 = tpu.matmul %318, %322, %cst_57 {dimension_numbers = #tpu.dot_dimension_numbers<[1], [0], [0], [1], [0, 0, 1, 1], [], []>} : vector<2x128xf32>, vector<128x512xf32>, vector<2x512xf32> -> vector<2x512xf32>
    %324 = arith.addf %321, %323 : vector<2x512xf32>
    %325 = vector.extract_strided_slice %324 {offsets = [0, 0], sizes = [2, 128], strides = [1, 1]} : vector<2x512xf32> to vector<2x128xf32>
    %326 = arith.negf %325 : vector<2x128xf32>
    %327 = math.exp %326 : vector<2x128xf32>
    %cst_58 = arith.constant 1.000000e+00 : f32
    %328 = vector.broadcast %cst_58 : f32 to vector<2x128xf32>
    %329 = arith.addf %328, %327 : vector<2x128xf32>
    %330 = arith.divf %328, %329 : vector<2x128xf32>
    %331 = vector.extract_strided_slice %324 {offsets = [0, 128], sizes = [2, 128], strides = [1, 1]} : vector<2x512xf32> to vector<2x128xf32>
    %332 = arith.negf %331 : vector<2x128xf32>
    %333 = math.exp %332 : vector<2x128xf32>
    %cst_59 = arith.constant 1.000000e+00 : f32
    %334 = vector.broadcast %cst_59 : f32 to vector<2x128xf32>
    %335 = arith.addf %334, %333 : vector<2x128xf32>
    %336 = arith.divf %334, %335 : vector<2x128xf32>
    %337 = vector.extract_strided_slice %324 {offsets = [0, 256], sizes = [2, 128], strides = [1, 1]} : vector<2x512xf32> to vector<2x128xf32>
    %338 = math.tanh %337 : vector<2x128xf32>
    %339 = vector.extract_strided_slice %324 {offsets = [0, 384], sizes = [2, 128], strides = [1, 1]} : vector<2x512xf32> to vector<2x128xf32>
    %340 = arith.negf %339 : vector<2x128xf32>
    %341 = math.exp %340 : vector<2x128xf32>
    %cst_60 = arith.constant 1.000000e+00 : f32
    %342 = vector.broadcast %cst_60 : f32 to vector<2x128xf32>
    %343 = arith.addf %342, %341 : vector<2x128xf32>
    %344 = arith.divf %342, %343 : vector<2x128xf32>
    %345 = arith.mulf %336, %316 : vector<2x128xf32>
    %346 = arith.mulf %330, %338 : vector<2x128xf32>
    %347 = arith.addf %345, %346 : vector<2x128xf32>
    %348 = math.tanh %347 : vector<2x128xf32>
    %349 = arith.mulf %344, %348 : vector<2x128xf32>
    %350 = vector.extract_strided_slice %349 {offsets = [0, 0], sizes = [2, 64], strides = [1, 1]} : vector<2x128xf32> to vector<2x64xf32>
    %351 = vector.extract_strided_slice %349 {offsets = [0, 64], sizes = [2, 64], strides = [1, 1]} : vector<2x128xf32> to vector<2x64xf32>
    %352 = tpu.concatenate %133, %351 in 1 : vector<2x64xf32>, vector<2x64xf32> -> vector<2x128xf32>
    %353 = tpu.concatenate %164, %320 in 1 : vector<2x64xf32>, vector<2x64xf32> -> vector<2x128xf32>
    %354 = tpu.concatenate %195, %289 in 1 : vector<2x64xf32>, vector<2x64xf32> -> vector<2x128xf32>
    %355 = tpu.concatenate %226, %258 in 1 : vector<2x64xf32>, vector<2x64xf32> -> vector<2x128xf32>
    %356 = tpu.concatenate %257, %227 in 1 : vector<2x64xf32>, vector<2x64xf32> -> vector<2x128xf32>
    %357 = tpu.concatenate %288, %196 in 1 : vector<2x64xf32>, vector<2x64xf32> -> vector<2x128xf32>
    %358 = tpu.concatenate %319, %165 in 1 : vector<2x64xf32>, vector<2x64xf32> -> vector<2x128xf32>
    %359 = tpu.concatenate %350, %134 in 1 : vector<2x64xf32>, vector<2x64xf32> -> vector<2x128xf32>
    %360 = tpu.concatenate %352, %353, %354, %355, %356, %357, %358, %359 in 0 : vector<2x128xf32>, vector<2x128xf32>, vector<2x128xf32>, vector<2x128xf32>, vector<2x128xf32>, vector<2x128xf32>, vector<2x128xf32>, vector<2x128xf32> -> vector<16x128xf32>
    %c0_61 = arith.constant 0 : index
    %c0_62 = arith.constant 0 : index
    %361 = vector.load %arg5[%c0_61, %c0_62] : memref<128x1024xf32, #tpu.memory_space<vmem>>, vector<128x1024xf32>
    %cst_63 = arith.constant dense<0.000000e+00> : vector<16x1024xf32>
    %362 = tpu.matmul %360, %361, %cst_63 {dimension_numbers = #tpu.dot_dimension_numbers<[1], [0], [0], [1], [0, 0, 1, 1], [], []>} : vector<16x128xf32>, vector<128x1024xf32>, vector<16x1024xf32> -> vector<16x1024xf32>
    %c0_64 = arith.constant 0 : index
    %c0_65 = arith.constant 0 : index
    %363 = vector.load %arg6[%c0_64, %c0_65] : memref<1x512xf32, #tpu.memory_space<vmem>>, vector<1x512xf32>
    %364 = vector.extract_strided_slice %362 {offsets = [0, 0], sizes = [2, 512], strides = [1, 1]} : vector<16x1024xf32> to vector<2x512xf32>
    %365 = vector.broadcast %363 : vector<1x512xf32> to vector<2x512xf32>
    %366 = arith.addf %364, %365 : vector<2x512xf32>
    %367 = vector.extract_strided_slice %362 {offsets = [2, 0], sizes = [2, 512], strides = [1, 1]} : vector<16x1024xf32> to vector<2x512xf32>
    %368 = vector.broadcast %363 : vector<1x512xf32> to vector<2x512xf32>
    %369 = arith.addf %367, %368 : vector<2x512xf32>
    %370 = vector.extract_strided_slice %362 {offsets = [4, 0], sizes = [2, 512], strides = [1, 1]} : vector<16x1024xf32> to vector<2x512xf32>
    %371 = vector.broadcast %363 : vector<1x512xf32> to vector<2x512xf32>
    %372 = arith.addf %370, %371 : vector<2x512xf32>
    %373 = vector.extract_strided_slice %362 {offsets = [6, 0], sizes = [2, 512], strides = [1, 1]} : vector<16x1024xf32> to vector<2x512xf32>
    %374 = vector.broadcast %363 : vector<1x512xf32> to vector<2x512xf32>
    %375 = arith.addf %373, %374 : vector<2x512xf32>
    %376 = vector.extract_strided_slice %362 {offsets = [8, 0], sizes = [2, 512], strides = [1, 1]} : vector<16x1024xf32> to vector<2x512xf32>
    %377 = vector.broadcast %363 : vector<1x512xf32> to vector<2x512xf32>
    %378 = arith.addf %376, %377 : vector<2x512xf32>
    %379 = vector.extract_strided_slice %362 {offsets = [10, 0], sizes = [2, 512], strides = [1, 1]} : vector<16x1024xf32> to vector<2x512xf32>
    %380 = vector.broadcast %363 : vector<1x512xf32> to vector<2x512xf32>
    %381 = arith.addf %379, %380 : vector<2x512xf32>
    %382 = vector.extract_strided_slice %362 {offsets = [12, 0], sizes = [2, 512], strides = [1, 1]} : vector<16x1024xf32> to vector<2x512xf32>
    %383 = vector.broadcast %363 : vector<1x512xf32> to vector<2x512xf32>
    %384 = arith.addf %382, %383 : vector<2x512xf32>
    %385 = vector.extract_strided_slice %362 {offsets = [14, 0], sizes = [2, 512], strides = [1, 1]} : vector<16x1024xf32> to vector<2x512xf32>
    %386 = vector.broadcast %363 : vector<1x512xf32> to vector<2x512xf32>
    %387 = arith.addf %385, %386 : vector<2x512xf32>
    %388 = vector.extract_strided_slice %362 {offsets = [0, 512], sizes = [2, 512], strides = [1, 1]} : vector<16x1024xf32> to vector<2x512xf32>
    %389 = vector.extract_strided_slice %362 {offsets = [2, 512], sizes = [2, 512], strides = [1, 1]} : vector<16x1024xf32> to vector<2x512xf32>
    %390 = vector.extract_strided_slice %362 {offsets = [4, 512], sizes = [2, 512], strides = [1, 1]} : vector<16x1024xf32> to vector<2x512xf32>
    %391 = vector.extract_strided_slice %362 {offsets = [6, 512], sizes = [2, 512], strides = [1, 1]} : vector<16x1024xf32> to vector<2x512xf32>
    %392 = vector.extract_strided_slice %362 {offsets = [8, 512], sizes = [2, 512], strides = [1, 1]} : vector<16x1024xf32> to vector<2x512xf32>
    %393 = vector.extract_strided_slice %362 {offsets = [10, 512], sizes = [2, 512], strides = [1, 1]} : vector<16x1024xf32> to vector<2x512xf32>
    %394 = vector.extract_strided_slice %362 {offsets = [12, 512], sizes = [2, 512], strides = [1, 1]} : vector<16x1024xf32> to vector<2x512xf32>
    %395 = vector.extract_strided_slice %362 {offsets = [14, 512], sizes = [2, 512], strides = [1, 1]} : vector<16x1024xf32> to vector<2x512xf32>
    %c1 = arith.constant 1 : index
    %c0_66 = arith.constant 0 : index
    %c0_67 = arith.constant 0 : index
    %396 = vector.load %arg8[%c1, %c0_66, %c0_67] : memref<2x2x128xf32, #tpu.memory_space<vmem>>, vector<1x2x128xf32>
    %397 = vector.shape_cast %396 : vector<1x2x128xf32> to vector<2x128xf32>
    %c1_68 = arith.constant 1 : index
    %c0_69 = arith.constant 0 : index
    %c0_70 = arith.constant 0 : index
    %398 = vector.load %arg9[%c1_68, %c0_69, %c0_70] : memref<2x2x128xf32, #tpu.memory_space<vmem>>, vector<1x2x128xf32>
    %399 = vector.shape_cast %398 : vector<1x2x128xf32> to vector<2x128xf32>
    %400 = arith.addf %366, %395 : vector<2x512xf32>
    %c0_71 = arith.constant 0 : index
    %c0_72 = arith.constant 0 : index
    %401 = vector.load %arg7[%c0_71, %c0_72] : memref<128x512xf32, #tpu.memory_space<vmem>>, vector<128x512xf32>
    %cst_73 = arith.constant dense<0.000000e+00> : vector<2x512xf32>
    %402 = tpu.matmul %397, %401, %cst_73 {dimension_numbers = #tpu.dot_dimension_numbers<[1], [0], [0], [1], [0, 0, 1, 1], [], []>} : vector<2x128xf32>, vector<128x512xf32>, vector<2x512xf32> -> vector<2x512xf32>
    %403 = arith.addf %400, %402 : vector<2x512xf32>
    %404 = vector.extract_strided_slice %403 {offsets = [0, 0], sizes = [2, 128], strides = [1, 1]} : vector<2x512xf32> to vector<2x128xf32>
    %405 = arith.negf %404 : vector<2x128xf32>
    %406 = math.exp %405 : vector<2x128xf32>
    %cst_74 = arith.constant 1.000000e+00 : f32
    %407 = vector.broadcast %cst_74 : f32 to vector<2x128xf32>
    %408 = arith.addf %407, %406 : vector<2x128xf32>
    %409 = arith.divf %407, %408 : vector<2x128xf32>
    %410 = vector.extract_strided_slice %403 {offsets = [0, 128], sizes = [2, 128], strides = [1, 1]} : vector<2x512xf32> to vector<2x128xf32>
    %411 = arith.negf %410 : vector<2x128xf32>
    %412 = math.exp %411 : vector<2x128xf32>
    %cst_75 = arith.constant 1.000000e+00 : f32
    %413 = vector.broadcast %cst_75 : f32 to vector<2x128xf32>
    %414 = arith.addf %413, %412 : vector<2x128xf32>
    %415 = arith.divf %413, %414 : vector<2x128xf32>
    %416 = vector.extract_strided_slice %403 {offsets = [0, 256], sizes = [2, 128], strides = [1, 1]} : vector<2x512xf32> to vector<2x128xf32>
    %417 = math.tanh %416 : vector<2x128xf32>
    %418 = vector.extract_strided_slice %403 {offsets = [0, 384], sizes = [2, 128], strides = [1, 1]} : vector<2x512xf32> to vector<2x128xf32>
    %419 = arith.negf %418 : vector<2x128xf32>
    %420 = math.exp %419 : vector<2x128xf32>
    %cst_76 = arith.constant 1.000000e+00 : f32
    %421 = vector.broadcast %cst_76 : f32 to vector<2x128xf32>
    %422 = arith.addf %421, %420 : vector<2x128xf32>
    %423 = arith.divf %421, %422 : vector<2x128xf32>
    %424 = arith.mulf %415, %399 : vector<2x128xf32>
    %425 = arith.mulf %409, %417 : vector<2x128xf32>
    %426 = arith.addf %424, %425 : vector<2x128xf32>
    %427 = math.tanh %426 : vector<2x128xf32>
    %428 = arith.mulf %423, %427 : vector<2x128xf32>
    %429 = vector.extract_strided_slice %428 {offsets = [0, 64], sizes = [2, 64], strides = [1, 1]} : vector<2x128xf32> to vector<2x64xf32>
    %430 = arith.addf %369, %394 : vector<2x512xf32>
    %c0_77 = arith.constant 0 : index
    %c0_78 = arith.constant 0 : index
    %431 = vector.load %arg7[%c0_77, %c0_78] : memref<128x512xf32, #tpu.memory_space<vmem>>, vector<128x512xf32>
    %cst_79 = arith.constant dense<0.000000e+00> : vector<2x512xf32>
    %432 = tpu.matmul %428, %431, %cst_79 {dimension_numbers = #tpu.dot_dimension_numbers<[1], [0], [0], [1], [0, 0, 1, 1], [], []>} : vector<2x128xf32>, vector<128x512xf32>, vector<2x512xf32> -> vector<2x512xf32>
    %433 = arith.addf %430, %432 : vector<2x512xf32>
    %434 = vector.extract_strided_slice %433 {offsets = [0, 0], sizes = [2, 128], strides = [1, 1]} : vector<2x512xf32> to vector<2x128xf32>
    %435 = arith.negf %434 : vector<2x128xf32>
    %436 = math.exp %435 : vector<2x128xf32>
    %cst_80 = arith.constant 1.000000e+00 : f32
    %437 = vector.broadcast %cst_80 : f32 to vector<2x128xf32>
    %438 = arith.addf %437, %436 : vector<2x128xf32>
    %439 = arith.divf %437, %438 : vector<2x128xf32>
    %440 = vector.extract_strided_slice %433 {offsets = [0, 128], sizes = [2, 128], strides = [1, 1]} : vector<2x512xf32> to vector<2x128xf32>
    %441 = arith.negf %440 : vector<2x128xf32>
    %442 = math.exp %441 : vector<2x128xf32>
    %cst_81 = arith.constant 1.000000e+00 : f32
    %443 = vector.broadcast %cst_81 : f32 to vector<2x128xf32>
    %444 = arith.addf %443, %442 : vector<2x128xf32>
    %445 = arith.divf %443, %444 : vector<2x128xf32>
    %446 = vector.extract_strided_slice %433 {offsets = [0, 256], sizes = [2, 128], strides = [1, 1]} : vector<2x512xf32> to vector<2x128xf32>
    %447 = math.tanh %446 : vector<2x128xf32>
    %448 = vector.extract_strided_slice %433 {offsets = [0, 384], sizes = [2, 128], strides = [1, 1]} : vector<2x512xf32> to vector<2x128xf32>
    %449 = arith.negf %448 : vector<2x128xf32>
    %450 = math.exp %449 : vector<2x128xf32>
    %cst_82 = arith.constant 1.000000e+00 : f32
    %451 = vector.broadcast %cst_82 : f32 to vector<2x128xf32>
    %452 = arith.addf %451, %450 : vector<2x128xf32>
    %453 = arith.divf %451, %452 : vector<2x128xf32>
    %454 = arith.mulf %445, %426 : vector<2x128xf32>
    %455 = arith.mulf %439, %447 : vector<2x128xf32>
    %456 = arith.addf %454, %455 : vector<2x128xf32>
    %457 = math.tanh %456 : vector<2x128xf32>
    %458 = arith.mulf %453, %457 : vector<2x128xf32>
    %459 = arith.addf %372, %393 : vector<2x512xf32>
    %c0_83 = arith.constant 0 : index
    %c0_84 = arith.constant 0 : index
    %460 = vector.load %arg7[%c0_83, %c0_84] : memref<128x512xf32, #tpu.memory_space<vmem>>, vector<128x512xf32>
    %cst_85 = arith.constant dense<0.000000e+00> : vector<2x512xf32>
    %461 = tpu.matmul %458, %460, %cst_85 {dimension_numbers = #tpu.dot_dimension_numbers<[1], [0], [0], [1], [0, 0, 1, 1], [], []>} : vector<2x128xf32>, vector<128x512xf32>, vector<2x512xf32> -> vector<2x512xf32>
    %462 = arith.addf %459, %461 : vector<2x512xf32>
    %463 = vector.extract_strided_slice %462 {offsets = [0, 0], sizes = [2, 128], strides = [1, 1]} : vector<2x512xf32> to vector<2x128xf32>
    %464 = arith.negf %463 : vector<2x128xf32>
    %465 = math.exp %464 : vector<2x128xf32>
    %cst_86 = arith.constant 1.000000e+00 : f32
    %466 = vector.broadcast %cst_86 : f32 to vector<2x128xf32>
    %467 = arith.addf %466, %465 : vector<2x128xf32>
    %468 = arith.divf %466, %467 : vector<2x128xf32>
    %469 = vector.extract_strided_slice %462 {offsets = [0, 128], sizes = [2, 128], strides = [1, 1]} : vector<2x512xf32> to vector<2x128xf32>
    %470 = arith.negf %469 : vector<2x128xf32>
    %471 = math.exp %470 : vector<2x128xf32>
    %cst_87 = arith.constant 1.000000e+00 : f32
    %472 = vector.broadcast %cst_87 : f32 to vector<2x128xf32>
    %473 = arith.addf %472, %471 : vector<2x128xf32>
    %474 = arith.divf %472, %473 : vector<2x128xf32>
    %475 = vector.extract_strided_slice %462 {offsets = [0, 256], sizes = [2, 128], strides = [1, 1]} : vector<2x512xf32> to vector<2x128xf32>
    %476 = math.tanh %475 : vector<2x128xf32>
    %477 = vector.extract_strided_slice %462 {offsets = [0, 384], sizes = [2, 128], strides = [1, 1]} : vector<2x512xf32> to vector<2x128xf32>
    %478 = arith.negf %477 : vector<2x128xf32>
    %479 = math.exp %478 : vector<2x128xf32>
    %cst_88 = arith.constant 1.000000e+00 : f32
    %480 = vector.broadcast %cst_88 : f32 to vector<2x128xf32>
    %481 = arith.addf %480, %479 : vector<2x128xf32>
    %482 = arith.divf %480, %481 : vector<2x128xf32>
    %483 = arith.mulf %474, %456 : vector<2x128xf32>
    %484 = arith.mulf %468, %476 : vector<2x128xf32>
    %485 = arith.addf %483, %484 : vector<2x128xf32>
    %486 = math.tanh %485 : vector<2x128xf32>
    %487 = arith.mulf %482, %486 : vector<2x128xf32>
    %488 = arith.addf %375, %392 : vector<2x512xf32>
    %c0_89 = arith.constant 0 : index
    %c0_90 = arith.constant 0 : index
    %489 = vector.load %arg7[%c0_89, %c0_90] : memref<128x512xf32, #tpu.memory_space<vmem>>, vector<128x512xf32>
    %cst_91 = arith.constant dense<0.000000e+00> : vector<2x512xf32>
    %490 = tpu.matmul %487, %489, %cst_91 {dimension_numbers = #tpu.dot_dimension_numbers<[1], [0], [0], [1], [0, 0, 1, 1], [], []>} : vector<2x128xf32>, vector<128x512xf32>, vector<2x512xf32> -> vector<2x512xf32>
    %491 = arith.addf %488, %490 : vector<2x512xf32>
    %492 = vector.extract_strided_slice %491 {offsets = [0, 0], sizes = [2, 128], strides = [1, 1]} : vector<2x512xf32> to vector<2x128xf32>
    %493 = arith.negf %492 : vector<2x128xf32>
    %494 = math.exp %493 : vector<2x128xf32>
    %cst_92 = arith.constant 1.000000e+00 : f32
    %495 = vector.broadcast %cst_92 : f32 to vector<2x128xf32>
    %496 = arith.addf %495, %494 : vector<2x128xf32>
    %497 = arith.divf %495, %496 : vector<2x128xf32>
    %498 = vector.extract_strided_slice %491 {offsets = [0, 128], sizes = [2, 128], strides = [1, 1]} : vector<2x512xf32> to vector<2x128xf32>
    %499 = arith.negf %498 : vector<2x128xf32>
    %500 = math.exp %499 : vector<2x128xf32>
    %cst_93 = arith.constant 1.000000e+00 : f32
    %501 = vector.broadcast %cst_93 : f32 to vector<2x128xf32>
    %502 = arith.addf %501, %500 : vector<2x128xf32>
    %503 = arith.divf %501, %502 : vector<2x128xf32>
    %504 = vector.extract_strided_slice %491 {offsets = [0, 256], sizes = [2, 128], strides = [1, 1]} : vector<2x512xf32> to vector<2x128xf32>
    %505 = math.tanh %504 : vector<2x128xf32>
    %506 = vector.extract_strided_slice %491 {offsets = [0, 384], sizes = [2, 128], strides = [1, 1]} : vector<2x512xf32> to vector<2x128xf32>
    %507 = arith.negf %506 : vector<2x128xf32>
    %508 = math.exp %507 : vector<2x128xf32>
    %cst_94 = arith.constant 1.000000e+00 : f32
    %509 = vector.broadcast %cst_94 : f32 to vector<2x128xf32>
    %510 = arith.addf %509, %508 : vector<2x128xf32>
    %511 = arith.divf %509, %510 : vector<2x128xf32>
    %512 = arith.mulf %503, %485 : vector<2x128xf32>
    %513 = arith.mulf %497, %505 : vector<2x128xf32>
    %514 = arith.addf %512, %513 : vector<2x128xf32>
    %515 = math.tanh %514 : vector<2x128xf32>
    %516 = arith.mulf %511, %515 : vector<2x128xf32>
    %517 = arith.addf %378, %391 : vector<2x512xf32>
    %c0_95 = arith.constant 0 : index
    %c0_96 = arith.constant 0 : index
    %518 = vector.load %arg7[%c0_95, %c0_96] : memref<128x512xf32, #tpu.memory_space<vmem>>, vector<128x512xf32>
    %cst_97 = arith.constant dense<0.000000e+00> : vector<2x512xf32>
    %519 = tpu.matmul %516, %518, %cst_97 {dimension_numbers = #tpu.dot_dimension_numbers<[1], [0], [0], [1], [0, 0, 1, 1], [], []>} : vector<2x128xf32>, vector<128x512xf32>, vector<2x512xf32> -> vector<2x512xf32>
    %520 = arith.addf %517, %519 : vector<2x512xf32>
    %521 = vector.extract_strided_slice %520 {offsets = [0, 0], sizes = [2, 128], strides = [1, 1]} : vector<2x512xf32> to vector<2x128xf32>
    %522 = arith.negf %521 : vector<2x128xf32>
    %523 = math.exp %522 : vector<2x128xf32>
    %cst_98 = arith.constant 1.000000e+00 : f32
    %524 = vector.broadcast %cst_98 : f32 to vector<2x128xf32>
    %525 = arith.addf %524, %523 : vector<2x128xf32>
    %526 = arith.divf %524, %525 : vector<2x128xf32>
    %527 = vector.extract_strided_slice %520 {offsets = [0, 128], sizes = [2, 128], strides = [1, 1]} : vector<2x512xf32> to vector<2x128xf32>
    %528 = arith.negf %527 : vector<2x128xf32>
    %529 = math.exp %528 : vector<2x128xf32>
    %cst_99 = arith.constant 1.000000e+00 : f32
    %530 = vector.broadcast %cst_99 : f32 to vector<2x128xf32>
    %531 = arith.addf %530, %529 : vector<2x128xf32>
    %532 = arith.divf %530, %531 : vector<2x128xf32>
    %533 = vector.extract_strided_slice %520 {offsets = [0, 256], sizes = [2, 128], strides = [1, 1]} : vector<2x512xf32> to vector<2x128xf32>
    %534 = math.tanh %533 : vector<2x128xf32>
    %535 = vector.extract_strided_slice %520 {offsets = [0, 384], sizes = [2, 128], strides = [1, 1]} : vector<2x512xf32> to vector<2x128xf32>
    %536 = arith.negf %535 : vector<2x128xf32>
    %537 = math.exp %536 : vector<2x128xf32>
    %cst_100 = arith.constant 1.000000e+00 : f32
    %538 = vector.broadcast %cst_100 : f32 to vector<2x128xf32>
    %539 = arith.addf %538, %537 : vector<2x128xf32>
    %540 = arith.divf %538, %539 : vector<2x128xf32>
    %541 = arith.mulf %532, %514 : vector<2x128xf32>
    %542 = arith.mulf %526, %534 : vector<2x128xf32>
    %543 = arith.addf %541, %542 : vector<2x128xf32>
    %544 = math.tanh %543 : vector<2x128xf32>
    %545 = arith.mulf %540, %544 : vector<2x128xf32>
    %546 = arith.addf %381, %390 : vector<2x512xf32>
    %c0_101 = arith.constant 0 : index
    %c0_102 = arith.constant 0 : index
    %547 = vector.load %arg7[%c0_101, %c0_102] : memref<128x512xf32, #tpu.memory_space<vmem>>, vector<128x512xf32>
    %cst_103 = arith.constant dense<0.000000e+00> : vector<2x512xf32>
    %548 = tpu.matmul %545, %547, %cst_103 {dimension_numbers = #tpu.dot_dimension_numbers<[1], [0], [0], [1], [0, 0, 1, 1], [], []>} : vector<2x128xf32>, vector<128x512xf32>, vector<2x512xf32> -> vector<2x512xf32>
    %549 = arith.addf %546, %548 : vector<2x512xf32>
    %550 = vector.extract_strided_slice %549 {offsets = [0, 0], sizes = [2, 128], strides = [1, 1]} : vector<2x512xf32> to vector<2x128xf32>
    %551 = arith.negf %550 : vector<2x128xf32>
    %552 = math.exp %551 : vector<2x128xf32>
    %cst_104 = arith.constant 1.000000e+00 : f32
    %553 = vector.broadcast %cst_104 : f32 to vector<2x128xf32>
    %554 = arith.addf %553, %552 : vector<2x128xf32>
    %555 = arith.divf %553, %554 : vector<2x128xf32>
    %556 = vector.extract_strided_slice %549 {offsets = [0, 128], sizes = [2, 128], strides = [1, 1]} : vector<2x512xf32> to vector<2x128xf32>
    %557 = arith.negf %556 : vector<2x128xf32>
    %558 = math.exp %557 : vector<2x128xf32>
    %cst_105 = arith.constant 1.000000e+00 : f32
    %559 = vector.broadcast %cst_105 : f32 to vector<2x128xf32>
    %560 = arith.addf %559, %558 : vector<2x128xf32>
    %561 = arith.divf %559, %560 : vector<2x128xf32>
    %562 = vector.extract_strided_slice %549 {offsets = [0, 256], sizes = [2, 128], strides = [1, 1]} : vector<2x512xf32> to vector<2x128xf32>
    %563 = math.tanh %562 : vector<2x128xf32>
    %564 = vector.extract_strided_slice %549 {offsets = [0, 384], sizes = [2, 128], strides = [1, 1]} : vector<2x512xf32> to vector<2x128xf32>
    %565 = arith.negf %564 : vector<2x128xf32>
    %566 = math.exp %565 : vector<2x128xf32>
    %cst_106 = arith.constant 1.000000e+00 : f32
    %567 = vector.broadcast %cst_106 : f32 to vector<2x128xf32>
    %568 = arith.addf %567, %566 : vector<2x128xf32>
    %569 = arith.divf %567, %568 : vector<2x128xf32>
    %570 = arith.mulf %561, %543 : vector<2x128xf32>
    %571 = arith.mulf %555, %563 : vector<2x128xf32>
    %572 = arith.addf %570, %571 : vector<2x128xf32>
    %573 = math.tanh %572 : vector<2x128xf32>
    %574 = arith.mulf %569, %573 : vector<2x128xf32>
    %575 = arith.addf %384, %389 : vector<2x512xf32>
    %c0_107 = arith.constant 0 : index
    %c0_108 = arith.constant 0 : index
    %576 = vector.load %arg7[%c0_107, %c0_108] : memref<128x512xf32, #tpu.memory_space<vmem>>, vector<128x512xf32>
    %cst_109 = arith.constant dense<0.000000e+00> : vector<2x512xf32>
    %577 = tpu.matmul %574, %576, %cst_109 {dimension_numbers = #tpu.dot_dimension_numbers<[1], [0], [0], [1], [0, 0, 1, 1], [], []>} : vector<2x128xf32>, vector<128x512xf32>, vector<2x512xf32> -> vector<2x512xf32>
    %578 = arith.addf %575, %577 : vector<2x512xf32>
    %579 = vector.extract_strided_slice %578 {offsets = [0, 0], sizes = [2, 128], strides = [1, 1]} : vector<2x512xf32> to vector<2x128xf32>
    %580 = arith.negf %579 : vector<2x128xf32>
    %581 = math.exp %580 : vector<2x128xf32>
    %cst_110 = arith.constant 1.000000e+00 : f32
    %582 = vector.broadcast %cst_110 : f32 to vector<2x128xf32>
    %583 = arith.addf %582, %581 : vector<2x128xf32>
    %584 = arith.divf %582, %583 : vector<2x128xf32>
    %585 = vector.extract_strided_slice %578 {offsets = [0, 128], sizes = [2, 128], strides = [1, 1]} : vector<2x512xf32> to vector<2x128xf32>
    %586 = arith.negf %585 : vector<2x128xf32>
    %587 = math.exp %586 : vector<2x128xf32>
    %cst_111 = arith.constant 1.000000e+00 : f32
    %588 = vector.broadcast %cst_111 : f32 to vector<2x128xf32>
    %589 = arith.addf %588, %587 : vector<2x128xf32>
    %590 = arith.divf %588, %589 : vector<2x128xf32>
    %591 = vector.extract_strided_slice %578 {offsets = [0, 256], sizes = [2, 128], strides = [1, 1]} : vector<2x512xf32> to vector<2x128xf32>
    %592 = math.tanh %591 : vector<2x128xf32>
    %593 = vector.extract_strided_slice %578 {offsets = [0, 384], sizes = [2, 128], strides = [1, 1]} : vector<2x512xf32> to vector<2x128xf32>
    %594 = arith.negf %593 : vector<2x128xf32>
    %595 = math.exp %594 : vector<2x128xf32>
    %cst_112 = arith.constant 1.000000e+00 : f32
    %596 = vector.broadcast %cst_112 : f32 to vector<2x128xf32>
    %597 = arith.addf %596, %595 : vector<2x128xf32>
    %598 = arith.divf %596, %597 : vector<2x128xf32>
    %599 = arith.mulf %590, %572 : vector<2x128xf32>
    %600 = arith.mulf %584, %592 : vector<2x128xf32>
    %601 = arith.addf %599, %600 : vector<2x128xf32>
    %602 = math.tanh %601 : vector<2x128xf32>
    %603 = arith.mulf %598, %602 : vector<2x128xf32>
    %604 = arith.addf %387, %388 : vector<2x512xf32>
    %c0_113 = arith.constant 0 : index
    %c0_114 = arith.constant 0 : index
    %605 = vector.load %arg7[%c0_113, %c0_114] : memref<128x512xf32, #tpu.memory_space<vmem>>, vector<128x512xf32>
    %cst_115 = arith.constant dense<0.000000e+00> : vector<2x512xf32>
    %606 = tpu.matmul %603, %605, %cst_115 {dimension_numbers = #tpu.dot_dimension_numbers<[1], [0], [0], [1], [0, 0, 1, 1], [], []>} : vector<2x128xf32>, vector<128x512xf32>, vector<2x512xf32> -> vector<2x512xf32>
    %607 = arith.addf %604, %606 : vector<2x512xf32>
    %608 = vector.extract_strided_slice %607 {offsets = [0, 0], sizes = [2, 128], strides = [1, 1]} : vector<2x512xf32> to vector<2x128xf32>
    %609 = arith.negf %608 : vector<2x128xf32>
    %610 = math.exp %609 : vector<2x128xf32>
    %cst_116 = arith.constant 1.000000e+00 : f32
    %611 = vector.broadcast %cst_116 : f32 to vector<2x128xf32>
    %612 = arith.addf %611, %610 : vector<2x128xf32>
    %613 = arith.divf %611, %612 : vector<2x128xf32>
    %614 = vector.extract_strided_slice %607 {offsets = [0, 128], sizes = [2, 128], strides = [1, 1]} : vector<2x512xf32> to vector<2x128xf32>
    %615 = arith.negf %614 : vector<2x128xf32>
    %616 = math.exp %615 : vector<2x128xf32>
    %cst_117 = arith.constant 1.000000e+00 : f32
    %617 = vector.broadcast %cst_117 : f32 to vector<2x128xf32>
    %618 = arith.addf %617, %616 : vector<2x128xf32>
    %619 = arith.divf %617, %618 : vector<2x128xf32>
    %620 = vector.extract_strided_slice %607 {offsets = [0, 256], sizes = [2, 128], strides = [1, 1]} : vector<2x512xf32> to vector<2x128xf32>
    %621 = math.tanh %620 : vector<2x128xf32>
    %622 = vector.extract_strided_slice %607 {offsets = [0, 384], sizes = [2, 128], strides = [1, 1]} : vector<2x512xf32> to vector<2x128xf32>
    %623 = arith.negf %622 : vector<2x128xf32>
    %624 = math.exp %623 : vector<2x128xf32>
    %cst_118 = arith.constant 1.000000e+00 : f32
    %625 = vector.broadcast %cst_118 : f32 to vector<2x128xf32>
    %626 = arith.addf %625, %624 : vector<2x128xf32>
    %627 = arith.divf %625, %626 : vector<2x128xf32>
    %628 = arith.mulf %619, %601 : vector<2x128xf32>
    %629 = arith.mulf %613, %621 : vector<2x128xf32>
    %630 = arith.addf %628, %629 : vector<2x128xf32>
    %631 = math.tanh %630 : vector<2x128xf32>
    %632 = arith.mulf %627, %631 : vector<2x128xf32>
    %633 = vector.extract_strided_slice %632 {offsets = [0, 0], sizes = [2, 64], strides = [1, 1]} : vector<2x128xf32> to vector<2x64xf32>
    %634 = tpu.concatenate %633, %429 in 1 : vector<2x64xf32>, vector<2x64xf32> -> vector<2x128xf32>
    %c0_119 = arith.constant 0 : index
    %c0_120 = arith.constant 0 : index
    %635 = vector.load %arg10[%c0_119, %c0_120] : memref<128x64xf32, #tpu.memory_space<vmem>>, vector<128x64xf32>
    %cst_121 = arith.constant dense<0.000000e+00> : vector<2x64xf32>
    %636 = tpu.matmul %634, %635, %cst_121 {dimension_numbers = #tpu.dot_dimension_numbers<[1], [0], [0], [1], [0, 0, 1, 1], [], []>} : vector<2x128xf32>, vector<128x64xf32>, vector<2x64xf32> -> vector<2x64xf32>
    %c0_122 = arith.constant 0 : index
    %c0_123 = arith.constant 0 : index
    %637 = vector.load %arg11[%c0_122, %c0_123] : memref<1x64xf32, #tpu.memory_space<vmem>>, vector<1x64xf32>
    %638 = vector.broadcast %637 : vector<1x64xf32> to vector<2x64xf32>
    %639 = arith.addf %636, %638 : vector<2x64xf32>
    %cst_124 = arith.constant 0.000000e+00 : f32
    %640 = vector.broadcast %cst_124 : f32 to vector<2x64xf32>
    %641 = arith.maximumf %639, %640 : vector<2x64xf32>
    %c0_125 = arith.constant 0 : index
    %c0_126 = arith.constant 0 : index
    %642 = vector.load %arg12[%c0_125, %c0_126] : memref<64x1xf32, #tpu.memory_space<vmem>>, vector<64x1xf32>
    %cst_127 = arith.constant dense<0.000000e+00> : vector<2x1xf32>
    %643 = tpu.matmul %641, %642, %cst_127 {dimension_numbers = #tpu.dot_dimension_numbers<[1], [0], [0], [1], [0, 0, 1, 1], [], []>} : vector<2x64xf32>, vector<64x1xf32>, vector<2x1xf32> -> vector<2x1xf32>
    %c0_128 = arith.constant 0 : index
    %c0_129 = arith.constant 0 : index
    %644 = vector.load %arg13[%c0_128, %c0_129] : memref<1x1xf32, #tpu.memory_space<vmem>>, vector<1x1xf32>
    %645 = vector.broadcast %644 : vector<1x1xf32> to vector<2x1xf32>
    %646 = arith.addf %643, %645 : vector<2x1xf32>
    %c0_130 = arith.constant 0 : index
    %c0_131 = arith.constant 0 : index
    %647 = vector.load %arg14[%c0_130, %c0_131] : memref<2x1xf32, #tpu.memory_space<vmem>>, vector<2x1xf32>
    tpu.vector_store %arg14[%c0_130, %c0_131], %646 {strides = array<i32>} : memref<2x1xf32, #tpu.memory_space<vmem>>, vector<2x1xf32>,
    return
  }
}

</mosaic_0001>

<bundles_post_ra>
// kernel: lstm_forward.1
= control target key start
LH: loop header
LB: loop body
LE: loop exit
PB: predicated region body
PF: predicated region fallthrough
CT: control target
= control target key end

     0   :  { %s7103_s0 = inlined_call_operand.vmem [shape: f32[8,2,1], index: 0, kind: input, shape index: {}]   ;;  %s7104_s1 = inlined_call_operand.vmem [shape: f32[1,512], index: 1, kind: input, shape index: {}]   ;;  %s7105_s2 = inlined_call_operand.vmem [shape: f32[1,512], index: 2, kind: input, shape index: {}]   ;;  %s7106_s3 = inlined_call_operand.vmem [shape: f32[1,512], index: 3, kind: input, shape index: {}]   ;;  %s7107_s4 = inlined_call_operand.hbm [shape: f32[128,512], index: 4, kind: input, shape index: {}]   ;;  %s7108_s5 = inlined_call_operand.hbm [shape: f32[128,1024], index: 5, kind: input, shape index: {}]   ;;  %s7109_s6 = inlined_call_operand.vmem [shape: f32[1,512], index: 6, kind: input, shape index: {}]   ;;  %s7110_s7 = inlined_call_operand.hbm [shape: f32[128,512], index: 7, kind: input, shape index: {}]   ;;  %s7111_s8 = inlined_call_operand.vmem [shape: f32[2,2,128], index: 8, kind: input, shape index: {}]   ;;  %s7112_s9 = inlined_call_operand.vmem [shape: f32[2,2,128], index: 9, kind: input, shape index: {}]   ;;  %s7113_s10 = inlined_call_operand.vmem [shape: f32[128,64], index: 10, kind: input, shape index: {}]   ;;  %s7114_s11 = inlined_call_operand.vmem [shape: f32[1,64], index: 11, kind: input, shape index: {}]   ;;  %s7115_s12 = inlined_call_operand.vmem [shape: f32[64,1], index: 12, kind: input, shape index: {}]   ;;  %s7116_s13 = inlined_call_operand.<no memory space> [shape: f32[1,1], index: 13, kind: input, shape index: {}]   ;;  %s7117_s14 = inlined_call_operand.vmem [shape: f32[2,1], index: 14, kind: output, shape index: {}]  }
   0x1   :  { %v19_v0 = vstv %s7116_s13 }
   0x2   :  { %20 = vst [vmem:[#allocation2] sm:$0x1] %v19_v0 }
   0x3   :  { %21 = vsyncpa [#allocation4], 0 }
   0x4   :  { %22 = vsyncpa [#allocation6], 0  ;;  %s5709_s15 = smov [#allocation5]   ;;  %s5639_s19 = scalar_lea.hbm %s7108_s5, 16384 }
   0x5   :  { %s48_s16 = sshll.u32 %s5709_s15, 4  ;;  %p5640_p0 = scmp.ne.s32.totalorder %s7108_s5, %s5639_s19  ;;  %s49_s16 = int_to_ptr.vmem [resolvable:$true] %s48_s16 }
   0x6   :  { %p5643_p1 = scmp.lt.u32.totalorder %s5639_s19, %s7108_s5 }
   0x8   :  { %p5645_p2 = pnand %p5643_p1, %p5640_p0 }
   0xa   :  { %5648 = shalt.err (!%p5645_p2)
}
   0xb   :  { %s5649_s13 = scalar_lea.vmem %s49_s16, 16384  ;;  %p5654_p4 = scmp.lt.s32.totalorder %s49_s16, %s49_s16 }
   0xc   :  { %p5650_p3 = scmp.ne.s32.totalorder %s49_s16, %s5649_s13  ;;  %p5655_p5 = scmp.lt.s32.totalorder %s5649_s13, %s5649_s13 }
   0xe   :  { %p5656_p6 = por %p5655_p5, %p5654_p4 }
  0x10   :  { %p5657_p7 = pnand %p5656_p6, %p5650_p3 }
  0x12   :  { %5660 = shalt.err (!%p5657_p7)
}
  0x13   :  { %s5710_s24 = smov 1024   ;;  %s5711_s25 = smov 64  }
  0x14   :  { %54 = dma.hbm_to_vmem [thread:$0]  %s7108_s5, 16384, %s49_s16, [#allocation6], %s5710_s24, %s5710_s24, %s5711_s25  }
  0x15   :  { %s5712_s28 = smov [#allocation3]   ;;  %s5661_s17 = scalar_lea.hbm %s7107_s4, 8192 }
  0x16   :  { %s36_s29 = sshll.u32 %s5712_s28, 4  ;;  %p5662_p8 = scmp.ne.s32.totalorder %s7107_s4, %s5661_s17  ;;  %s37_s29 = int_to_ptr.vmem [resolvable:$true] %s36_s29 }
  0x17   :  { %p5665_p9 = scmp.lt.u32.totalorder %s5661_s17, %s7107_s4 }
  0x19   :  { %p5667_p10 = pnand %p5665_p9, %p5662_p8 }
  0x1b   :  { %5670 = shalt.err (!%p5667_p10)
}
  0x1c   :  { %s5671_s22 = scalar_lea.vmem %s37_s29, 8192  ;;  %p5676_p12 = scmp.lt.s32.totalorder %s37_s29, %s37_s29 }
  0x1d   :  { %p5672_p11 = scmp.ne.s32.totalorder %s37_s29, %s5671_s22  ;;  %p5677_p13 = scmp.lt.s32.totalorder %s5671_s22, %s5671_s22 }
  0x1f   :  { %p5678_p0 = por %p5677_p13, %p5676_p12 }
  0x21   :  { %p5679_p1 = pnand %p5678_p0, %p5672_p11 }
  0x23   :  { %5682 = shalt.err (!%p5679_p1)
}
  0x24   :  { %s5713_s5 = smov 512   ;;  %s5714_s16 = smov 32  }
  0x25   :  { %42 = dma.hbm_to_vmem [thread:$0]  %s7107_s4, 8192, %s37_s29, [#allocation4], %s5713_s5, %s5713_s5, %s5714_s16  }
  0x26   :  { %s5715_s24 = smov [#allocation7]   ;;  %s5683_s28 = scalar_lea.hbm %s7110_s7, 8192 }
  0x27   :  { %s62_s25 = sshll.u32 %s5715_s24, 4  ;;  %p5684_p2 = scmp.ne.s32.totalorder %s7110_s7, %s5683_s28  ;;  %s63_s25 = int_to_ptr.vmem [resolvable:$true] %s62_s25 }
  0x28   :  { %p5687_p3 = scmp.lt.u32.totalorder %s5683_s28, %s7110_s7 }
  0x2a   :  { %p5689_p4 = pnand %p5687_p3, %p5684_p2 }
  0x2c   :  { %5692 = shalt.err (!%p5689_p4)
}
  0x2d   :  { %s5693_s19 = scalar_lea.vmem %s63_s25, 8192  ;;  %p5698_p6 = scmp.lt.s32.totalorder %s63_s25, %s63_s25 }
  0x2e   :  { %p5694_p5 = scmp.ne.s32.totalorder %s63_s25, %s5693_s19  ;;  %p5699_p7 = scmp.lt.s32.totalorder %s5693_s19, %s5693_s19 }
  0x30   :  { %p5700_p8 = por %p5699_p7, %p5698_p6 }
  0x32   :  { %p5701_p9 = pnand %p5700_p8, %p5694_p5 }
  0x34   :  { %5704 = shalt.err (!%p5701_p9)
}
  0x35   :  { %68 = dma.hbm_to_vmem [thread:$0]  %s7110_s7, 8192, %s63_s25, [#allocation6], %s5713_s5, %s5713_s5, %s5714_s16  }
  0x36   :  { %5705 = dma.done.wait [#allocation4], 8192  }
  0x37   :  { %5706 = vsyncadd [#allocation4], 4294959104 }
  0x38   :  { %5707 = dma.done.wait [#allocation6], 24576  }
  0x39   :  { %5708 = vsyncadd [#allocation6], 4294942720  ;;  %v7118_v1 = vmov 0.0   ;;  %v5717_v2 = vmov 0   ;;  %v307_v3 = vld [vmem:[#allocation3 + $0x8] sm:$0xff]  ;;  %v309_v5 = vld [vmem:[#allocation3 + $0x18] sm:$0xff] }
  0x3a   :  { %434 = vmatprep.mubr.f32.mxu0 %v7118_v1  ;;  %505 = vmatprep.mubr.f32.mxu1 %v7118_v1  ;;  %v311_v4 = vld [vmem:[#allocation3 + $0x28] sm:$0xff]  ;;  %v313_v7 = vld [vmem:[#allocation3 + $0x38] sm:$0xff]  ;;  %v306_v8 = vld [vmem:[#allocation3] sm:$0xff]  ;;  %vm1758_vm0 = vcmask 523264   ;;  %vm1785_vm1 = vcmask 1041408   ;;  %vm1787_vm2 = vcmask 1043456  }
  0x3b   :  { %5382 = vset.pattern.permute.xlu1 %v5717_v2  ;;  %5381 = vset.pattern.permute.xlu0 %v5717_v2  ;;  %v5836_v6 = vpack.c.bf16 %v311_v4, %v307_v3  ;;  %v310_v9 = vld [vmem:[#allocation3 + $0x20] sm:$0xff]  ;;  %v5838_v10 = vpack.c.bf16 %v313_v7, %v309_v5  ;;  %v308_v12 = vld [vmem:[#allocation3 + $0x10] sm:$0xff]  ;;  %v315_v14 = vld [vmem:[#allocation3 + $0x48] sm:$0xff]  ;;  %vm1789_vm3 = vcmask 1045504   ;;  %vm5719_vm4 = vmmov 0  }
  0x3c   :  { %v5840_v11 = vpack.c.bf16 %v310_v9, %v306_v8  ;;  %v312_v13 = vld [vmem:[#allocation3 + $0x30] sm:$0xff]  ;;  %v319_v16 = vld [vmem:[#allocation3 + $0x68] sm:$0xff]  ;;  %v317_v17 = vld [vmem:[#allocation3 + $0x58] sm:$0xff]  ;;  %vm4041_vm5 = vcmask 1024  }
  0x3d   :  { %7173 = vst [vmem:[#allocation10_spill] sm:$0xff] %v5836_v6  ;;  %7174 = vst [vmem:[#allocation11_spill] sm:$0xff] %v5838_v10  ;;  %4183 = vmatprep.subr.bf16.mxu0 %v5836_v6  ;;  %v5843_v15 = vpack.c.bf16 %v312_v13, %v308_v12  ;;  %v321_v18 = vld [vmem:[#allocation3 + $0x78] sm:$0xff]  ;;  %4215 = vmatprep.subr.bf16.mxu1 %v5838_v10  ;;  %v5847_v19 = vpack.c.bf16 %v319_v16, %v315_v14  ;;  %v314_v21 = vld [vmem:[#allocation3 + $0x40] sm:$0xff] }
  0x3e   :  { %4185 = vmatpush1.bf16.msra.mxu0 %v5840_v11  ;;  %v5849_v20 = vpack.c.bf16 %v321_v18, %v317_v17  ;;  %v318_v22 = vld [vmem:[#allocation3 + $0x60] sm:$0xff]  ;;  %v316_v23 = vld [vmem:[#allocation3 + $0x50] sm:$0xff]  ;;  %v323_v26 = vld [vmem:[#allocation3 + $0x88] sm:$0xff] }
  0x3f   :  { %4217 = vmatpush1.bf16.msra.mxu1 %v5843_v15  ;;  %v5852_v24 = vpack.c.bf16 %v318_v22, %v314_v21  ;;  %v320_v25 = vld [vmem:[#allocation3 + $0x70] sm:$0xff]  ;;  %v327_v27 = vld [vmem:[#allocation3 + $0xa8] sm:$0xff]  ;;  %4187 = vmatprep.subr.bf16.mxu0 %v5847_v19  ;;  %v325_v30 = vld [vmem:[#allocation3 + $0x98] sm:$0xff] }
  0x40   :  { %4219 = vmatprep.subr.bf16.mxu1 %v5849_v20  ;;  %v5856_v28 = vpack.c.bf16 %v320_v25, %v316_v23  ;;  %v5858_v29 = vpack.c.bf16 %v327_v27, %v323_v26  ;;  %v329_v31 = vld [vmem:[#allocation3 + $0xb8] sm:$0xff]  ;;  %v322_v32 = vld [vmem:[#allocation3 + $0x80] sm:$0xff]  ;;  %v324_v35 = vld [vmem:[#allocation3 + $0x90] sm:$0xff] }
  0x41   :  { %v5860_v33 = vpack.c.bf16 %v329_v31, %v325_v30  ;;  %v326_v34 = vld [vmem:[#allocation3 + $0xa0] sm:$0xff]  ;;  %v328_v36 = vld [vmem:[#allocation3 + $0xb0] sm:$0xff]  ;;  %v331_v38 = vld [vmem:[#allocation3 + $0xc8] sm:$0xff] }
  0x42   :  { %4189 = vmatpush1.bf16.msra.mxu0 %v5852_v24  ;;  %v5863_v37 = vpack.c.bf16 %v326_v34, %v322_v32  ;;  %v335_v39 = vld [vmem:[#allocation3 + $0xe8] sm:$0xff]  ;;  %v333_v40 = vld [vmem:[#allocation3 + $0xd8] sm:$0xff]  ;;  %v5867_v41 = vpack.c.bf16 %v328_v36, %v324_v35  ;;  %v330_v44 = vld [vmem:[#allocation3 + $0xc0] sm:$0xff] }
  0x43   :  { %4221 = vmatpush1.bf16.msra.mxu1 %v5856_v28  ;;  %4191 = vmatprep.subr.bf16.mxu0 %v5858_v29  ;;  %v5869_v42 = vpack.c.bf16 %v335_v39, %v331_v38  ;;  %v337_v43 = vld [vmem:[#allocation3 + $0xf8] sm:$0xff]  ;;  %v334_v45 = vld [vmem:[#allocation3 + $0xe0] sm:$0xff]  ;;  %v332_v47 = vld [vmem:[#allocation3 + $0xd0] sm:$0xff] }
  0x44   :  { %4223 = vmatprep.subr.bf16.mxu1 %v5860_v33  ;;  %v5872_v46 = vpack.c.bf16 %v337_v43, %v333_v40  ;;  %v336_v48 = vld [vmem:[#allocation3 + $0xf0] sm:$0xff]  ;;  %v339_v49 = vld [vmem:[#allocation3 + $0x108] sm:$0xff]  ;;  %v341_v51 = vld [vmem:[#allocation3 + $0x118] sm:$0xff]  ;;  %v5875_v53 = vpack.c.bf16 %v334_v45, %v330_v44 }
  0x45   :  { %v343_v50 = vld [vmem:[#allocation3 + $0x128] sm:$0xff]  ;;  %v345_v52 = vld [vmem:[#allocation3 + $0x138] sm:$0xff]  ;;  %v5879_v54 = vpack.c.bf16 %v336_v48, %v332_v47  ;;  %v338_v56 = vld [vmem:[#allocation3 + $0x100] sm:$0xff] }
  0x46   :  { %4193 = vmatpush1.bf16.msra.mxu0 %v5863_v37  ;;  %v5881_v55 = vpack.c.bf16 %v343_v50, %v339_v49  ;;  %v342_v57 = vld [vmem:[#allocation3 + $0x120] sm:$0xff]  ;;  %v340_v58 = vld [vmem:[#allocation3 + $0x110] sm:$0xff]  ;;  %v5884_v59 = vpack.c.bf16 %v345_v52, %v341_v51  ;;  %v347_v61 = vld [vmem:[#allocation3 + $0x148] sm:$0xff] }
  0x47   :  { %4225 = vmatpush1.bf16.msra.mxu1 %v5867_v41  ;;  %4195 = vmatprep.subr.bf16.mxu0 %v5869_v42  ;;  %v344_v60 = vld [vmem:[#allocation3 + $0x130] sm:$0xff]  ;;  %v351_v62 = vld [vmem:[#allocation3 + $0x168] sm:$0xff]  ;;  %v349_v63 = vld [vmem:[#allocation3 + $0x158] sm:$0xff]  ;;  %v5887_v2 = vpack.c.bf16 %v342_v57, %v338_v56 }
  0x48   :  { %4227 = vmatprep.subr.bf16.mxu1 %v5872_v46  ;;  %v353_v0 = vld [vmem:[#allocation3 + $0x178] sm:$0xff]  ;;  %v5891_v3 = vpack.c.bf16 %v344_v60, %v340_v58  ;;  %v5893_v4 = vpack.c.bf16 %v351_v62, %v347_v61  ;;  %v346_v5 = vld [vmem:[#allocation3 + $0x140] sm:$0xff]  ;;  %v348_v8 = vld [vmem:[#allocation3 + $0x150] sm:$0xff] }
  0x49   :  { %v350_v7 = vld [vmem:[#allocation3 + $0x160] sm:$0xff]  ;;  %v5896_v9 = vpack.c.bf16 %v353_v0, %v349_v63  ;;  %v352_v12 = vld [vmem:[#allocation3 + $0x170] sm:$0xff]  ;;  %v355_v13 = vld [vmem:[#allocation3 + $0x188] sm:$0xff]  ;;  %v107_v0 = vlaneseq }
  0x4a   :  { %4197 = vmatpush1.bf16.msra.mxu0 %v5875_v53  ;;  %v359_v14 = vld [vmem:[#allocation3 + $0x1a8] sm:$0xff]  ;;  %v357_v16 = vld [vmem:[#allocation3 + $0x198] sm:$0xff]  ;;  %v5899_v18 = vpack.c.bf16 %v350_v7, %v346_v5  ;;  %v354_v21 = vld [vmem:[#allocation3 + $0x180] sm:$0xff]  ;;  %v5903_v23 = vpack.c.bf16 %v352_v12, %v348_v8 }
  0x4b   :  { %4229 = vmatpush1.bf16.msra.mxu1 %v5879_v54  ;;  %4199 = vmatprep.subr.bf16.mxu0 %v5881_v55  ;;  %v361_v17 = vld [vmem:[#allocation3 + $0x1b8] sm:$0xff]  ;;  %v358_v22 = vld [vmem:[#allocation3 + $0x1a0] sm:$0xff]  ;;  %v5905_v25 = vpack.c.bf16 %v359_v14, %v355_v13  ;;  %v356_v26 = vld [vmem:[#allocation3 + $0x190] sm:$0xff]  ;;  %v108_v8 = vshrl.u32 %v107_v0, 7 }
  0x4c   :  { %4231 = vmatprep.subr.bf16.mxu1 %v5884_v59  ;;  %7175 = vst [vmem:[#allocation12_spill] sm:$0xff] %v5903_v23  ;;  %v360_v27 = vld [vmem:[#allocation3 + $0x1b0] sm:$0xff]  ;;  %v91_v30 = vld [vmem:[%s7103_s0 + $0x2] sm:$0x3]  ;;  %v5911_v31 = vpack.c.bf16 %v361_v17, %v357_v16  ;;  %v363_v32 = vld [vmem:[#allocation3 + $0x1c8] sm:$0xff]  ;;  %v5920_v40 = vpack.c.bf16 %v358_v22, %v354_v21 }
  0x4d   :  { %7176 = vst [vmem:[#allocation13_spill] sm:$0xff] %v5905_v25  ;;  %v367_v34 = vld [vmem:[#allocation3 + $0x1e8] sm:$0xff]  ;;  %158 = vperm.xlu1 %5382, %v91_v30   ;;  %v90_v35 = vld [vmem:[%s7103_s0] sm:$0x3]  ;;  %v5927_v44 = vpack.c.bf16 %v360_v27, %v356_v26  ;;  %v364_v50 = vld [vmem:[#allocation3 + $0x1d0] sm:$0xff]  ;;  %v6005_v14 = vsub.s32 0, %v108_v8 }
  0x4e   :  { %4201 = vmatpush1.bf16.msra.mxu0 %v5887_v2  ;;  %7177 = vst [vmem:[#allocation14_spill] sm:$0xff] %v5911_v31  ;;  %v365_v36 = vld [vmem:[#allocation3 + $0x1d8] sm:$0xff]  ;;  %103 = vperm.xlu0 %5381, %v90_v35   ;;  %v96_v39 = vld [vmem:[%s7103_s0 + $0xc] sm:$0x3]  ;;  %7178 = vst [vmem:[#allocation15_spill] sm:$0xff] %v5920_v40  ;;  %v5929_v45 = vpack.c.bf16 %v367_v34, %v363_v32  ;;  %v6015_v22 = vsub.s32 2, %v108_v8 }
  0x4f   :  { %4233 = vmatpush1.bf16.msra.mxu1 %v5891_v3  ;;  %4203 = vmatprep.subr.bf16.mxu0 %v5893_v4  ;;  %v369_v38 = vld [vmem:[#allocation3 + $0x1f8] sm:$0xff]  ;;  %v97_v43 = vld [vmem:[%s7103_s0 + $0xe] sm:$0x3]  ;;  %7179 = vst [vmem:[#allocation16_spill] sm:$0xff] %v5927_v44  ;;  %v362_v47 = vld [vmem:[#allocation3 + $0x1c0] sm:$0xff]  ;;  %v6017_v26 = vsub.s32 1, %v108_v8 }
  0x50   :  { %4235 = vmatprep.subr.bf16.mxu1 %v5896_v9  ;;  %7180 = vst [vmem:[#allocation17_spill] sm:$0xff] %v5929_v45  ;;  %v366_v48 = vld [vmem:[#allocation3 + $0x1e0] sm:$0xff]  ;;  %v5932_v49 = vpack.c.bf16 %v369_v38, %v365_v36  ;;  %v368_v51 = vld [vmem:[#allocation3 + $0x1f0] sm:$0xff]  ;;  %v95_v52 = vld [vmem:[%s7103_s0 + $0xa] sm:$0x3]  ;;  %v6022_v30 = vsub.s32 3, %v108_v8 }
  0x51   :  { %223 = vperm.xlu1 %5382, %v96_v39   ;;  %v5938_v56 = vpack.c.bf16 %v366_v48, %v362_v47  ;;  %v92_v57 = vld [vmem:[%s7103_s0 + $0x4] sm:$0x3]  ;;  %v5945_v58 = vpack.c.bf16 %v368_v51, %v364_v50  ;;  %v94_v60 = vld [vmem:[%s7103_s0 + $0x8] sm:$0x3]  ;;  %v300_v61 = vld [vmem:[%s7111_s8] sm:$0x3] }
  0x52   :  { %4205 = vmatpush1.bf16.msra.mxu0 %v5899_v18  ;;  %7181 = vst [vmem:[#allocation18_spill] sm:$0xff] %v5932_v49  ;;  %236 = vperm.xlu0 %5381, %v97_v43   ;;  %v93_v62 = vld [vmem:[%s7103_s0 + $0x6] sm:$0x3]  ;;  %7187 = vst [vmem:[#allocation24_spill] sm:$0xff] %v6005_v14  ;;  %v98_v17 = vld [vmem:[%s7104_s1] sm:$0xf] }
  0x53   :  { %4237 = vmatpush1.bf16.msra.mxu1 %v5903_v23  ;;  %4207 = vmatprep.subr.bf16.mxu0 %v5905_v25  ;;  %7182 = vst [vmem:[#allocation19_spill] sm:$0xff] %v5938_v56  ;;  %7183 = vst [vmem:[#allocation20_spill] sm:$0xff] %v5945_v58  ;;  %v99_v21 = vld [vmem:[%s7105_s2] sm:$0xf]  ;;  %v6025_v32 = vrot.slane %v98_v17, %v6005_v14  ;;  %v6047_v48 = vrot.slane %v98_v17, %v6015_v22 }
  0x54   :  { %4239 = vmatprep.subr.bf16.mxu1 %v5911_v31  ;;  %7188 = vst [vmem:[#allocation25_spill] sm:$0xff] %v6015_v22  ;;  %7189 = vst [vmem:[#allocation26_spill] sm:$0xff] %v6017_v26  ;;  %v100_v27 = vld [vmem:[%s7106_s3] sm:$0xf]  ;;  %v6028_v34 = vrot.slane %v99_v21, %v6005_v14  ;;  %v6031_v35 = vrot.slane %v99_v21, %v6015_v22  ;;  %v6038_v39 = vrot.slane %v99_v21, %v6017_v26 }
  0x55   :  { %210 = vperm.xlu1 %5382, %v95_v52   ;;  %7190 = vst [vmem:[#allocation27_spill] sm:$0xff] %v6022_v30  ;;  %v6041_v43 = vrot.slane %v99_v21, %v6022_v30  ;;  %v6044_v47 = vrot.slane %v100_v27, %v6005_v14  ;;  %v6050_v50 = vrot.slane %v98_v17, %v6017_v26 }
  0x56   :  { %4209 = vmatpush1.bf16.msra.mxu0 %v5920_v40  ;;  %171 = vperm.xlu0 %5381, %v92_v57   ;;  %7191 = vst [vmem:[#allocation28_spill] sm:$0xff] %v6028_v34  ;;  %7194 = vst [vmem:[#allocation31_spill] sm:$0xff] %v6038_v39  ;;  %v6053_v51 = vrot.slane %v100_v27, %v6015_v22  ;;  %v6056_v52 = vrot.slane %v100_v27, %v6017_v26 }
  0x57   :  { %4241 = vmatpush1.bf16.msra.mxu1 %v5927_v44  ;;  %4211 = vmatprep.subr.bf16.mxu0 %v5929_v45  ;;  %7195 = vst [vmem:[#allocation32_spill] sm:$0xff] %v6041_v43  ;;  %v6059_v57 = vrot.slane %v98_v17, %v6022_v30 }
  0x58   :  { %4243 = vmatprep.subr.bf16.mxu1 %v5932_v49  ;;  %7196 = vst [vmem:[#allocation33_spill] sm:$0xff] %v6056_v52 }
  0x59   :  { %197 = vperm.xlu1 %5382, %v94_v60   ;;  %v6062_v60 = vrot.slane %v100_v27, %v6022_v30 }
  0x5a   :  { %4213 = vmatpush1.bf16.msra.mxu0 %v5938_v56  ;;  %184 = vperm.xlu0 %5381, %v93_v62  }
  0x5b   :  { %4245 = vmatpush1.bf16.msra.mxu1 %v5945_v58  ;;  %4247 = vmatprep.subr.bf16.mxu0 %v5836_v6 }
  0x5c   :  { %4279 = vmatprep.subr.bf16.mxu1 %v5838_v10 }
  0x5d   :  { %435 = vmatmul.mubr.f32.vlgmr.msra.gmra.mrb[0].mxu0 %v300_v61 }
  0x5e   :  { %506 = vmatmul.mubr.f32.vlgmr.msra.gmra.mrb[0].mxu1 %v300_v61  ;;  %4249 = vmatpush1.bf16.msra.mxu0 %v5840_v11 }
  0x5f   :  { %4281 = vmatpush1.bf16.msra.mxu1 %v5843_v15  ;;  %4251 = vmatprep.subr.bf16.mxu0 %v5847_v19 }
  0x60   :  { %4283 = vmatprep.subr.bf16.mxu1 %v5849_v20  ;;  %608 = vmatprep.mubr.f32.mxu0 %v7118_v1 }
  0x61   :  { %679 = vmatprep.mubr.f32.mxu1 %v7118_v1 }
  0x62   :  { %4253 = vmatpush1.bf16.msra.mxu0 %v5852_v24 }
  0x63   :  { %4285 = vmatpush1.bf16.msra.mxu1 %v5856_v28  ;;  %4255 = vmatprep.subr.bf16.mxu0 %v5858_v29 }
  0x64   :  { %4287 = vmatprep.subr.bf16.mxu1 %v5860_v33 }
  0x66   :  { %4257 = vmatpush1.bf16.msra.mxu0 %v5863_v37 }
  0x67   :  { %4289 = vmatpush1.bf16.msra.mxu1 %v5867_v41  ;;  %4259 = vmatprep.subr.bf16.mxu0 %v5869_v42 }
  0x68   :  { %4291 = vmatprep.subr.bf16.mxu1 %v5872_v46 }
  0x6a   :  { %4261 = vmatpush1.bf16.msra.mxu0 %v5875_v53 }
  0x6b   :  { %4293 = vmatpush1.bf16.msra.mxu1 %v5879_v54  ;;  %4263 = vmatprep.subr.bf16.mxu0 %v5881_v55 }
  0x6c   :  { %4295 = vmatprep.subr.bf16.mxu1 %v5884_v59 }
  0x6e   :  { %4265 = vmatpush1.bf16.msra.mxu0 %v5887_v2 }
  0x6f   :  { %4297 = vmatpush1.bf16.msra.mxu1 %v5891_v3  ;;  %4267 = vmatprep.subr.bf16.mxu0 %v5893_v4 }
  0x70   :  { %4299 = vmatprep.subr.bf16.mxu1 %v5896_v9 }
  0x72   :  { %4269 = vmatpush1.bf16.msra.mxu0 %v5899_v18 }
  0x73   :  { %4301 = vmatpush1.bf16.msra.mxu1 %v5903_v23  ;;  %4271 = vmatprep.subr.bf16.mxu0 %v5905_v25 }
  0x74   :  { %4303 = vmatprep.subr.bf16.mxu1 %v5911_v31 }
  0x76   :  { %4273 = vmatpush1.bf16.msra.mxu0 %v5920_v40 }
  0x77   :  { %4305 = vmatpush1.bf16.msra.mxu1 %v5927_v44  ;;  %4275 = vmatprep.subr.bf16.mxu0 %v5929_v45 }
  0x78   :  { %4307 = vmatprep.subr.bf16.mxu1 %v5932_v49 }
  0x7a   :  { %4277 = vmatpush1.bf16.msra.mxu0 %v5938_v56 }
  0x7b   :  { %4309 = vmatpush1.bf16.msra.mxu1 %v5945_v58  ;;  %4311 = vmatprep.subr.bf16.mxu0 %v5836_v6 }
  0x7c   :  { %4343 = vmatprep.subr.bf16.mxu1 %v5838_v10 }
  0xcc   :  { %v5995_v63 = vpop.permute.xlu1 %158 }
  0xcd   :  { %7184 = vst [vmem:[#allocation21_spill] sm:$0xff] %v5995_v63  ;;  %v5997_v5 = vpop.permute.xlu0 %103 }
  0xce   :  { %v268_v0 = vmul.f32 %v6028_v34, %v5997_v5  ;;  %v270_v8 = vmul.f32 %v6031_v35, %v5997_v5  ;;  %v269_v27 = vmul.f32 %v6038_v39, %v5997_v5  ;;  %v271_v1 = vmul.f32 %v6041_v43, %v5997_v5 }
  0xd0   :  { %v5999_v7 = vpop.permute.xlu1 %223 }
  0xd1   :  { %7185 = vst [vmem:[#allocation22_spill] sm:$0xff] %v5999_v7  ;;  %v6001_v12 = vpop.permute.xlu0 %236 }
  0xd2   :  { %v239_v17 = vmul.f32 %v6001_v12, %v6025_v32  ;;  %v241_v63 = vmul.f32 %v6001_v12, %v6047_v48  ;;  %v240_v10 = vmul.f32 %v6001_v12, %v6050_v50 }
  0xd4   :  { %v6003_v13 = vpop.permute.xlu1 %210 }
  0xd5   :  { %7186 = vst [vmem:[#allocation23_spill] sm:$0xff] %v6003_v13  ;;  %v6007_v16 = vpop.permute.xlu0 %171  ;;  %v213_v21 = vmul.f32 %v6003_v13, %v6025_v32  ;;  %v215_v14 = vmul.f32 %v6003_v13, %v6047_v48  ;;  %v214_v31 = vmul.f32 %v6003_v13, %v6050_v50 }
  0xd6   :  { %v276_v7 = vmul.f32 %v6028_v34, %v6007_v16  ;;  %v278_v49 = vmul.f32 %v6031_v35, %v6007_v16 }
  0xd8   :  { %v6033_v36 = vpop.permute.xlu1 %197 }
  0xd9   :  { %7192 = vst [vmem:[#allocation29_spill] sm:$0xff] %v6033_v36  ;;  %v6035_v38 = vpop.permute.xlu0 %184  ;;  %v200_v61 = vmul.f32 %v6033_v36, %v6025_v32  ;;  %v202_v26 = vmul.f32 %v6033_v36, %v6047_v48  ;;  %v201_v56 = vmul.f32 %v6033_v36, %v6050_v50  ;;  %v203_v44 = vmul.f32 %v6033_v36, %v6059_v57 }
  0xda   :  { %7193 = vst [vmem:[#allocation30_spill] sm:$0xff] %v6035_v38  ;;  %v280_v62 = vmul.f32 %v6028_v34, %v6035_v38  ;;  %v282_v22 = vmul.f32 %v6031_v35, %v6035_v38  ;;  %v281_v45 = vmul.f32 %v6038_v39, %v6035_v38  ;;  %v283_v40 = vmul.f32 %v6041_v43, %v6035_v38 }
  0xdb   :  { %v204_v30 = vadd.f32 %v200_v61, %v6044_v47  ;;  %v242_v61 = vmul.f32 %v6001_v12, %v6059_v57  ;;  %v206_v58 = vadd.f32 %v202_v26, %v6053_v51  ;;  %v205_v26 = vadd.f32 %v201_v56, %v6056_v52 }
  0xdc   :  { %v207_v25 = vadd.f32 %v203_v44, %v6062_v60  ;;  %v277_v36 = vmul.f32 %v6038_v39, %v6007_v16  ;;  %v216_v38 = vmul.f32 %v6003_v13, %v6059_v57  ;;  %v218_v56 = vadd.f32 %v214_v31, %v6056_v52 }
  0xdd   :  { %v6095_v6 = vadd.f32 %v280_v62, %v204_v30  ;;  %v217_v30 = vadd.f32 %v213_v21, %v6044_v47  ;;  %v6109_v62 = vadd.f32 %v282_v22, %v206_v58  ;;  %v6122_v21 = vadd.f32 %v281_v45, %v205_v26 }
  0xde   :  { %v6129_v22 = vadd.f32 %v283_v40, %v207_v25  ;;  %v220_v44 = vadd.f32 %v216_v38, %v6062_v60  ;;  %v244_v45 = vadd.f32 %v240_v10, %v6056_v52  ;;  %v127_v38 = vmul.f32 %v6025_v32, %v5997_v5 }
  0xdf   :  { %7197 = vst [vmem:[#allocation34_spill] sm:$0xff] %v6095_v6  ;;  %7198 = vst [vmem:[#allocation35_spill] sm:$0xff] %v6109_v62  ;;  %v219_v6 = vadd.f32 %v215_v14, %v6053_v51  ;;  %v6116_v23 = vadd.f32 %v276_v7, %v217_v30  ;;  %v279_v14 = vmul.f32 %v6041_v43, %v6007_v16 }
  0xe0   :  { %7200 = vst [vmem:[#allocation37_spill] sm:$0xff] %v6122_v21  ;;  %7202 = vst [vmem:[#allocation39_spill] sm:$0xff] %v6129_v22  ;;  %v243_v7 = vadd.f32 %v239_v17, %v6044_v47  ;;  %v245_v30 = vadd.f32 %v241_v63, %v6053_v51  ;;  %v6144_v25 = vadd.f32 %v269_v27, %v244_v45 }
  0xe1   :  { %7199 = vst [vmem:[#allocation36_spill] sm:$0xff] %v6116_v23  ;;  %v6124_v58 = vadd.f32 %v278_v49, %v219_v6  ;;  %v6134_v23 = vadd.f32 %v277_v36, %v218_v56  ;;  %v246_v6 = vadd.f32 %v242_v61, %v6062_v60  ;;  %v6138_v49 = vadd.f32 %v279_v14, %v220_v44 }
  0xe2   :  { %v6140_v31 = vadd.f32 %v268_v0, %v243_v7  ;;  %v6142_v26 = vadd.f32 %v270_v8, %v245_v30  ;;  %7207 = vst [vmem:[#allocation44_spill] sm:$0xff] %v6144_v25  ;;  %v128_v63 = vmul.f32 %v6050_v50, %v5997_v5  ;;  %v152_v10 = vadd.f32 %v6044_v47, %v127_v38 }
  0xe3   :  { %7201 = vst [vmem:[#allocation38_spill] sm:$0xff] %v6124_v58  ;;  %7203 = vst [vmem:[#allocation40_spill] sm:$0xff] %v6134_v23  ;;  %v6146_v40 = vadd.f32 %v271_v1, %v246_v6  ;;  %v296_v36 = vmul.f32 %v6028_v34, %v6001_v12  ;;  %v297_v8 = vmul.f32 %v6038_v39, %v6001_v12 }
  0xe4   :  { %7204 = vst [vmem:[#allocation41_spill] sm:$0xff] %v6138_v49  ;;  %7205 = vst [vmem:[#allocation42_spill] sm:$0xff] %v6140_v31  ;;  %v153_v0 = vadd.f32 %v6056_v52, %v128_v63  ;;  %v130_v1 = vmul.f32 %v6059_v57, %v5997_v5  ;;  %v299_v45 = vmul.f32 %v6041_v43, %v6001_v12 }
  0xe5   :  { %7206 = vst [vmem:[#allocation43_spill] sm:$0xff] %v6142_v26  ;;  %7208 = vst [vmem:[#allocation45_spill] sm:$0xff] %v6146_v40  ;;  %v302_v17 = vadd.f32 %v296_v36, %v152_v10  ;;  %v129_v63 = vmul.f32 %v6047_v48, %v5997_v5 }
  0xe6   :  { %v303_v61 = vadd.f32 %v297_v8, %v153_v0  ;;  %v155_v30 = vadd.f32 %v6062_v60, %v130_v1  ;;  %v298_v0 = vmul.f32 %v6031_v35, %v6001_v12 }
  0xe7   :  { %v154_v36 = vadd.f32 %v6053_v51, %v129_v63 }
  0xe8   :  { %v305_v10 = vadd.f32 %v299_v45, %v155_v30 }
 0x130   :  { %v436_v27 = vpop.f32.mrb[0].mxu0 }
 0x131   :  { %v512_v56 = vadd.f32 %v436_v27, %v302_v17  ;;  %v507_v14 = vpop.f32.mrb[0].mxu1  ;;  %v438_v44 = vpop.f32.mrb[1].mxu0  ;;  %v304_v17 = vadd.f32 %v298_v0, %v154_v36  ;;  %v7210_v36 = vmov 0.0   ;;  %v7211_v0 = vld [vmem:[#allocation12_spill] sm:$0xff] }
 0x132   :  { %v513_v7 = vadd.f32 %v438_v44, %v303_v61  ;;  %v509_v6 = vpop.f32.mrb[1].mxu1 }
 0x133   :  { %v4049_v38 = vmul.f32 -1.442695, %v512_v56  ;;  %v515_v8 = vadd.f32 %v509_v6, %v305_v10  ;;  %v514_v27 = vadd.f32 %v507_v14, %v304_v17  ;;  %v7213_v17 = vld [vmem:[#allocation14_spill] sm:$0xff] }
 0x134   :  { %v4050_v40 = vmul.f32 -1.442695, %v513_v7  ;;  %v301_v7 = vld [vmem:[%s7112_s9] sm:$0x3] }
 0x135   :  { %5383 = vpow2.f32 %v4049_v38  ;;  %v4051_v1 = vmul.f32 -1.442695, %v515_v8  ;;  %v7212_v8 = vld [vmem:[#allocation13_spill] sm:$0xff] }
 0x136   :  { %5385 = vpow2.f32 %v4050_v40 }
 0x137   :  { %5387 = vpow2.f32 %v4051_v1  ;;  %v7214_v1 = vld [vmem:[#allocation15_spill] sm:$0xff] }
 0x138   :  { %5389 = vtanh.f32 %v514_v27  ;;  %v7215_v27 = vld [vmem:[#allocation16_spill] sm:$0xff] }
 0x13f   :  { %v5384_v61 = vpop.eup %5383 }
 0x140   :  { %v5386_v44 = vpop.eup %5385  ;;  %v519_v25 = vadd.f32 1.0, %v5384_v61  ;;  %v7216_v61 = vld [vmem:[#allocation17_spill] sm:$0xff] }
 0x141   :  { %v525_v56 = vadd.f32 1.0, %v5386_v44  ;;  %v5388_v5 = vpop.eup %5387  ;;  %v7217_v44 = vld [vmem:[#allocation18_spill] sm:$0xff] }
 0x142   :  { %5391 = vrcp.f32 %v519_v25  ;;  %v5390_v40 = vpop.eup %5389  ;;  %v532_v6 = vadd.f32 1.0, %v5388_v5  ;;  %v7219_v5 = vld [vmem:[#allocation20_spill] sm:$0xff] }
 0x143   :  { %5393 = vrcp.f32 %v525_v56  ;;  %v7218_v56 = vld [vmem:[#allocation19_spill] sm:$0xff] }
 0x144   :  { %5395 = vrcp.f32 %v532_v6 }
 0x14c   :  { %v5392_v30 = vpop.eup %5391 }
 0x14d   :  { %v5394_v12 = vpop.eup %5393  ;;  %v536_v45 = vmul.f32 %v5392_v30, %v5390_v40  ;;  %v7220_v40 = vld [vmem:[#allocation10_spill] sm:$0xff]  ;;  %v7222_v30 = vld [vmem:[#allocation21_spill] sm:$0xff] }
 0x14e   :  { %v535_v38 = vmul.f32 %v5394_v12, %v301_v7  ;;  %v5396_v63 = vpop.eup %5395  ;;  %v7221_v7 = vld [vmem:[#allocation11_spill] sm:$0xff]  ;;  %v161_v12 = vmul.f32 %v7222_v30, %v6025_v32  ;;  %v164_v26 = vmul.f32 %v7222_v30, %v6059_v57 }
 0x150   :  { %v6171_v14 = vadd.f32 %v536_v45, %v535_v38  ;;  %v162_v45 = vmul.f32 %v7222_v30, %v6050_v50  ;;  %v165_v6 = vadd.f32 %v161_v12, %v6044_v47  ;;  %v7223_v38 = vld [vmem:[#allocation22_spill] sm:$0xff]  ;;  %v168_v12 = vadd.f32 %v164_v26, %v6062_v60 }
 0x152   :  { %5397 = vtanh.f32 %v6171_v14 }
 0x15c   :  { %v5398_v10 = vpop.eup %5397 }
 0x15d   :  { %v6174_v25 = vmul.f32 %v5398_v10, %v5396_v63  ;;  %v292_v63 = vmul.f32 %v6028_v34, %v7223_v38  ;;  %v166_v10 = vadd.f32 %v162_v45, %v6056_v52  ;;  %v295_v34 = vmul.f32 %v6041_v43, %v7223_v38 }
 0x15f   :  { %7209 = vst [vmem:[#allocation46_spill] sm:$0xff] %v6174_v25  ;;  %609 = vmatmul.mubr.f32.vlgmr.msra.gmra.mrb[2].mxu0 %v6174_v25  ;;  %680 = vmatmul.mubr.f32.vlgmr.msra.gmra.mrb[2].mxu1 %v6174_v25  ;;  %v293_v25 = vmul.f32 %v6038_v39, %v7223_v38  ;;  %v540_v31 = vadd.f32 %v292_v63, %v165_v6 }
 0x160   :  { %4313 = vmatpush1.bf16.msra.mxu0 %v5840_v11  ;;  %4345 = vmatpush1.bf16.msra.mxu1 %v5843_v15  ;;  %v163_v39 = vmul.f32 %v7222_v30, %v6047_v48  ;;  %v543_v6 = vadd.f32 %v295_v34, %v168_v12 }
 0x161   :  { %4315 = vmatprep.subr.bf16.mxu0 %v5847_v19  ;;  %4347 = vmatprep.subr.bf16.mxu1 %v5849_v20  ;;  %v541_v58 = vadd.f32 %v293_v25, %v166_v10 }
 0x162   :  { %782 = vmatprep.mubr.f32.mxu0 %v7210_v36  ;;  %853 = vmatprep.mubr.f32.mxu1 %v7210_v36  ;;  %v167_v63 = vadd.f32 %v163_v39, %v6053_v51 }
 0x164   :  { %4317 = vmatpush1.bf16.msra.mxu0 %v5852_v24  ;;  %4349 = vmatpush1.bf16.msra.mxu1 %v5856_v28 }
 0x165   :  { %4319 = vmatprep.subr.bf16.mxu0 %v5858_v29  ;;  %4351 = vmatprep.subr.bf16.mxu1 %v5860_v33 }
 0x168   :  { %4321 = vmatpush1.bf16.msra.mxu0 %v5863_v37  ;;  %4353 = vmatpush1.bf16.msra.mxu1 %v5867_v41 }
 0x169   :  { %4323 = vmatprep.subr.bf16.mxu0 %v5869_v42  ;;  %4355 = vmatprep.subr.bf16.mxu1 %v5872_v46 }
 0x16c   :  { %4325 = vmatpush1.bf16.msra.mxu0 %v5875_v53  ;;  %4357 = vmatpush1.bf16.msra.mxu1 %v5879_v54 }
 0x16d   :  { %4327 = vmatprep.subr.bf16.mxu0 %v5881_v55  ;;  %4359 = vmatprep.subr.bf16.mxu1 %v5884_v59 }
 0x170   :  { %4329 = vmatpush1.bf16.msra.mxu0 %v5887_v2  ;;  %4361 = vmatpush1.bf16.msra.mxu1 %v5891_v3 }
 0x171   :  { %4331 = vmatprep.subr.bf16.mxu0 %v5893_v4  ;;  %4363 = vmatprep.subr.bf16.mxu1 %v5896_v9 }
 0x174   :  { %4333 = vmatpush1.bf16.msra.mxu0 %v5899_v18  ;;  %4365 = vmatpush1.bf16.msra.mxu1 %v7211_v0 }
 0x175   :  { %4335 = vmatprep.subr.bf16.mxu0 %v7212_v8  ;;  %4367 = vmatprep.subr.bf16.mxu1 %v7213_v17 }
 0x178   :  { %4337 = vmatpush1.bf16.msra.mxu0 %v7214_v1  ;;  %4369 = vmatpush1.bf16.msra.mxu1 %v7215_v27 }
 0x179   :  { %4339 = vmatprep.subr.bf16.mxu0 %v7216_v61  ;;  %4371 = vmatprep.subr.bf16.mxu1 %v7217_v44 }
 0x17c   :  { %4341 = vmatpush1.bf16.msra.mxu0 %v7218_v56  ;;  %4373 = vmatpush1.bf16.msra.mxu1 %v7219_v5 }
 0x17d   :  { %4375 = vmatprep.subr.bf16.mxu0 %v7220_v40  ;;  %4407 = vmatprep.subr.bf16.mxu1 %v7221_v7 }
 0x232   :  { %v610_v49 = vpop.f32.mrb[2].mxu0  ;;  %v681_v23 = vpop.f32.mrb[2].mxu1 }
 0x233   :  { %v686_v22 = vadd.f32 %v610_v49, %v540_v31  ;;  %v612_v21 = vpop.f32.mrb[3].mxu0  ;;  %v683_v62 = vpop.f32.mrb[3].mxu1  ;;  %v294_v49 = vmul.f32 %v6031_v35, %v7223_v38 }
 0x234   :  { %v687_v13 = vadd.f32 %v612_v21, %v541_v58  ;;  %v689_v31 = vadd.f32 %v683_v62, %v543_v6 }
 0x235   :  { %v4052_v45 = vmul.f32 -1.442695, %v686_v22  ;;  %v542_v21 = vadd.f32 %v294_v49, %v167_v63  ;;  %v7225_v49 = vld [vmem:[#allocation23_spill] sm:$0xff] }
 0x236   :  { %v4053_v52 = vmul.f32 -1.442695, %v687_v13  ;;  %v4054_v58 = vmul.f32 -1.442695, %v689_v31  ;;  %v7226_v31 = vld [vmem:[#allocation28_spill] sm:$0xff] }
 0x237   :  { %5399 = vpow2.f32 %v4052_v45  ;;  %v688_v26 = vadd.f32 %v681_v23, %v542_v21  ;;  %v288_v21 = vmul.f32 %v7226_v31, %v7225_v49 }
 0x238   :  { %5401 = vpow2.f32 %v4053_v52 }
 0x239   :  { %5403 = vpow2.f32 %v4054_v58  ;;  %v7227_v58 = vld [vmem:[#allocation33_spill] sm:$0xff] }
 0x23a   :  { %5405 = vtanh.f32 %v688_v26 }
 0x241   :  { %v5400_v25 = vpop.eup %5399 }
 0x242   :  { %v5402_v10 = vpop.eup %5401  ;;  %v693_v43 = vadd.f32 1.0, %v5400_v25  ;;  %v7228_v25 = vld [vmem:[#allocation31_spill] sm:$0xff] }
 0x243   :  { %v699_v22 = vadd.f32 1.0, %v5402_v10  ;;  %v5404_v13 = vpop.eup %5403  ;;  %v289_v10 = vmul.f32 %v7228_v25, %v7225_v49  ;;  %v176_v25 = vmul.f32 %v6007_v16, %v6047_v48 }
 0x244   :  { %5407 = vrcp.f32 %v693_v43  ;;  %v5406_v52 = vpop.eup %5405  ;;  %v706_v45 = vadd.f32 1.0, %v5404_v13  ;;  %v174_v43 = vmul.f32 %v6007_v16, %v6025_v32 }
 0x245   :  { %5409 = vrcp.f32 %v699_v22  ;;  %v177_v22 = vmul.f32 %v6007_v16, %v6059_v57 }
 0x246   :  { %5411 = vrcp.f32 %v706_v45 }
 0x24e   :  { %v5408_v34 = vpop.eup %5407 }
 0x24f   :  { %v5410_v12 = vpop.eup %5409  ;;  %v710_v39 = vmul.f32 %v5408_v34, %v5406_v52 }
 0x250   :  { %v709_v30 = vmul.f32 %v5410_v12, %v6171_v14  ;;  %v5412_v23 = vpop.eup %5411  ;;  %v175_v14 = vmul.f32 %v6007_v16, %v6050_v50 }
 0x252   :  { %v6233_v62 = vadd.f32 %v710_v39, %v709_v30  ;;  %v178_v30 = vadd.f32 %v174_v43, %v6044_v47  ;;  %v179_v26 = vadd.f32 %v175_v14, %v7227_v58  ;;  %v181_v43 = vadd.f32 %v177_v22, %v6062_v60 }
 0x254   :  { %5413 = vtanh.f32 %v6233_v62  ;;  %v714_v13 = vadd.f32 %v288_v21, %v178_v30  ;;  %v715_v12 = vadd.f32 %v289_v10, %v179_v26  ;;  %v180_v21 = vadd.f32 %v176_v25, %v6053_v51 }
 0x255   :  { %v290_v26 = vmul.f32 %v6031_v35, %v7225_v49 }
 0x25e   :  { %v5414_v6 = vpop.eup %5413 }
 0x25f   :  { %v6236_v63 = vmul.f32 %v5414_v6, %v5412_v23 }
 0x261   :  { %7224 = vst [vmem:[#allocation12_spill] sm:$0xff] %v6236_v63  ;;  %783 = vmatmul.mubr.f32.vlgmr.msra.gmra.mrb[4].mxu0 %v6236_v63  ;;  %854 = vmatmul.mubr.f32.vlgmr.msra.gmra.mrb[4].mxu1 %v6236_v63  ;;  %v7229_v63 = vld [vmem:[#allocation32_spill] sm:$0xff] }
 0x262   :  { %4377 = vmatpush1.bf16.msra.mxu0 %v5840_v11  ;;  %4409 = vmatpush1.bf16.msra.mxu1 %v5843_v15  ;;  %v291_v38 = vmul.f32 %v7229_v63, %v7225_v49 }
 0x263   :  { %4379 = vmatprep.subr.bf16.mxu0 %v5847_v19  ;;  %4411 = vmatprep.subr.bf16.mxu1 %v5849_v20 }
 0x264   :  { %956 = vmatprep.mubr.f32.mxu0 %v7210_v36  ;;  %1027 = vmatprep.mubr.f32.mxu1 %v7210_v36  ;;  %v717_v30 = vadd.f32 %v291_v38, %v181_v43 }
 0x266   :  { %4381 = vmatpush1.bf16.msra.mxu0 %v5852_v24  ;;  %4413 = vmatpush1.bf16.msra.mxu1 %v5856_v28 }
 0x267   :  { %4383 = vmatprep.subr.bf16.mxu0 %v5858_v29  ;;  %4415 = vmatprep.subr.bf16.mxu1 %v5860_v33 }
 0x26a   :  { %4385 = vmatpush1.bf16.msra.mxu0 %v5863_v37  ;;  %4417 = vmatpush1.bf16.msra.mxu1 %v5867_v41 }
 0x26b   :  { %4387 = vmatprep.subr.bf16.mxu0 %v5869_v42  ;;  %4419 = vmatprep.subr.bf16.mxu1 %v5872_v46 }
 0x26e   :  { %4389 = vmatpush1.bf16.msra.mxu0 %v5875_v53  ;;  %4421 = vmatpush1.bf16.msra.mxu1 %v5879_v54 }
 0x26f   :  { %4391 = vmatprep.subr.bf16.mxu0 %v5881_v55  ;;  %4423 = vmatprep.subr.bf16.mxu1 %v5884_v59 }
 0x272   :  { %4393 = vmatpush1.bf16.msra.mxu0 %v5887_v2  ;;  %4425 = vmatpush1.bf16.msra.mxu1 %v5891_v3 }
 0x273   :  { %4395 = vmatprep.subr.bf16.mxu0 %v5893_v4  ;;  %4427 = vmatprep.subr.bf16.mxu1 %v5896_v9 }
 0x276   :  { %4397 = vmatpush1.bf16.msra.mxu0 %v5899_v18  ;;  %4429 = vmatpush1.bf16.msra.mxu1 %v7211_v0 }
 0x277   :  { %4399 = vmatprep.subr.bf16.mxu0 %v7212_v8  ;;  %4431 = vmatprep.subr.bf16.mxu1 %v7213_v17 }
 0x27a   :  { %4401 = vmatpush1.bf16.msra.mxu0 %v7214_v1  ;;  %4433 = vmatpush1.bf16.msra.mxu1 %v7215_v27 }
 0x27b   :  { %4403 = vmatprep.subr.bf16.mxu0 %v7216_v61  ;;  %4435 = vmatprep.subr.bf16.mxu1 %v7217_v44 }
 0x27e   :  { %4405 = vmatpush1.bf16.msra.mxu0 %v7218_v56  ;;  %4437 = vmatpush1.bf16.msra.mxu1 %v7219_v5 }
 0x27f   :  { %4439 = vmatprep.subr.bf16.mxu0 %v7220_v40  ;;  %4471 = vmatprep.subr.bf16.mxu1 %v7221_v7 }
 0x334   :  { %v784_v52 = vpop.f32.mrb[4].mxu0  ;;  %v855_v34 = vpop.f32.mrb[4].mxu1 }
 0x335   :  { %v860_v39 = vadd.f32 %v784_v52, %v714_v13  ;;  %v786_v45 = vpop.f32.mrb[5].mxu0  ;;  %v857_v23 = vpop.f32.mrb[5].mxu1  ;;  %v716_v13 = vadd.f32 %v290_v26, %v180_v21 }
 0x336   :  { %v861_v6 = vadd.f32 %v786_v45, %v715_v12  ;;  %v863_v10 = vadd.f32 %v857_v23, %v717_v30 }
 0x337   :  { %v4055_v14 = vmul.f32 -1.442695, %v860_v39  ;;  %v862_v22 = vadd.f32 %v855_v34, %v716_v13 }
 0x338   :  { %v4056_v58 = vmul.f32 -1.442695, %v861_v6  ;;  %v4057_v52 = vmul.f32 -1.442695, %v863_v10  ;;  %v7231_v10 = vld [vmem:[#allocation29_spill] sm:$0xff] }
 0x339   :  { %5415 = vpow2.f32 %v4055_v14  ;;  %v284_v13 = vmul.f32 %v7226_v31, %v7231_v10 }
 0x33a   :  { %5417 = vpow2.f32 %v4056_v58 }
 0x33b   :  { %5419 = vpow2.f32 %v4057_v52  ;;  %v7232_v52 = vld [vmem:[#allocation33_spill] sm:$0xff] }
 0x33c   :  { %5421 = vtanh.f32 %v862_v22 }
 0x343   :  { %v5416_v12 = vpop.eup %5415 }
 0x344   :  { %v5418_v45 = vpop.eup %5417  ;;  %v867_v63 = vadd.f32 1.0, %v5416_v12  ;;  %v7233_v12 = vld [vmem:[#allocation31_spill] sm:$0xff] }
 0x345   :  { %v873_v39 = vadd.f32 1.0, %v5418_v45  ;;  %v5420_v16 = vpop.eup %5419  ;;  %v285_v45 = vmul.f32 %v7233_v12, %v7231_v10 }
 0x346   :  { %5423 = vrcp.f32 %v867_v63  ;;  %v5422_v58 = vpop.eup %5421  ;;  %v880_v43 = vadd.f32 1.0, %v5420_v16 }
 0x347   :  { %5425 = vrcp.f32 %v873_v39 }
 0x348   :  { %5427 = vrcp.f32 %v880_v43 }
 0x350   :  { %v5424_v38 = vpop.eup %5423 }
 0x351   :  { %v5426_v6 = vpop.eup %5425  ;;  %v884_v25 = vmul.f32 %v5424_v38, %v5422_v58 }
 0x352   :  { %v883_v49 = vmul.f32 %v5426_v6, %v6233_v62  ;;  %v5428_v34 = vpop.eup %5427  ;;  %v7230_v62 = vld [vmem:[#allocation30_spill] sm:$0xff] }
 0x353   :  { %v187_v63 = vmul.f32 %v7230_v62, %v6025_v32  ;;  %v188_v21 = vmul.f32 %v7230_v62, %v6050_v50  ;;  %v190_v39 = vmul.f32 %v7230_v62, %v6059_v57  ;;  %v189_v12 = vmul.f32 %v7230_v62, %v6047_v48 }
 0x354   :  { %v6295_v23 = vadd.f32 %v884_v25, %v883_v49 }
 0x355   :  { %v191_v26 = vadd.f32 %v187_v63, %v6044_v47  ;;  %v192_v22 = vadd.f32 %v188_v21, %v7232_v52  ;;  %v7234_v63 = vld [vmem:[#allocation32_spill] sm:$0xff] }
 0x356   :  { %5429 = vtanh.f32 %v6295_v23  ;;  %v287_v31 = vmul.f32 %v7234_v63, %v7231_v10 }
 0x357   :  { %v888_v16 = vadd.f32 %v284_v13, %v191_v26  ;;  %v889_v6 = vadd.f32 %v285_v45, %v192_v22  ;;  %v193_v13 = vadd.f32 %v189_v12, %v6053_v51  ;;  %v286_v22 = vmul.f32 %v6031_v35, %v7231_v10 }
 0x360   :  { %v5430_v14 = vpop.eup %5429 }
 0x361   :  { %v6298_v30 = vmul.f32 %v5430_v14, %v5428_v34  ;;  %v194_v14 = vadd.f32 %v190_v39, %v6062_v60 }
 0x363   :  { %957 = vmatmul.mubr.f32.vlgmr.msra.gmra.mrb[6].mxu0 %v6298_v30  ;;  %1028 = vmatmul.mubr.f32.vlgmr.msra.gmra.mrb[6].mxu1 %v6298_v30  ;;  %v891_v26 = vadd.f32 %v287_v31, %v194_v14 }
 0x364   :  { %4441 = vmatpush1.bf16.msra.mxu0 %v5840_v11  ;;  %4473 = vmatpush1.bf16.msra.mxu1 %v5843_v15 }
 0x365   :  { %4443 = vmatprep.subr.bf16.mxu0 %v5847_v19  ;;  %4475 = vmatprep.subr.bf16.mxu1 %v5849_v20 }
 0x366   :  { %1130 = vmatprep.mubr.f32.mxu0 %v7210_v36  ;;  %1201 = vmatprep.mubr.f32.mxu1 %v7210_v36 }
 0x368   :  { %4445 = vmatpush1.bf16.msra.mxu0 %v5852_v24  ;;  %4477 = vmatpush1.bf16.msra.mxu1 %v5856_v28 }
 0x369   :  { %4447 = vmatprep.subr.bf16.mxu0 %v5858_v29  ;;  %4479 = vmatprep.subr.bf16.mxu1 %v5860_v33 }
 0x36c   :  { %4449 = vmatpush1.bf16.msra.mxu0 %v5863_v37  ;;  %4481 = vmatpush1.bf16.msra.mxu1 %v5867_v41 }
 0x36d   :  { %4451 = vmatprep.subr.bf16.mxu0 %v5869_v42  ;;  %4483 = vmatprep.subr.bf16.mxu1 %v5872_v46 }
 0x370   :  { %4453 = vmatpush1.bf16.msra.mxu0 %v5875_v53  ;;  %4485 = vmatpush1.bf16.msra.mxu1 %v5879_v54 }
 0x371   :  { %4455 = vmatprep.subr.bf16.mxu0 %v5881_v55  ;;  %4487 = vmatprep.subr.bf16.mxu1 %v5884_v59 }
 0x374   :  { %4457 = vmatpush1.bf16.msra.mxu0 %v5887_v2  ;;  %4489 = vmatpush1.bf16.msra.mxu1 %v5891_v3 }
 0x375   :  { %4459 = vmatprep.subr.bf16.mxu0 %v5893_v4  ;;  %4491 = vmatprep.subr.bf16.mxu1 %v5896_v9 }
 0x378   :  { %4461 = vmatpush1.bf16.msra.mxu0 %v5899_v18  ;;  %4493 = vmatpush1.bf16.msra.mxu1 %v7211_v0 }
 0x379   :  { %4463 = vmatprep.subr.bf16.mxu0 %v7212_v8  ;;  %4495 = vmatprep.subr.bf16.mxu1 %v7213_v17 }
 0x37c   :  { %4465 = vmatpush1.bf16.msra.mxu0 %v7214_v1  ;;  %4497 = vmatpush1.bf16.msra.mxu1 %v7215_v27 }
 0x37d   :  { %4467 = vmatprep.subr.bf16.mxu0 %v7216_v61  ;;  %4499 = vmatprep.subr.bf16.mxu1 %v7217_v44 }
 0x380   :  { %4469 = vmatpush1.bf16.msra.mxu0 %v7218_v56  ;;  %4501 = vmatpush1.bf16.msra.mxu1 %v7219_v5 }
 0x381   :  { %4503 = vmatprep.subr.bf16.mxu0 %v7220_v40  ;;  %4535 = vmatprep.subr.bf16.mxu1 %v7221_v7 }
 0x436   :  { %v958_v58 = vpop.f32.mrb[6].mxu0  ;;  %v1029_v38 = vpop.f32.mrb[6].mxu1 }
 0x437   :  { %v1034_v25 = vadd.f32 %v958_v58, %v888_v16  ;;  %v960_v43 = vpop.f32.mrb[7].mxu0  ;;  %v1031_v49 = vpop.f32.mrb[7].mxu1  ;;  %v890_v16 = vadd.f32 %v286_v22, %v193_v13  ;;  %v7235_v13 = vld [vmem:[#allocation34_spill] sm:$0xff] }
 0x438   :  { %v1035_v34 = vadd.f32 %v960_v43, %v889_v6  ;;  %v1037_v45 = vadd.f32 %v1031_v49, %v891_v26 }
 0x439   :  { %v4058_v21 = vmul.f32 -1.442695, %v1034_v25  ;;  %v1036_v39 = vadd.f32 %v1029_v38, %v890_v16 }
 0x43a   :  { %v4059_v52 = vmul.f32 -1.442695, %v1035_v34  ;;  %v4060_v58 = vmul.f32 -1.442695, %v1037_v45  ;;  %v7236_v45 = vld [vmem:[#allocation35_spill] sm:$0xff] }
 0x43b   :  { %5431 = vpow2.f32 %v4058_v21 }
 0x43c   :  { %5433 = vpow2.f32 %v4059_v52 }
 0x43d   :  { %5435 = vpow2.f32 %v4060_v58 }
 0x43e   :  { %5437 = vtanh.f32 %v1036_v39 }
 0x445   :  { %v5432_v6 = vpop.eup %5431 }
 0x446   :  { %v5434_v43 = vpop.eup %5433  ;;  %v1041_v63 = vadd.f32 1.0, %v5432_v6  ;;  %v7237_v6 = vld [vmem:[#allocation37_spill] sm:$0xff] }
 0x447   :  { %v1047_v25 = vadd.f32 1.0, %v5434_v43  ;;  %v5436_v62 = vpop.eup %5435 }
 0x448   :  { %5439 = vrcp.f32 %v1041_v63  ;;  %v5438_v52 = vpop.eup %5437  ;;  %v1054_v14 = vadd.f32 1.0, %v5436_v62 }
 0x449   :  { %5441 = vrcp.f32 %v1047_v25  ;;  %v7238_v25 = vld [vmem:[#allocation39_spill] sm:$0xff] }
 0x44a   :  { %5443 = vrcp.f32 %v1054_v14 }
 0x452   :  { %v5440_v31 = vpop.eup %5439 }
 0x453   :  { %v5442_v34 = vpop.eup %5441  ;;  %v1058_v12 = vmul.f32 %v5440_v31, %v5438_v52 }
 0x454   :  { %v1057_v10 = vmul.f32 %v5442_v34, %v6295_v23  ;;  %v5444_v38 = vpop.eup %5443 }
 0x456   :  { %v6357_v49 = vadd.f32 %v1058_v12, %v1057_v10 }
 0x458   :  { %5445 = vtanh.f32 %v6357_v49 }
 0x462   :  { %v5446_v21 = vpop.eup %5445 }
 0x463   :  { %v6360_v26 = vmul.f32 %v5446_v21, %v5444_v38 }
 0x465   :  { %1131 = vmatmul.mubr.f32.vlgmr.msra.gmra.mrb[8].mxu0 %v6360_v26  ;;  %1202 = vmatmul.mubr.f32.vlgmr.msra.gmra.mrb[8].mxu1 %v6360_v26 }
 0x466   :  { %4505 = vmatpush1.bf16.msra.mxu0 %v5840_v11  ;;  %4537 = vmatpush1.bf16.msra.mxu1 %v5843_v15 }
 0x467   :  { %4507 = vmatprep.subr.bf16.mxu0 %v5847_v19  ;;  %4539 = vmatprep.subr.bf16.mxu1 %v5849_v20 }
 0x468   :  { %1304 = vmatprep.mubr.f32.mxu0 %v7210_v36  ;;  %1375 = vmatprep.mubr.f32.mxu1 %v7210_v36 }
 0x46a   :  { %4509 = vmatpush1.bf16.msra.mxu0 %v5852_v24  ;;  %4541 = vmatpush1.bf16.msra.mxu1 %v5856_v28 }
 0x46b   :  { %4511 = vmatprep.subr.bf16.mxu0 %v5858_v29  ;;  %4543 = vmatprep.subr.bf16.mxu1 %v5860_v33 }
 0x46e   :  { %4513 = vmatpush1.bf16.msra.mxu0 %v5863_v37  ;;  %4545 = vmatpush1.bf16.msra.mxu1 %v5867_v41 }
 0x46f   :  { %4515 = vmatprep.subr.bf16.mxu0 %v5869_v42  ;;  %4547 = vmatprep.subr.bf16.mxu1 %v5872_v46 }
 0x472   :  { %4517 = vmatpush1.bf16.msra.mxu0 %v5875_v53  ;;  %4549 = vmatpush1.bf16.msra.mxu1 %v5879_v54 }
 0x473   :  { %4519 = vmatprep.subr.bf16.mxu0 %v5881_v55  ;;  %4551 = vmatprep.subr.bf16.mxu1 %v5884_v59 }
 0x476   :  { %4521 = vmatpush1.bf16.msra.mxu0 %v5887_v2  ;;  %4553 = vmatpush1.bf16.msra.mxu1 %v5891_v3 }
 0x477   :  { %4523 = vmatprep.subr.bf16.mxu0 %v5893_v4  ;;  %4555 = vmatprep.subr.bf16.mxu1 %v5896_v9 }
 0x47a   :  { %4525 = vmatpush1.bf16.msra.mxu0 %v5899_v18  ;;  %4557 = vmatpush1.bf16.msra.mxu1 %v7211_v0 }
 0x47b   :  { %4527 = vmatprep.subr.bf16.mxu0 %v7212_v8  ;;  %4559 = vmatprep.subr.bf16.mxu1 %v7213_v17 }
 0x47e   :  { %4529 = vmatpush1.bf16.msra.mxu0 %v7214_v1  ;;  %4561 = vmatpush1.bf16.msra.mxu1 %v7215_v27 }
 0x47f   :  { %4531 = vmatprep.subr.bf16.mxu0 %v7216_v61  ;;  %4563 = vmatprep.subr.bf16.mxu1 %v7217_v44 }
 0x482   :  { %4533 = vmatpush1.bf16.msra.mxu0 %v7218_v56  ;;  %4565 = vmatpush1.bf16.msra.mxu1 %v7219_v5 }
 0x483   :  { %4567 = vmatprep.subr.bf16.mxu0 %v7220_v40  ;;  %4599 = vmatprep.subr.bf16.mxu1 %v7221_v7 }
 0x538   :  { %v1132_v23 = vpop.f32.mrb[8].mxu0  ;;  %v1203_v63 = vpop.f32.mrb[8].mxu1 }
 0x539   :  { %v1208_v22 = vadd.f32 %v1132_v23, %v7235_v13  ;;  %v1210_v16 = vadd.f32 %v1203_v63, %v7236_v45  ;;  %v1134_v58 = vpop.f32.mrb[9].mxu0  ;;  %v1205_v39 = vpop.f32.mrb[9].mxu1 }
 0x53a   :  { %v1209_v43 = vadd.f32 %v1134_v58, %v7237_v6  ;;  %v1211_v62 = vadd.f32 %v1205_v39, %v7238_v25 }
 0x53b   :  { %v4061_v52 = vmul.f32 -1.442695, %v1208_v22 }
 0x53c   :  { %v4062_v31 = vmul.f32 -1.442695, %v1209_v43  ;;  %v4063_v34 = vmul.f32 -1.442695, %v1211_v62  ;;  %v7239_v62 = vld [vmem:[#allocation36_spill] sm:$0xff] }
 0x53d   :  { %5447 = vpow2.f32 %v4061_v52 }
 0x53e   :  { %5449 = vpow2.f32 %v4062_v31  ;;  %v7240_v31 = vld [vmem:[#allocation38_spill] sm:$0xff] }
 0x53f   :  { %5451 = vpow2.f32 %v4063_v34 }
 0x540   :  { %5453 = vtanh.f32 %v1210_v16 }
 0x547   :  { %v5448_v12 = vpop.eup %5447 }
 0x548   :  { %v5450_v14 = vpop.eup %5449  ;;  %v1215_v10 = vadd.f32 1.0, %v5448_v12 }
 0x549   :  { %v1221_v38 = vadd.f32 1.0, %v5450_v14  ;;  %v5452_v21 = vpop.eup %5451 }
 0x54a   :  { %5455 = vrcp.f32 %v1215_v10  ;;  %v5454_v23 = vpop.eup %5453  ;;  %v1228_v58 = vadd.f32 1.0, %v5452_v21  ;;  %v7241_v10 = vld [vmem:[#allocation40_spill] sm:$0xff]  ;;  %v7242_v21 = vld [vmem:[#allocation41_spill] sm:$0xff] }
 0x54b   :  { %5457 = vrcp.f32 %v1221_v38 }
 0x54c   :  { %5459 = vrcp.f32 %v1228_v58 }
 0x554   :  { %v5456_v63 = vpop.eup %5455 }
 0x555   :  { %v5458_v13 = vpop.eup %5457  ;;  %v1232_v45 = vmul.f32 %v5456_v63, %v5454_v23 }
 0x556   :  { %v1231_v22 = vmul.f32 %v5458_v13, %v6357_v49  ;;  %v5460_v6 = vpop.eup %5459 }
 0x558   :  { %v6403_v39 = vadd.f32 %v1232_v45, %v1231_v22 }
 0x55a   :  { %5461 = vtanh.f32 %v6403_v39 }
 0x564   :  { %v5462_v43 = vpop.eup %5461 }
 0x565   :  { %v6406_v25 = vmul.f32 %v5462_v43, %v5460_v6 }
 0x567   :  { %1305 = vmatmul.mubr.f32.vlgmr.msra.gmra.mrb[10].mxu0 %v6406_v25  ;;  %1376 = vmatmul.mubr.f32.vlgmr.msra.gmra.mrb[10].mxu1 %v6406_v25 }
 0x568   :  { %4569 = vmatpush1.bf16.msra.mxu0 %v5840_v11  ;;  %4601 = vmatpush1.bf16.msra.mxu1 %v5843_v15 }
 0x569   :  { %4571 = vmatprep.subr.bf16.mxu0 %v5847_v19  ;;  %4603 = vmatprep.subr.bf16.mxu1 %v5849_v20 }
 0x56a   :  { %1478 = vmatprep.mubr.f32.mxu0 %v7210_v36  ;;  %1549 = vmatprep.mubr.f32.mxu1 %v7210_v36 }
 0x56c   :  { %4573 = vmatpush1.bf16.msra.mxu0 %v5852_v24  ;;  %4605 = vmatpush1.bf16.msra.mxu1 %v5856_v28 }
 0x56d   :  { %4575 = vmatprep.subr.bf16.mxu0 %v5858_v29  ;;  %4607 = vmatprep.subr.bf16.mxu1 %v5860_v33 }
 0x570   :  { %4577 = vmatpush1.bf16.msra.mxu0 %v5863_v37  ;;  %4609 = vmatpush1.bf16.msra.mxu1 %v5867_v41 }
 0x571   :  { %4579 = vmatprep.subr.bf16.mxu0 %v5869_v42  ;;  %4611 = vmatprep.subr.bf16.mxu1 %v5872_v46 }
 0x574   :  { %4581 = vmatpush1.bf16.msra.mxu0 %v5875_v53  ;;  %4613 = vmatpush1.bf16.msra.mxu1 %v5879_v54 }
 0x575   :  { %4583 = vmatprep.subr.bf16.mxu0 %v5881_v55  ;;  %4615 = vmatprep.subr.bf16.mxu1 %v5884_v59 }
 0x578   :  { %4585 = vmatpush1.bf16.msra.mxu0 %v5887_v2  ;;  %4617 = vmatpush1.bf16.msra.mxu1 %v5891_v3 }
 0x579   :  { %4587 = vmatprep.subr.bf16.mxu0 %v5893_v4  ;;  %4619 = vmatprep.subr.bf16.mxu1 %v5896_v9 }
 0x57c   :  { %4589 = vmatpush1.bf16.msra.mxu0 %v5899_v18  ;;  %4621 = vmatpush1.bf16.msra.mxu1 %v7211_v0 }
 0x57d   :  { %4591 = vmatprep.subr.bf16.mxu0 %v7212_v8  ;;  %4623 = vmatprep.subr.bf16.mxu1 %v7213_v17 }
 0x580   :  { %4593 = vmatpush1.bf16.msra.mxu0 %v7214_v1  ;;  %4625 = vmatpush1.bf16.msra.mxu1 %v7215_v27 }
 0x581   :  { %4595 = vmatprep.subr.bf16.mxu0 %v7216_v61  ;;  %4627 = vmatprep.subr.bf16.mxu1 %v7217_v44 }
 0x584   :  { %4597 = vmatpush1.bf16.msra.mxu0 %v7218_v56  ;;  %4629 = vmatpush1.bf16.msra.mxu1 %v7219_v5 }
 0x585   :  { %4631 = vmatprep.subr.bf16.mxu0 %v7220_v40  ;;  %4663 = vmatprep.subr.bf16.mxu1 %v7221_v7 }
 0x63a   :  { %v1306_v49 = vpop.f32.mrb[10].mxu0  ;;  %v1377_v16 = vpop.f32.mrb[10].mxu1 }
 0x63b   :  { %v1382_v52 = vadd.f32 %v1306_v49, %v7239_v62  ;;  %v1384_v34 = vadd.f32 %v1377_v16, %v7240_v31  ;;  %v1308_v12 = vpop.f32.mrb[11].mxu0  ;;  %v1379_v14 = vpop.f32.mrb[11].mxu1 }
 0x63c   :  { %v1383_v38 = vadd.f32 %v1308_v12, %v7241_v10  ;;  %v1385_v23 = vadd.f32 %v1379_v14, %v7242_v21  ;;  %v1763_v21 = vsel %vm1758_vm0, %v6406_v25, %v6360_v26 }
 0x63d   :  { %v4064_v63 = vmul.f32 -1.442695, %v1382_v52 }
 0x63e   :  { %v4065_v13 = vmul.f32 -1.442695, %v1383_v38  ;;  %v4066_v45 = vmul.f32 -1.442695, %v1385_v23 }
 0x63f   :  { %5463 = vpow2.f32 %v4064_v63 }
 0x640   :  { %5465 = vpow2.f32 %v4065_v13 }
 0x641   :  { %5467 = vpow2.f32 %v4066_v45 }
 0x642   :  { %5469 = vtanh.f32 %v1384_v34 }
 0x649   :  { %v5464_v40 = vpop.eup %5463 }
 0x64a   :  { %v5466_v58 = vpop.eup %5465  ;;  %v1389_v7 = vadd.f32 1.0, %v5464_v40 }
 0x64b   :  { %v1395_v22 = vadd.f32 1.0, %v5466_v58  ;;  %v5468_v6 = vpop.eup %5467 }
 0x64c   :  { %5471 = vrcp.f32 %v1389_v7  ;;  %v5470_v43 = vpop.eup %5469  ;;  %v1402_v31 = vadd.f32 1.0, %v5468_v6 }
 0x64d   :  { %5473 = vrcp.f32 %v1395_v22 }
 0x64e   :  { %5475 = vrcp.f32 %v1402_v31 }
 0x656   :  { %v5472_v49 = vpop.eup %5471 }
 0x657   :  { %v5474_v16 = vpop.eup %5473  ;;  %v1406_v62 = vmul.f32 %v5472_v49, %v5470_v43 }
 0x658   :  { %v1405_v52 = vmul.f32 %v5474_v16, %v6403_v39  ;;  %v5476_v14 = vpop.eup %5475  ;;  %v7249_v16 = vld [vmem:[#allocation12_spill] sm:$0xff] }
 0x65a   :  { %v6449_v12 = vadd.f32 %v1406_v62, %v1405_v52 }
 0x65c   :  { %5477 = vtanh.f32 %v6449_v12 }
 0x666   :  { %v5478_v10 = vpop.eup %5477 }
 0x667   :  { %v6452_v38 = vmul.f32 %v5478_v10, %v5476_v14  ;;  %v1803_v14 = vld [vmem:[#allocation5 + $0x48] sm:$0xff]  ;;  %v1797_v10 = vld [vmem:[#allocation5 + $0x18] sm:$0xff] }
 0x669   :  { %1479 = vmatmul.mubr.f32.vlgmr.msra.gmra.mrb[12].mxu0 %v6452_v38  ;;  %1550 = vmatmul.mubr.f32.vlgmr.msra.gmra.mrb[12].mxu1 %v6452_v38  ;;  %v1764_v34 = vsel %vm1758_vm0, %v6452_v38, %v6298_v30 }
 0x66a   :  { %4633 = vmatpush1.bf16.msra.mxu0 %v5840_v11  ;;  %4665 = vmatpush1.bf16.msra.mxu1 %v5843_v15  ;;  %v1777_v39 = vrot.slane %v1764_v34, 6  ;;  %v7243_v11 = vld [vmem:[#allocation22_spill] sm:$0xff] }
 0x66b   :  { %4635 = vmatprep.subr.bf16.mxu0 %v5847_v19  ;;  %4667 = vmatprep.subr.bf16.mxu1 %v5849_v20  ;;  %v226_v15 = vmul.f32 %v7243_v11, %v6025_v32  ;;  %v227_v19 = vmul.f32 %v7243_v11, %v6050_v50  ;;  %v7248_v32 = vld [vmem:[#allocation32_spill] sm:$0xff] }
 0x66c   :  { %1652 = vmatprep.mubr.f32.mxu0 %v7210_v36  ;;  %1723 = vmatprep.mubr.f32.mxu1 %v7210_v36  ;;  %v6469_v23 = vsel %vm1785_vm1, %v1763_v21, %v1777_v39  ;;  %v1805_v39 = vld [vmem:[#allocation5 + $0x58] sm:$0xff]  ;;  %v1794_v21 = vld [vmem:[#allocation5] sm:$0xff] }
 0x66d   :  { %v230_v20 = vadd.f32 %v226_v15, %v6044_v47  ;;  %v4726_v15 = vpack.c.bf16 %v1805_v39, %v1797_v10  ;;  %v1860_v10 = vld [vmem:[#allocation5 + $0x210] sm:$0xff]  ;;  %v1875_v39 = vld [vmem:[#allocation5 + $0x288] sm:$0xff] }
 0x66e   :  { %4637 = vmatpush1.bf16.msra.mxu0 %v5852_v24  ;;  %4669 = vmatpush1.bf16.msra.mxu1 %v5856_v28  ;;  %v7244_v24 = vld [vmem:[#allocation21_spill] sm:$0xff]  ;;  %v7245_v28 = vld [vmem:[#allocation28_spill] sm:$0xff] }
 0x66f   :  { %4639 = vmatprep.subr.bf16.mxu0 %v5858_v29  ;;  %4671 = vmatprep.subr.bf16.mxu1 %v5860_v33  ;;  %v272_v29 = vmul.f32 %v7245_v28, %v7244_v24  ;;  %v7246_v33 = vld [vmem:[#allocation33_spill] sm:$0xff]  ;;  %v275_v47 = vmul.f32 %v7248_v32, %v7244_v24 }
 0x670   :  { %v1837_v32 = vld [vmem:[#allocation5 + $0x158] sm:$0xff] }
 0x672   :  { %4641 = vmatpush1.bf16.msra.mxu0 %v5863_v37  ;;  %4673 = vmatpush1.bf16.msra.mxu1 %v5867_v41  ;;  %v231_v37 = vadd.f32 %v227_v19, %v7246_v33  ;;  %v7247_v41 = vld [vmem:[#allocation31_spill] sm:$0xff] }
 0x673   :  { %4643 = vmatprep.subr.bf16.mxu0 %v5869_v42  ;;  %4675 = vmatprep.subr.bf16.mxu1 %v5872_v46  ;;  %v273_v42 = vmul.f32 %v7247_v41, %v7244_v24  ;;  %v229_v46 = vmul.f32 %v7243_v11, %v6059_v57  ;;  %v1819_v33 = vld [vmem:[#allocation5 + $0xc8] sm:$0xff]  ;;  %v1821_v41 = vld [vmem:[#allocation5 + $0xd8] sm:$0xff] }
 0x676   :  { %4645 = vmatpush1.bf16.msra.mxu0 %v5875_v53  ;;  %4677 = vmatpush1.bf16.msra.mxu1 %v5879_v54  ;;  %v1410_v53 = vadd.f32 %v272_v29, %v230_v20  ;;  %v1796_v20 = vld [vmem:[#allocation5 + $0x10] sm:$0xff]  ;;  %v1811_v29 = vld [vmem:[#allocation5 + $0x88] sm:$0xff] }
 0x677   :  { %4647 = vmatprep.subr.bf16.mxu0 %v5881_v55  ;;  %4679 = vmatprep.subr.bf16.mxu1 %v5884_v59  ;;  %v1411_v59 = vadd.f32 %v273_v42, %v231_v37  ;;  %v1813_v37 = vld [vmem:[#allocation5 + $0x98] sm:$0xff]  ;;  %v1810_v42 = vld [vmem:[#allocation5 + $0x80] sm:$0xff] }
 0x67a   :  { %4649 = vmatpush1.bf16.msra.mxu0 %v5887_v2  ;;  %4681 = vmatpush1.bf16.msra.mxu1 %v5891_v3 }
 0x67b   :  { %4651 = vmatprep.subr.bf16.mxu0 %v5893_v4  ;;  %4683 = vmatprep.subr.bf16.mxu1 %v5896_v9 }
 0x67e   :  { %4653 = vmatpush1.bf16.msra.mxu0 %v5899_v18  ;;  %4685 = vmatpush1.bf16.msra.mxu1 %v7211_v0  ;;  %v233_v18 = vadd.f32 %v229_v46, %v6062_v60  ;;  %v228_v0 = vmul.f32 %v7243_v11, %v6047_v48  ;;  %v1802_v11 = vld [vmem:[#allocation5 + $0x40] sm:$0xff] }
 0x67f   :  { %4655 = vmatprep.subr.bf16.mxu0 %v7212_v8  ;;  %4687 = vmatprep.subr.bf16.mxu1 %v7213_v17  ;;  %v4696_v19 = vpack.c.bf16 %v1802_v11, %v1794_v21  ;;  %v1818_v46 = vld [vmem:[#allocation5 + $0xc0] sm:$0xff]  ;;  %v1883_v11 = vld [vmem:[#allocation5 + $0x2c8] sm:$0xff] }
 0x680   :  { %v1413_v57 = vadd.f32 %v275_v47, %v233_v18  ;;  %v232_v17 = vadd.f32 %v228_v0, %v6053_v51  ;;  %v1826_v47 = vld [vmem:[#allocation5 + $0x100] sm:$0xff] }
 0x682   :  { %4657 = vmatpush1.bf16.msra.mxu0 %v7214_v1  ;;  %4689 = vmatpush1.bf16.msra.mxu1 %v7215_v27  ;;  %v274_v1 = vmul.f32 %v6031_v35, %v7244_v24  ;;  %v1804_v24 = vld [vmem:[#allocation5 + $0x50] sm:$0xff] }
 0x683   :  { %4659 = vmatprep.subr.bf16.mxu0 %v7216_v61  ;;  %4691 = vmatprep.subr.bf16.mxu1 %v7217_v44  ;;  %v4728_v28 = vpack.c.bf16 %v1804_v24, %v1796_v20  ;;  %v4714_v20 = vpack.c.bf16 %v1883_v11, %v1875_v39 }
 0x684   :  { %v1412_v61 = vadd.f32 %v274_v1, %v232_v17  ;;  %v1836_v17 = vld [vmem:[#allocation5 + $0x150] sm:$0xff] }
 0x686   :  { %4661 = vmatpush1.bf16.msra.mxu0 %v7218_v56  ;;  %4693 = vmatpush1.bf16.msra.mxu1 %v7219_v5 }
 0x687   :  { %4727 = vmatprep.subr.bf16.mxu1 %v4726_v15  ;;  %v1877_v15 = vld [vmem:[#allocation5 + $0x298] sm:$0xff] }
 0x73c   :  { %v1480_v54 = vpop.f32.mrb[12].mxu0  ;;  %v1551_v55 = vpop.f32.mrb[12].mxu1 }
 0x73d   :  { %v1556_v2 = vadd.f32 %v1480_v54, %v1410_v53  ;;  %v1482_v3 = vpop.f32.mrb[13].mxu0  ;;  %v1553_v4 = vpop.f32.mrb[13].mxu1  ;;  %v1558_v60 = vadd.f32 %v1551_v55, %v1412_v61  ;;  %v4730_v53 = vpack.c.bf16 %v1821_v41, %v1813_v37  ;;  %v4700_v54 = vpack.c.bf16 %v1818_v46, %v1810_v42  ;;  %v1812_v55 = vld [vmem:[#allocation5 + $0x90] sm:$0xff]  ;;  %v1851_v61 = vld [vmem:[#allocation5 + $0x1c8] sm:$0xff] }
 0x73e   :  { %v1557_v9 = vadd.f32 %v1482_v3, %v1411_v59  ;;  %v1559_v27 = vadd.f32 %v1553_v4, %v1413_v57  ;;  %v1820_v59 = vld [vmem:[#allocation5 + $0xd0] sm:$0xff]  ;;  %v1827_v3 = vld [vmem:[#allocation5 + $0x108] sm:$0xff] }
 0x73f   :  { %v4067_v50 = vmul.f32 -1.442695, %v1556_v2  ;;  %v4732_v2 = vpack.c.bf16 %v1820_v59, %v1812_v55  ;;  %v1835_v4 = vld [vmem:[#allocation5 + $0x148] sm:$0xff]  ;;  %v1828_v57 = vld [vmem:[#allocation5 + $0x110] sm:$0xff]  ;;  %v1901_v55 = vld [vmem:[#allocation5 + $0x358] sm:$0xff] }
 0x740   :  { %v4068_v8 = vmul.f32 -1.442695, %v1557_v9  ;;  %v4069_v44 = vmul.f32 -1.442695, %v1559_v27  ;;  %v1829_v9 = vld [vmem:[#allocation5 + $0x118] sm:$0xff]  ;;  %v4702_v18 = vpack.c.bf16 %v1835_v4, %v1827_v3  ;;  %v4736_v1 = vpack.c.bf16 %v1836_v17, %v1828_v57  ;;  %v1843_v27 = vld [vmem:[#allocation5 + $0x188] sm:$0xff] }
 0x741   :  { %5479 = vpow2.f32 %v4067_v50  ;;  %v1834_v50 = vld [vmem:[#allocation5 + $0x140] sm:$0xff]  ;;  %v4734_v0 = vpack.c.bf16 %v1837_v32, %v1829_v9  ;;  %v1891_v41 = vld [vmem:[#allocation5 + $0x308] sm:$0xff]  ;;  %v1892_v4 = vld [vmem:[#allocation5 + $0x310] sm:$0xff] }
 0x742   :  { %5481 = vpow2.f32 %v4068_v8  ;;  %v4704_v8 = vpack.c.bf16 %v1834_v50, %v1826_v47  ;;  %v1899_v42 = vld [vmem:[#allocation5 + $0x348] sm:$0xff]  ;;  %v1890_v59 = vld [vmem:[#allocation5 + $0x300] sm:$0xff]  ;;  %v1900_v9 = vld [vmem:[#allocation5 + $0x350] sm:$0xff] }
 0x743   :  { %5483 = vpow2.f32 %v4069_v44  ;;  %v1845_v44 = vld [vmem:[#allocation5 + $0x198] sm:$0xff]  ;;  %v1898_v3 = vld [vmem:[#allocation5 + $0x340] sm:$0xff]  ;;  %v1907_v32 = vld [vmem:[#allocation5 + $0x388] sm:$0xff] }
 0x744   :  { %5485 = vtanh.f32 %v1558_v60  ;;  %v4706_v60 = vpack.c.bf16 %v1851_v61, %v1843_v27  ;;  %v1915_v47 = vld [vmem:[#allocation5 + $0x3c8] sm:$0xff]  ;;  %v1909_v50 = vld [vmem:[#allocation5 + $0x398] sm:$0xff]  ;;  %v1906_v17 = vld [vmem:[#allocation5 + $0x380] sm:$0xff] }
 0x745   :  { %v1917_v57 = vld [vmem:[#allocation5 + $0x3d8] sm:$0xff]  ;;  %v1908_v61 = vld [vmem:[#allocation5 + $0x390] sm:$0xff] }
 0x746   :  { %v4754_v27 = vpack.c.bf16 %v1917_v57, %v1909_v50  ;;  %v1815_v50 = vld [vmem:[#allocation5 + $0xa8] sm:$0xff] }
 0x74b   :  { %v5480_v56 = vpop.eup %5479 }
 0x74c   :  { %v5482_v5 = vpop.eup %5481  ;;  %v1563_v63 = vadd.f32 1.0, %v5480_v56  ;;  %v1853_v56 = vld [vmem:[#allocation5 + $0x1d8] sm:$0xff] }
 0x74d   :  { %v1569_v13 = vadd.f32 1.0, %v5482_v5  ;;  %v5484_v48 = vpop.eup %5483  ;;  %v1842_v5 = vld [vmem:[#allocation5 + $0x180] sm:$0xff] }
 0x74e   :  { %5487 = vrcp.f32 %v1563_v63  ;;  %v5486_v45 = vpop.eup %5485  ;;  %v1576_v7 = vadd.f32 1.0, %v5484_v48  ;;  %v1850_v63 = vld [vmem:[#allocation5 + $0x1c0] sm:$0xff] }
 0x74f   :  { %5489 = vrcp.f32 %v1569_v13  ;;  %v4738_v13 = vpack.c.bf16 %v1853_v56, %v1845_v44  ;;  %v4708_v48 = vpack.c.bf16 %v1850_v63, %v1842_v5  ;;  %v1916_v44 = vld [vmem:[#allocation5 + $0x3d0] sm:$0xff]  ;;  %v1807_v56 = vld [vmem:[#allocation5 + $0x68] sm:$0xff]  ;;  %v1801_v5 = vld [vmem:[#allocation5 + $0x38] sm:$0xff] }
 0x750   :  { %5491 = vrcp.f32 %v1576_v7  ;;  %v1867_v7 = vld [vmem:[#allocation5 + $0x248] sm:$0xff]  ;;  %v1809_v63 = vld [vmem:[#allocation5 + $0x78] sm:$0xff] }
 0x758   :  { %v5488_v40 = vpop.eup %5487 }
 0x759   :  { %v5490_v58 = vpop.eup %5489  ;;  %v1580_v51 = vmul.f32 %v5488_v40, %v5486_v45  ;;  %v1844_v45 = vld [vmem:[#allocation5 + $0x190] sm:$0xff] }
 0x75a   :  { %v1579_v35 = vmul.f32 %v5490_v58, %v6449_v12  ;;  %v5492_v6 = vpop.eup %5491  ;;  %v1795_v12 = vld [vmem:[#allocation5 + $0x8] sm:$0xff]  ;;  %v1852_v40 = vld [vmem:[#allocation5 + $0x1d0] sm:$0xff] }
 0x75b   :  { %v4694_v34 = vpack.c.bf16 %v1803_v14, %v1795_v12  ;;  %v4740_v58 = vpack.c.bf16 %v1852_v40, %v1844_v45  ;;  %v4790_v40 = vpack.c.bf16 %v1809_v63, %v1801_v5  ;;  %v1831_v5 = vld [vmem:[#allocation5 + $0x128] sm:$0xff] }
 0x75c   :  { %v6518_v22 = vadd.f32 %v1580_v51, %v1579_v35  ;;  %v1859_v51 = vld [vmem:[#allocation5 + $0x208] sm:$0xff]  ;;  %v1861_v35 = vld [vmem:[#allocation5 + $0x218] sm:$0xff] }
 0x75d   :  { %4695 = vmatprep.subr.bf16.mxu0 %v4694_v34  ;;  %v1868_v34 = vld [vmem:[#allocation5 + $0x250] sm:$0xff] }
 0x75e   :  { %5493 = vtanh.f32 %v6518_v22  ;;  %v4744_v21 = vpack.c.bf16 %v1868_v34, %v1860_v10  ;;  %v7253_v10 = vld [vmem:[#allocation45_spill] sm:$0xff] }
 0x768   :  { %v5494_v43 = vpop.eup %5493 }
 0x769   :  { %v6521_v49 = vmul.f32 %v5494_v43, %v5492_v6  ;;  %v4710_v6 = vpack.c.bf16 %v1867_v7, %v1859_v51  ;;  %v1869_v43 = vld [vmem:[#allocation5 + $0x258] sm:$0xff]  ;;  %v7250_v7 = vld [vmem:[#allocation42_spill] sm:$0xff] }
 0x76a   :  { %v4742_v12 = vpack.c.bf16 %v1869_v43, %v1861_v35 }
 0x76b   :  { %1653 = vmatmul.mubr.f32.vlgmr.msra.gmra.mrb[14].mxu0 %v6521_v49  ;;  %1724 = vmatmul.mubr.f32.vlgmr.msra.gmra.mrb[14].mxu1 %v6521_v49  ;;  %v1765_v62 = vsel %vm1758_vm0, %v6521_v49, %v7249_v16 }
 0x76c   :  { %1986 = vmatprep.mubr.f32.mxu0 %v7210_v36  ;;  %2063 = vmatprep.mubr.f32.mxu1 %v7210_v36  ;;  %v1780_v31 = vrot.slane %v1765_v62, 4  ;;  %v1858_v62 = vld [vmem:[#allocation5 + $0x200] sm:$0xff] }
 0x76d   :  { %4697 = vmatpush1.bf16.msra.mxu0 %v4696_v19  ;;  %4729 = vmatpush1.bf16.msra.mxu1 %v4728_v28  ;;  %v1885_v19 = vld [vmem:[#allocation5 + $0x2d8] sm:$0xff]  ;;  %v1874_v28 = vld [vmem:[#allocation5 + $0x280] sm:$0xff] }
 0x76e   :  { %v6532_v52 = vsel %vm1787_vm2, %v6469_v23, %v1780_v31  ;;  %v4698_v23 = vpack.c.bf16 %v1819_v33, %v1811_v29  ;;  %4731 = vmatprep.subr.bf16.mxu1 %v4730_v53  ;;  %v1866_v31 = vld [vmem:[#allocation5 + $0x240] sm:$0xff]  ;;  %v4746_v24 = vpack.c.bf16 %v1885_v19, %v1877_v15  ;;  %v1876_v33 = vld [vmem:[#allocation5 + $0x290] sm:$0xff]  ;;  %v4718_v53 = vpack.c.bf16 %v1899_v42, %v1891_v41 }
 0x76f   :  { %v4712_v14 = vpack.c.bf16 %v1866_v31, %v1858_v62  ;;  %v1882_v29 = vld [vmem:[#allocation5 + $0x2c0] sm:$0xff] }
 0x770   :  { %4699 = vmatprep.subr.bf16.mxu0 %v4698_v23  ;;  %v4716_v37 = vpack.c.bf16 %v1882_v29, %v1874_v28  ;;  %v1884_v23 = vld [vmem:[#allocation5 + $0x2d0] sm:$0xff] }
 0x771   :  { %4701 = vmatpush1.bf16.msra.mxu0 %v4700_v54  ;;  %4733 = vmatpush1.bf16.msra.mxu1 %v4732_v2  ;;  %v4748_v46 = vpack.c.bf16 %v1884_v23, %v1876_v33  ;;  %v1893_v54 = vld [vmem:[#allocation5 + $0x318] sm:$0xff] }
 0x772   :  { %4703 = vmatprep.subr.bf16.mxu0 %v4702_v18  ;;  %4735 = vmatprep.subr.bf16.mxu1 %v4734_v0  ;;  %v4750_v2 = vpack.c.bf16 %v1901_v55, %v1893_v54  ;;  %v4720_v18 = vpack.c.bf16 %v1898_v3, %v1890_v59  ;;  %v4752_v0 = vpack.c.bf16 %v1900_v9, %v1892_v4  ;;  %v1798_v3 = vld [vmem:[#allocation5 + $0x20] sm:$0xff]  ;;  %v1800_v9 = vld [vmem:[#allocation5 + $0x30] sm:$0xff] }
 0x773   :  { %v1760_v54 = vsel %vm1758_vm0, %v7249_v16, %v6521_v49  ;;  %v1762_v55 = vsel %vm1758_vm0, %v6360_v26, %v6406_v25  ;;  %v1817_v26 = vld [vmem:[#allocation5 + $0xb8] sm:$0xff] }
 0x774   :  { %v1825_v25 = vld [vmem:[#allocation5 + $0xf8] sm:$0xff] }
 0x775   :  { %4705 = vmatpush1.bf16.msra.mxu0 %v4704_v8  ;;  %4737 = vmatpush1.bf16.msra.mxu1 %v4736_v1  ;;  %v4722_v8 = vpack.c.bf16 %v1915_v47, %v1907_v32  ;;  %v1914_v1 = vld [vmem:[#allocation5 + $0x3c0] sm:$0xff]  ;;  %v1768_v32 = vrot.slane %v1760_v54, 6  ;;  %v1774_v47 = vrot.slane %v1762_v55, 2 }
 0x776   :  { %4707 = vmatprep.subr.bf16.mxu0 %v4706_v60  ;;  %4739 = vmatprep.subr.bf16.mxu1 %v4738_v13  ;;  %v1799_v60 = vld [vmem:[#allocation5 + $0x28] sm:$0xff]  ;;  %v4724_v13 = vpack.c.bf16 %v1914_v1, %v1906_v17  ;;  %v1870_v54 = vld [vmem:[#allocation5 + $0x260] sm:$0xff] }
 0x777   :  { %v4758_v45 = vpack.c.bf16 %v1807_v56, %v1799_v60  ;;  %v1816_v60 = vld [vmem:[#allocation5 + $0xb0] sm:$0xff] }
 0x778   :  { %v1824_v56 = vld [vmem:[#allocation5 + $0xf0] sm:$0xff] }
 0x779   :  { %4709 = vmatpush1.bf16.msra.mxu0 %v4708_v48  ;;  %4741 = vmatpush1.bf16.msra.mxu1 %v4740_v58  ;;  %v4756_v48 = vpack.c.bf16 %v1916_v44, %v1908_v61  ;;  %v1822_v61 = vld [vmem:[#allocation5 + $0xe0] sm:$0xff] }
 0x77a   :  { %4711 = vmatprep.subr.bf16.mxu0 %v4710_v6  ;;  %4743 = vmatprep.subr.bf16.mxu1 %v4742_v12  ;;  %v7251_v6 = vld [vmem:[#allocation43_spill] sm:$0xff]  ;;  %v7252_v12 = vld [vmem:[#allocation44_spill] sm:$0xff] }
 0x77d   :  { %4713 = vmatpush1.bf16.msra.mxu0 %v4712_v14  ;;  %4745 = vmatpush1.bf16.msra.mxu1 %v4744_v21 }
 0x77e   :  { %4715 = vmatprep.subr.bf16.mxu0 %v4714_v20  ;;  %4747 = vmatprep.subr.bf16.mxu1 %v4746_v24 }
 0x781   :  { %4717 = vmatpush1.bf16.msra.mxu0 %v4716_v37  ;;  %4749 = vmatpush1.bf16.msra.mxu1 %v4748_v46 }
 0x782   :  { %4719 = vmatprep.subr.bf16.mxu0 %v4718_v53  ;;  %4751 = vmatprep.subr.bf16.mxu1 %v4750_v2  ;;  %v1761_v2 = vsel %vm1758_vm0, %v6298_v30, %v6452_v38 }
 0x783   :  { %v1771_v16 = vrot.slane %v1761_v2, 4  ;;  %v1864_v2 = vld [vmem:[#allocation5 + $0x230] sm:$0xff] }
 0x785   :  { %4721 = vmatpush1.bf16.msra.mxu0 %v4720_v18  ;;  %4753 = vmatpush1.bf16.msra.mxu1 %v4752_v0  ;;  %v1808_v18 = vld [vmem:[#allocation5 + $0x70] sm:$0xff]  ;;  %v7254_v0 = vld [vmem:[#allocation46_spill] sm:$0xff] }
 0x786   :  { %4723 = vmatprep.subr.bf16.mxu0 %v4722_v8  ;;  %4755 = vmatprep.subr.bf16.mxu1 %v4754_v27  ;;  %v1823_v8 = vld [vmem:[#allocation5 + $0xe8] sm:$0xff]  ;;  %v4792_v17 = vpack.c.bf16 %v1808_v18, %v1800_v9  ;;  %v1814_v27 = vld [vmem:[#allocation5 + $0xa0] sm:$0xff]  ;;  %v1881_v9 = vld [vmem:[#allocation5 + $0x2b8] sm:$0xff] }
 0x787   :  { %v1889_v18 = vld [vmem:[#allocation5 + $0x2f8] sm:$0xff] }
 0x789   :  { %4725 = vmatpush1.bf16.msra.mxu0 %v4724_v13  ;;  %4757 = vmatpush1.bf16.msra.mxu1 %v4756_v48  ;;  %v4762_v13 = vpack.c.bf16 %v1823_v8, %v1815_v50  ;;  %v4794_v48 = vpack.c.bf16 %v1825_v25, %v1817_v26  ;;  %v1878_v50 = vld [vmem:[#allocation5 + $0x2a0] sm:$0xff]  ;;  %v1880_v8 = vld [vmem:[#allocation5 + $0x2b0] sm:$0xff]  ;;  %v1895_v25 = vld [vmem:[#allocation5 + $0x328] sm:$0xff] }
 0x78a   :  { %4759 = vmatprep.subr.bf16.mxu0 %v4758_v45  ;;  %4791 = vmatprep.subr.bf16.mxu1 %v4790_v40  ;;  %v1839_v40 = vld [vmem:[#allocation5 + $0x168] sm:$0xff]  ;;  %v1888_v26 = vld [vmem:[#allocation5 + $0x2f0] sm:$0xff] }
 0x83e   :  { %v1654_v58 = vpop.f32.mrb[14].mxu0  ;;  %v1725_v51 = vpop.f32.mrb[14].mxu1 }
 0x83f   :  { %v1730_v35 = vadd.f32 %v1654_v58, %v7250_v7  ;;  %v1732_v43 = vadd.f32 %v1725_v51, %v7251_v6  ;;  %v1656_v62 = vpop.f32.mrb[15].mxu0  ;;  %v1727_v31 = vpop.f32.mrb[15].mxu1  ;;  %v1833_v58 = vld [vmem:[#allocation5 + $0x138] sm:$0xff]  ;;  %v4764_v7 = vpack.c.bf16 %v1822_v61, %v1814_v27  ;;  %v1830_v6 = vld [vmem:[#allocation5 + $0x120] sm:$0xff] }
 0x840   :  { %v1731_v14 = vadd.f32 %v1656_v62, %v7252_v12  ;;  %v1733_v34 = vadd.f32 %v1727_v31, %v7253_v10  ;;  %v1841_v51 = vld [vmem:[#allocation5 + $0x178] sm:$0xff]  ;;  %v4766_v62 = vpack.c.bf16 %v1839_v40, %v1831_v5  ;;  %v1832_v31 = vld [vmem:[#allocation5 + $0x130] sm:$0xff]  ;;  %v1855_v10 = vld [vmem:[#allocation5 + $0x1e8] sm:$0xff] }
 0x841   :  { %v4070_v39 = vmul.f32 -1.442695, %v1730_v35  ;;  %v4796_v35 = vpack.c.bf16 %v1824_v56, %v1816_v60  ;;  %v1840_v12 = vld [vmem:[#allocation5 + $0x170] sm:$0xff]  ;;  %v1894_v27 = vld [vmem:[#allocation5 + $0x320] sm:$0xff]  ;;  %v1913_v40 = vld [vmem:[#allocation5 + $0x3b8] sm:$0xff] }
 0x842   :  { %v4071_v21 = vmul.f32 -1.442695, %v1731_v14  ;;  %v4072_v11 = vmul.f32 -1.442695, %v1733_v34  ;;  %v1847_v14 = vld [vmem:[#allocation5 + $0x1a8] sm:$0xff]  ;;  %v1849_v34 = vld [vmem:[#allocation5 + $0x1b8] sm:$0xff] }
 0x843   :  { %5495 = vpow2.f32 %v4070_v39  ;;  %v1857_v39 = vld [vmem:[#allocation5 + $0x1f8] sm:$0xff]  ;;  %v1902_v61 = vld [vmem:[#allocation5 + $0x360] sm:$0xff]  ;;  %v1896_v56 = vld [vmem:[#allocation5 + $0x330] sm:$0xff] }
 0x844   :  { %5497 = vpow2.f32 %v4071_v21  ;;  %v1904_v5 = vld [vmem:[#allocation5 + $0x370] sm:$0xff] }
 0x845   :  { %5499 = vpow2.f32 %v4072_v11  ;;  %v4800_v11 = vpack.c.bf16 %v1840_v12, %v1832_v31  ;;  %v1920_v31 = vld [vmem:[#allocation5 + $0x3f0] sm:$0xff]  ;;  %v2281_v12 = vld [vmem:[#allocation7 + $0x8] sm:$0xff] }
 0x846   :  { %5501 = vtanh.f32 %v1732_v43  ;;  %v1838_v43 = vld [vmem:[#allocation5 + $0x160] sm:$0xff] }
 0x847   :  { %v4768_v21 = vpack.c.bf16 %v1838_v43, %v1830_v6  ;;  %v1918_v6 = vld [vmem:[#allocation5 + $0x3e0] sm:$0xff] }
 0x84d   :  { %v5496_v15 = vpop.eup %5495 }
 0x84e   :  { %v5498_v19 = vpop.eup %5497  ;;  %v1737_v20 = vadd.f32 1.0, %v5496_v15  ;;  %v1846_v15 = vld [vmem:[#allocation5 + $0x1a0] sm:$0xff] }
 0x84f   :  { %v1743_v24 = vadd.f32 1.0, %v5498_v19  ;;  %v5500_v28 = vpop.eup %5499  ;;  %v1854_v19 = vld [vmem:[#allocation5 + $0x1e0] sm:$0xff] }
 0x850   :  { %5503 = vrcp.f32 %v1737_v20  ;;  %v5502_v29 = vpop.eup %5501  ;;  %v1750_v41 = vadd.f32 1.0, %v5500_v28  ;;  %v4770_v20 = vpack.c.bf16 %v1855_v10, %v1847_v14  ;;  %v1848_v28 = vld [vmem:[#allocation5 + $0x1b0] sm:$0xff]  ;;  %v2285_v14 = vld [vmem:[#allocation7 + $0x28] sm:$0xff]  ;;  %v2283_v10 = vld [vmem:[#allocation7 + $0x18] sm:$0xff] }
 0x851   :  { %5505 = vrcp.f32 %v1743_v24  ;;  %v4802_v24 = vpack.c.bf16 %v1857_v39, %v1849_v34  ;;  %v2287_v34 = vld [vmem:[#allocation7 + $0x38] sm:$0xff] }
 0x852   :  { %5507 = vrcp.f32 %v1750_v41  ;;  %v1873_v41 = vld [vmem:[#allocation5 + $0x278] sm:$0xff] }
 0x85a   :  { %v5504_v33 = vpop.eup %5503 }
 0x85b   :  { %v5506_v37 = vpop.eup %5505  ;;  %v1754_v23 = vmul.f32 %v5504_v33, %v5502_v29  ;;  %v1856_v29 = vld [vmem:[#allocation5 + $0x1f0] sm:$0xff]  ;;  %v1863_v33 = vld [vmem:[#allocation5 + $0x228] sm:$0xff] }
 0x85c   :  { %v1753_v42 = vmul.f32 %v5506_v37, %v6518_v22  ;;  %v5508_v53 = vpop.eup %5507  ;;  %v1806_v22 = vld [vmem:[#allocation5 + $0x60] sm:$0xff]  ;;  %v1871_v37 = vld [vmem:[#allocation5 + $0x268] sm:$0xff] }
 0x85d   :  { %v4760_v38 = vpack.c.bf16 %v1806_v22, %v1798_v3  ;;  %v4774_v55 = vpack.c.bf16 %v1871_v37, %v1863_v33  ;;  %v1872_v3 = vld [vmem:[#allocation5 + $0x270] sm:$0xff]  ;;  %v1887_v22 = vld [vmem:[#allocation5 + $0x2e8] sm:$0xff]  ;;  %v2291_v37 = vld [vmem:[#allocation7 + $0x58] sm:$0xff] }
 0x85e   :  { %v1755_v46 = vadd.f32 %v1754_v23, %v1753_v42  ;;  %v1865_v23 = vld [vmem:[#allocation5 + $0x238] sm:$0xff]  ;;  %v4772_v42 = vpack.c.bf16 %v1854_v19, %v1846_v15  ;;  %v6569_v15 = vpack.c.bf16 %v2285_v14, %v2281_v12  ;;  %v6571_v19 = vpack.c.bf16 %v2287_v34, %v2283_v10  ;;  %v2293_v33 = vld [vmem:[#allocation7 + $0x68] sm:$0xff]  ;;  %v2320_v34 = vld [vmem:[#allocation7 + $0x140] sm:$0xff] }
 0x85f   :  { %v2327_v12 = vld [vmem:[#allocation7 + $0x178] sm:$0xff] }
 0x860   :  { %5509 = vtanh.f32 %v1755_v46  ;;  %v4804_v46 = vpack.c.bf16 %v1856_v29, %v1848_v28  ;;  %v2286_v28 = vld [vmem:[#allocation7 + $0x30] sm:$0xff]  ;;  %v2289_v29 = vld [vmem:[#allocation7 + $0x48] sm:$0xff] }
 0x86a   :  { %v5510_v59 = vpop.eup %5509 }
 0x86b   :  { %v1757_v4 = vmul.f32 %v5510_v59, %v5508_v53  ;;  %v1862_v53 = vld [vmem:[#allocation5 + $0x220] sm:$0xff]  ;;  %v4806_v59 = vpack.c.bf16 %v1873_v41, %v1865_v23  ;;  %v2295_v23 = vld [vmem:[#allocation7 + $0x78] sm:$0xff] }
 0x86d   :  { %v1759_v49 = vsel %vm1758_vm0, %v7254_v0, %v1757_v4  ;;  %v1766_v57 = vsel %vm1758_vm0, %v1757_v4, %v7254_v0  ;;  %v1879_v4 = vld [vmem:[#allocation5 + $0x2a8] sm:$0xff]  ;;  %v1886_v0 = vld [vmem:[#allocation5 + $0x2e0] sm:$0xff] }
 0x86e   :  { %v1786_v30 = vsel %vm1785_vm1, %v1759_v49, %v1768_v32  ;;  %v1783_v1 = vrot.slane %v1766_v57, 2  ;;  %v4776_v32 = vpack.c.bf16 %v1870_v54, %v1862_v53  ;;  %v4778_v49 = vpack.c.bf16 %v1887_v22, %v1879_v4  ;;  %v1903_v57 = vld [vmem:[#allocation5 + $0x368] sm:$0xff]  ;;  %v2292_v53 = vld [vmem:[#allocation7 + $0x60] sm:$0xff]  ;;  %v2290_v54 = vld [vmem:[#allocation7 + $0x50] sm:$0xff] }
 0x86f   :  { %v1788_v44 = vsel %vm1787_vm2, %v1786_v30, %v1771_v16  ;;  %v4810_v16 = vpack.c.bf16 %v1889_v18, %v1881_v9  ;;  %v1897_v30 = vld [vmem:[#allocation5 + $0x338] sm:$0xff]  ;;  %v2301_v4 = vld [vmem:[#allocation7 + $0xa8] sm:$0xff] }
 0x870   :  { %v6555_v63 = vsel %vm1789_vm3, %v1788_v44, %v1774_v47  ;;  %v6559_v45 = vsel %vm1789_vm3, %v6532_v52, %v1783_v1  ;;  %v4798_v52 = vpack.c.bf16 %v1841_v51, %v1833_v58  ;;  %v4808_v47 = vpack.c.bf16 %v1872_v3, %v1864_v2  ;;  %v1921_v58 = vld [vmem:[#allocation5 + $0x3f8] sm:$0xff] }
 0x871   :  { %1987 = vmatmul.mubr.f32.vlgmr.msra.gmra.mrb[16].mxu0 %v6555_v63  ;;  %2064 = vmatmul.mubr.f32.vlgmr.msra.gmra.mrb[16].mxu1 %v6555_v63  ;;  %v4812_v1 = vpack.c.bf16 %v1888_v26, %v1880_v8  ;;  %v4782_v44 = vpack.c.bf16 %v1903_v57, %v1895_v25  ;;  %v4784_v51 = vpack.c.bf16 %v1902_v61, %v1894_v27  ;;  %v2299_v22 = vld [vmem:[#allocation7 + $0x98] sm:$0xff]  ;;  %v2305_v8 = vld [vmem:[#allocation7 + $0xc8] sm:$0xff] }
 0x872   :  { %4761 = vmatpush1.bf16.msra.mxu0 %v4760_v38  ;;  %4793 = vmatpush1.bf16.msra.mxu1 %v4792_v17  ;;  %v1905_v38 = vld [vmem:[#allocation5 + $0x378] sm:$0xff]  ;;  %v4780_v17 = vpack.c.bf16 %v1886_v0, %v1878_v50  ;;  %v6579_v2 = vpack.c.bf16 %v2293_v33, %v2289_v29  ;;  %v6581_v3 = vpack.c.bf16 %v2295_v23, %v2291_v37  ;;  %v2300_v50 = vld [vmem:[#allocation7 + $0xa0] sm:$0xff]  ;;  %v2309_v26 = vld [vmem:[#allocation7 + $0xe8] sm:$0xff] }
 0x873   :  { %1992 = vmatprep.mubr.f32.mxu0 %v7210_v36  ;;  %2069 = vmatprep.mubr.f32.mxu1 %v7210_v36  ;;  %v4814_v60 = vpack.c.bf16 %v1905_v38, %v1897_v30  ;;  %v2303_v9 = vld [vmem:[#allocation7 + $0xb8] sm:$0xff]  ;;  %v6609_v27 = vpack.c.bf16 %v2309_v26, %v2305_v8  ;;  %v2333_v29 = vld [vmem:[#allocation7 + $0x1a8] sm:$0xff]  ;;  %v2336_v26 = vld [vmem:[#allocation7 + $0x1c0] sm:$0xff] }
 0x874   :  { %4763 = vmatprep.subr.bf16.mxu0 %v4762_v13  ;;  %4795 = vmatprep.subr.bf16.mxu1 %v4794_v48  ;;  %v1911_v13 = vld [vmem:[#allocation5 + $0x3a8] sm:$0xff]  ;;  %v2307_v25 = vld [vmem:[#allocation7 + $0xd8] sm:$0xff] }
 0x875   :  { %1993 = vmatmul.mubr.f32.gmra.mrb[18].mxu0 %v6559_v45  ;;  %2070 = vmatmul.mubr.f32.gmra.mrb[18].mxu1 %v6559_v45  ;;  %v1919_v48 = vld [vmem:[#allocation5 + $0x3e8] sm:$0xff]  ;;  %v2311_v57 = vld [vmem:[#allocation7 + $0xf8] sm:$0xff] }
 0x876   :  { %4765 = vmatpush1.bf16.msra.mxu0 %v4764_v7  ;;  %4797 = vmatpush1.bf16.msra.mxu1 %v4796_v35  ;;  %v4816_v7 = vpack.c.bf16 %v1904_v5, %v1896_v56  ;;  %v1910_v35 = vld [vmem:[#allocation5 + $0x3a0] sm:$0xff]  ;;  %v4786_v43 = vpack.c.bf16 %v1919_v48, %v1911_v13  ;;  %v6611_v61 = vpack.c.bf16 %v2311_v57, %v2307_v25  ;;  %v2317_v56 = vld [vmem:[#allocation7 + $0x128] sm:$0xff]  ;;  %v2315_v5 = vld [vmem:[#allocation7 + $0x118] sm:$0xff] }
 0x877   :  { %4767 = vmatprep.subr.bf16.mxu0 %v4766_v62  ;;  %4799 = vmatprep.subr.bf16.mxu1 %v4798_v52  ;;  %v4818_v62 = vpack.c.bf16 %v1921_v58, %v1913_v40  ;;  %v1912_v52 = vld [vmem:[#allocation5 + $0x3b0] sm:$0xff]  ;;  %v4788_v39 = vpack.c.bf16 %v1918_v6, %v1910_v35  ;;  %v2319_v13 = vld [vmem:[#allocation7 + $0x138] sm:$0xff]  ;;  %v2312_v58 = vld [vmem:[#allocation7 + $0x100] sm:$0xff] }
 0x878   :  { %2140 = vmatprep.mubr.f32.mxu0 %v7210_v36  ;;  %2217 = vmatprep.mubr.f32.mxu1 %v7210_v36  ;;  %v6625_v35 = vpack.c.bf16 %v2319_v13, %v2315_v5  ;;  %v2314_v6 = vld [vmem:[#allocation7 + $0x110] sm:$0xff]  ;;  %v2331_v33 = vld [vmem:[#allocation7 + $0x198] sm:$0xff] }
 0x879   :  { %v2335_v37 = vld [vmem:[#allocation7 + $0x1b8] sm:$0xff] }
 0x87a   :  { %4769 = vmatpush1.bf16.msra.mxu0 %v4768_v21  ;;  %4801 = vmatpush1.bf16.msra.mxu1 %v4800_v11  ;;  %v4820_v21 = vpack.c.bf16 %v1920_v31, %v1912_v52  ;;  %v2280_v11 = vld [vmem:[#allocation7] sm:$0xff]  ;;  %v2325_v52 = vld [vmem:[#allocation7 + $0x168] sm:$0xff]  ;;  %v2323_v31 = vld [vmem:[#allocation7 + $0x158] sm:$0xff] }
 0x87b   :  { %4771 = vmatprep.subr.bf16.mxu0 %v4770_v20  ;;  %4803 = vmatprep.subr.bf16.mxu1 %v4802_v24  ;;  %v2284_v20 = vld [vmem:[#allocation7 + $0x20] sm:$0xff]  ;;  %v2282_v24 = vld [vmem:[#allocation7 + $0x10] sm:$0xff] }
 0x87c   :  { %v6573_v41 = vpack.c.bf16 %v2284_v20, %v2280_v11  ;;  %v6637_v11 = vpack.c.bf16 %v2327_v12, %v2323_v31  ;;  %v2322_v20 = vld [vmem:[#allocation7 + $0x150] sm:$0xff]  ;;  %v2230_v13 = vld [vmem:[%s7109_s6] sm:$0xf] }
 0x87d   :  { %v7257_v12 = vld [vmem:[#allocation26_spill] sm:$0xff] }
 0x87e   :  { %4773 = vmatpush1.bf16.msra.mxu0 %v4772_v42  ;;  %4805 = vmatpush1.bf16.msra.mxu1 %v4804_v46  ;;  %v6575_v42 = vpack.c.bf16 %v2286_v28, %v2282_v24  ;;  %v2288_v46 = vld [vmem:[#allocation7 + $0x40] sm:$0xff]  ;;  %v2326_v24 = vld [vmem:[#allocation7 + $0x170] sm:$0xff]  ;;  %v2329_v28 = vld [vmem:[#allocation7 + $0x188] sm:$0xff] }
 0x87f   :  { %4775 = vmatprep.subr.bf16.mxu0 %v4774_v55  ;;  %4807 = vmatprep.subr.bf16.mxu1 %v4806_v59  ;;  %v2294_v55 = vld [vmem:[#allocation7 + $0x70] sm:$0xff]  ;;  %v2297_v59 = vld [vmem:[#allocation7 + $0x88] sm:$0xff]  ;;  %v6587_v18 = vpack.c.bf16 %v2292_v53, %v2288_v46  ;;  %v6643_v46 = vpack.c.bf16 %v2326_v24, %v2322_v20  ;;  %v2328_v53 = vld [vmem:[#allocation7 + $0x180] sm:$0xff] }
 0x880   :  { %v6593_v0 = vpack.c.bf16 %v2301_v4, %v2297_v59  ;;  %v6649_v59 = vpack.c.bf16 %v2335_v37, %v2331_v33  ;;  %v2330_v4 = vld [vmem:[#allocation7 + $0x190] sm:$0xff] }
 0x882   :  { %4777 = vmatpush1.bf16.msra.mxu0 %v4776_v32  ;;  %4809 = vmatpush1.bf16.msra.mxu1 %v4808_v47  ;;  %v6589_v32 = vpack.c.bf16 %v2294_v55, %v2290_v54  ;;  %v2296_v47 = vld [vmem:[#allocation7 + $0x80] sm:$0xff]  ;;  %v6647_v55 = vpack.c.bf16 %v2333_v29, %v2329_v28 }
 0x883   :  { %4779 = vmatprep.subr.bf16.mxu0 %v4778_v49  ;;  %4811 = vmatprep.subr.bf16.mxu1 %v4810_v16  ;;  %v6595_v49 = vpack.c.bf16 %v2303_v9, %v2299_v22  ;;  %v2298_v16 = vld [vmem:[#allocation7 + $0x90] sm:$0xff]  ;;  %v6603_v30 = vpack.c.bf16 %v2300_v50, %v2296_v47  ;;  %v2332_v54 = vld [vmem:[#allocation7 + $0x1a0] sm:$0xff]  ;;  %v2337_v9 = vld [vmem:[#allocation7 + $0x1c8] sm:$0xff] }
 0x884   :  { %v2334_v22 = vld [vmem:[#allocation7 + $0x1b0] sm:$0xff]  ;;  %v2341_v47 = vld [vmem:[#allocation7 + $0x1e8] sm:$0xff]  ;;  %v2339_v50 = vld [vmem:[#allocation7 + $0x1d8] sm:$0xff] }
 0x885   :  { %v6655_v8 = vpack.c.bf16 %v2334_v22, %v2330_v4  ;;  %v6659_v25 = vpack.c.bf16 %v2341_v47, %v2337_v9 }
 0x886   :  { %4781 = vmatpush1.bf16.msra.mxu0 %v4780_v17  ;;  %4813 = vmatpush1.bf16.msra.mxu1 %v4812_v1  ;;  %v2304_v17 = vld [vmem:[#allocation7 + $0xc0] sm:$0xff] }
 0x887   :  { %4783 = vmatprep.subr.bf16.mxu0 %v4782_v44  ;;  %4815 = vmatprep.subr.bf16.mxu1 %v4814_v60  ;;  %v2308_v1 = vld [vmem:[#allocation7 + $0xe0] sm:$0xff]  ;;  %v2306_v44 = vld [vmem:[#allocation7 + $0xd0] sm:$0xff]  ;;  %v2313_v60 = vld [vmem:[#allocation7 + $0x108] sm:$0xff] }
 0x888   :  { %v6617_v48 = vpack.c.bf16 %v2308_v1, %v2304_v17  ;;  %v2340_v17 = vld [vmem:[#allocation7 + $0x1e0] sm:$0xff]  ;;  %v2338_v1 = vld [vmem:[#allocation7 + $0x1d0] sm:$0xff] }
 0x88a   :  { %4785 = vmatpush1.bf16.msra.mxu0 %v4784_v51  ;;  %4817 = vmatpush1.bf16.msra.mxu1 %v4816_v7  ;;  %v2316_v51 = vld [vmem:[#allocation7 + $0x120] sm:$0xff]  ;;  %v6623_v7 = vpack.c.bf16 %v2317_v56, %v2313_v60 }
 0x88b   :  { %4787 = vmatprep.subr.bf16.mxu0 %v4786_v43  ;;  %4819 = vmatprep.subr.bf16.mxu1 %v4818_v62  ;;  %v2318_v43 = vld [vmem:[#allocation7 + $0x130] sm:$0xff]  ;;  %v2321_v62 = vld [vmem:[#allocation7 + $0x148] sm:$0xff]  ;;  %v6629_v14 = vpack.c.bf16 %v2316_v51, %v2312_v58  ;;  %v4073_v56 = vld [vmem:[%s7111_s8 + $0x2] sm:$0x3] }
 0x88c   :  { %v6631_v10 = vpack.c.bf16 %v2318_v43, %v2314_v6  ;;  %v7255_v43 = vld [vmem:[#allocation24_spill] sm:$0xff] }
 0x88e   :  { %4789 = vmatpush1.bf16.msra.mxu0 %v4788_v39  ;;  %4821 = vmatpush1.bf16.msra.mxu1 %v4820_v21  ;;  %v2324_v39 = vld [vmem:[#allocation7 + $0x160] sm:$0xff]  ;;  %v6635_v21 = vpack.c.bf16 %v2325_v52, %v2321_v62  ;;  %v2235_v62 = vrot.slane %v2230_v13, %v7255_v43  ;;  %v7256_v52 = vld [vmem:[#allocation25_spill] sm:$0xff] }
 0x88f   :  { %4823 = vmatprep.subr.bf16.mxu0 %v6569_v15  ;;  %4855 = vmatprep.subr.bf16.mxu1 %v6571_v19  ;;  %v6641_v23 = vpack.c.bf16 %v2324_v39, %v2320_v34  ;;  %v2243_v31 = vrot.slane %v2230_v13, %v7256_v52  ;;  %v2239_v34 = vrot.slane %v2230_v13, %v7257_v12  ;;  %v7258_v39 = vld [vmem:[#allocation27_spill] sm:$0xff] }
 0x890   :  { %v2247_v20 = vrot.slane %v2230_v13, %v7258_v39 }
 0x891   :  { %2141 = vmatmul.mubr.f32.vlgmr.msra.gmra.mrb[20].mxu0 %v6555_v63  ;;  %2218 = vmatmul.mubr.f32.vlgmr.msra.gmra.mrb[20].mxu1 %v6555_v63  ;;  %v2302_v63 = vld [vmem:[#allocation7 + $0xb0] sm:$0xff] }
 0x892   :  { %4825 = vmatpush1.bf16.msra.mxu0 %v6573_v41  ;;  %4857 = vmatpush1.bf16.msra.mxu1 %v6575_v42  ;;  %v6605_v38 = vpack.c.bf16 %v2302_v63, %v2298_v16  ;;  %v2343_v16 = vld [vmem:[#allocation7 + $0x1f8] sm:$0xff]  ;;  %v6653_v63 = vpack.c.bf16 %v2332_v54, %v2328_v53 }
 0x893   :  { %2146 = vmatprep.mubr.f32.mxu0 %v7210_v36  ;;  %2223 = vmatprep.mubr.f32.mxu1 %v7210_v36  ;;  %v6661_v57 = vpack.c.bf16 %v2343_v16, %v2339_v50 }
 0x894   :  { %4827 = vmatprep.subr.bf16.mxu0 %v6579_v2  ;;  %4859 = vmatprep.subr.bf16.mxu1 %v6581_v3 }
 0x895   :  { %2147 = vmatmul.mubr.f32.gmra.mrb[22].mxu0 %v6559_v45  ;;  %2224 = vmatmul.mubr.f32.gmra.mrb[22].mxu1 %v6559_v45  ;;  %v2310_v45 = vld [vmem:[#allocation7 + $0xf0] sm:$0xff] }
 0x896   :  { %4829 = vmatpush1.bf16.msra.mxu0 %v6587_v18  ;;  %4861 = vmatpush1.bf16.msra.mxu1 %v6589_v32  ;;  %v6619_v40 = vpack.c.bf16 %v2310_v45, %v2306_v44  ;;  %v2342_v44 = vld [vmem:[#allocation7 + $0x1f0] sm:$0xff]  ;;  %v6665_v45 = vpack.c.bf16 %v2340_v17, %v2336_v26 }
 0x897   :  { %4831 = vmatprep.subr.bf16.mxu0 %v6593_v0  ;;  %4863 = vmatprep.subr.bf16.mxu1 %v6595_v49  ;;  %v6667_v60 = vpack.c.bf16 %v2342_v44, %v2338_v1 }
 0x898   :  { %2408 = vmatprep.mubr.f32.mxu0 %v7210_v36  ;;  %2479 = vmatprep.mubr.f32.mxu1 %v7210_v36 }
 0x89a   :  { %4833 = vmatpush1.bf16.msra.mxu0 %v6603_v30  ;;  %4865 = vmatpush1.bf16.msra.mxu1 %v6605_v38 }
 0x89b   :  { %4835 = vmatprep.subr.bf16.mxu0 %v6609_v27  ;;  %4867 = vmatprep.subr.bf16.mxu1 %v6611_v61 }
 0x89e   :  { %4837 = vmatpush1.bf16.msra.mxu0 %v6617_v48  ;;  %4869 = vmatpush1.bf16.msra.mxu1 %v6619_v40 }
 0x89f   :  { %4839 = vmatprep.subr.bf16.mxu0 %v6623_v7  ;;  %4871 = vmatprep.subr.bf16.mxu1 %v6625_v35 }
 0x8a2   :  { %4841 = vmatpush1.bf16.msra.mxu0 %v6629_v14  ;;  %4873 = vmatpush1.bf16.msra.mxu1 %v6631_v10 }
 0x8a3   :  { %4843 = vmatprep.subr.bf16.mxu0 %v6635_v21  ;;  %4875 = vmatprep.subr.bf16.mxu1 %v6637_v11 }
 0x8a6   :  { %4845 = vmatpush1.bf16.msra.mxu0 %v6641_v23  ;;  %4877 = vmatpush1.bf16.msra.mxu1 %v6643_v46 }
 0x8a7   :  { %4847 = vmatprep.subr.bf16.mxu0 %v6647_v55  ;;  %4879 = vmatprep.subr.bf16.mxu1 %v6649_v59 }
 0x8aa   :  { %4849 = vmatpush1.bf16.msra.mxu0 %v6653_v63  ;;  %4881 = vmatpush1.bf16.msra.mxu1 %v6655_v8 }
 0x8ab   :  { %4851 = vmatprep.subr.bf16.mxu0 %v6659_v25  ;;  %4883 = vmatprep.subr.bf16.mxu1 %v6661_v57 }
 0x8ae   :  { %4853 = vmatpush1.bf16.msra.mxu0 %v6665_v45  ;;  %4885 = vmatpush1.bf16.msra.mxu1 %v6667_v60 }
 0x8af   :  { %4887 = vmatprep.subr.bf16.mxu0 %v6569_v15  ;;  %4919 = vmatprep.subr.bf16.mxu1 %v6571_v19 }
 0x8b1   :  { %2409 = vmatmul.mubr.f32.vlgmr.msra.gmra.mrb[24].mxu0 %v4073_v56  ;;  %2480 = vmatmul.mubr.f32.vlgmr.msra.gmra.mrb[24].mxu1 %v4073_v56 }
 0x8b2   :  { %4889 = vmatpush1.bf16.msra.mxu0 %v6573_v41  ;;  %4921 = vmatpush1.bf16.msra.mxu1 %v6575_v42 }
 0x8b3   :  { %4891 = vmatprep.subr.bf16.mxu0 %v6579_v2  ;;  %4923 = vmatprep.subr.bf16.mxu1 %v6581_v3 }
 0x8b4   :  { %2590 = vmatprep.mubr.f32.mxu0 %v7210_v36  ;;  %2661 = vmatprep.mubr.f32.mxu1 %v7210_v36 }
 0x8b6   :  { %4893 = vmatpush1.bf16.msra.mxu0 %v6587_v18  ;;  %4925 = vmatpush1.bf16.msra.mxu1 %v6589_v32 }
 0x8b7   :  { %4895 = vmatprep.subr.bf16.mxu0 %v6593_v0  ;;  %4927 = vmatprep.subr.bf16.mxu1 %v6595_v49 }
 0x8ba   :  { %4897 = vmatpush1.bf16.msra.mxu0 %v6603_v30  ;;  %4929 = vmatpush1.bf16.msra.mxu1 %v6605_v38 }
 0x8bb   :  { %4899 = vmatprep.subr.bf16.mxu0 %v6609_v27  ;;  %4931 = vmatprep.subr.bf16.mxu1 %v6611_v61 }
 0x8be   :  { %4901 = vmatpush1.bf16.msra.mxu0 %v6617_v48  ;;  %4933 = vmatpush1.bf16.msra.mxu1 %v6619_v40 }
 0x8bf   :  { %4903 = vmatprep.subr.bf16.mxu0 %v6623_v7  ;;  %4935 = vmatprep.subr.bf16.mxu1 %v6625_v35 }
 0x8c2   :  { %4905 = vmatpush1.bf16.msra.mxu0 %v6629_v14  ;;  %4937 = vmatpush1.bf16.msra.mxu1 %v6631_v10 }
 0x8c3   :  { %4907 = vmatprep.subr.bf16.mxu0 %v6635_v21  ;;  %4939 = vmatprep.subr.bf16.mxu1 %v6637_v11 }
 0x8c6   :  { %4909 = vmatpush1.bf16.msra.mxu0 %v6641_v23  ;;  %4941 = vmatpush1.bf16.msra.mxu1 %v6643_v46 }
 0x8c7   :  { %4911 = vmatprep.subr.bf16.mxu0 %v6647_v55  ;;  %4943 = vmatprep.subr.bf16.mxu1 %v6649_v59 }
 0x8ca   :  { %4913 = vmatpush1.bf16.msra.mxu0 %v6653_v63  ;;  %4945 = vmatpush1.bf16.msra.mxu1 %v6655_v8 }
 0x8cb   :  { %4915 = vmatprep.subr.bf16.mxu0 %v6659_v25  ;;  %4947 = vmatprep.subr.bf16.mxu1 %v6661_v57 }
 0x8ce   :  { %4917 = vmatpush1.bf16.msra.mxu0 %v6665_v45  ;;  %4949 = vmatpush1.bf16.msra.mxu1 %v6667_v60 }
 0x8cf   :  { %4951 = vmatprep.subr.bf16.mxu0 %v6569_v15  ;;  %4983 = vmatprep.subr.bf16.mxu1 %v6571_v19 }
 0x944   :  { %v1988_v5 = vpop.f32.mrb[16].mxu0  ;;  %v2065_v58 = vpop.f32.mrb[16].mxu1 }
 0x945   :  { %v1990_v51 = vpop.f32.mrb[17].mxu0  ;;  %v2067_v6 = vpop.f32.mrb[17].mxu1  ;;  %v2252_v22 = vadd.f32 %v2235_v62, %v1988_v5  ;;  %v2254_v9 = vadd.f32 %v2243_v31, %v2065_v58 }
 0x946   :  { %v2253_v47 = vadd.f32 %v2239_v34, %v1990_v51  ;;  %v2255_v50 = vadd.f32 %v2247_v20, %v2067_v6 }
 0x948   :  { %v1994_v24 = vpop.f32.mrb[18].mxu0  ;;  %v2071_v28 = vpop.f32.mrb[18].mxu1 }
 0x949   :  { %v2256_v29 = vadd.f32 %v2235_v62, %v1994_v24  ;;  %v2258_v33 = vadd.f32 %v2243_v31, %v2071_v28  ;;  %v1996_v37 = vpop.f32.mrb[19].mxu0  ;;  %v2073_v53 = vpop.f32.mrb[19].mxu1 }
 0x94a   :  { %v2257_v54 = vadd.f32 %v2239_v34, %v1996_v37  ;;  %v2259_v4 = vadd.f32 %v2247_v20, %v2073_v53 }
 0x964   :  { %v2142_v16 = vpop.f32.mrb[20].mxu0  ;;  %v2219_v26 = vpop.f32.mrb[20].mxu1 }
 0x965   :  { %v3091_v17 = vrot.slane %v2142_v16, 6  ;;  %v3279_v1 = vrot.slane %v2142_v16, 2  ;;  %v3093_v44 = vrot.slane %v2219_v26, 6  ;;  %v3281_v56 = vrot.slane %v2219_v26, 2  ;;  %v2144_v43 = vpop.f32.mrb[21].mxu0  ;;  %v2221_v13 = vpop.f32.mrb[21].mxu1 }
 0x966   :  { %v3092_v52 = vrot.slane %v2144_v43, 6  ;;  %v3280_v12 = vrot.slane %v2144_v43, 2  ;;  %v3094_v39 = vrot.slane %v2221_v13, 6  ;;  %v3282_v24 = vrot.slane %v2221_v13, 2 }
 0x967   :  { %v6719_v28 = vadd.f32 %v3279_v1, %v2256_v29  ;;  %v6721_v37 = vadd.f32 %v3281_v56, %v2258_v33  ;;  %v6723_v5 = vadd.f32 %v3091_v17, %v2256_v29  ;;  %v6725_v58 = vadd.f32 %v3093_v44, %v2258_v33 }
 0x968   :  { %v6727_v51 = vadd.f32 %v3280_v12, %v2257_v54  ;;  %v6729_v6 = vadd.f32 %v3282_v24, %v2259_v4  ;;  %v2148_v62 = vpop.f32.mrb[22].mxu0  ;;  %v2225_v31 = vpop.f32.mrb[22].mxu1  ;;  %v6731_v34 = vadd.f32 %v3092_v52, %v2257_v54  ;;  %v6733_v20 = vadd.f32 %v3094_v39, %v2259_v4 }
 0x969   :  { %7259 = vst [vmem:[#allocation13_spill] sm:$0xff] %v6721_v37  ;;  %v2268_v53 = vrot.slane %v2148_v62, 6  ;;  %v2514_v16 = vrot.slane %v2148_v62, 2  ;;  %v2270_v26 = vrot.slane %v2225_v31, 6  ;;  %v2516_v1 = vrot.slane %v2225_v31, 2  ;;  %v2150_v56 = vpop.f32.mrb[23].mxu0 }
 0x96a   :  { %7260 = vst [vmem:[#allocation14_spill] sm:$0xff] %v6727_v51  ;;  %7261 = vst [vmem:[#allocation15_spill] sm:$0xff] %v6729_v6  ;;  %v2227_v43 = vpop.f32.mrb[23].mxu1  ;;  %v2269_v29 = vrot.slane %v2150_v56, 6  ;;  %v2515_v17 = vrot.slane %v2150_v56, 2 }
 0x96b   :  { %v2271_v33 = vrot.slane %v2227_v43, 6  ;;  %v2517_v44 = vrot.slane %v2227_v43, 2  ;;  %v6735_v13 = vadd.f32 %v2514_v16, %v2252_v22  ;;  %v6737_v12 = vadd.f32 %v2516_v1, %v2254_v9 }
 0x96c   :  { %v6739_v24 = vadd.f32 %v2268_v53, %v2252_v22  ;;  %v6741_v54 = vadd.f32 %v2270_v26, %v2254_v9  ;;  %v6743_v4 = vadd.f32 %v2515_v17, %v2253_v47  ;;  %v6747_v39 = vadd.f32 %v2269_v29, %v2253_v47 }
 0x96d   :  { %v6745_v52 = vadd.f32 %v2517_v44, %v2255_v50  ;;  %v6749_v62 = vadd.f32 %v2271_v33, %v2255_v50 }
 0x984   :  { %v2410_v31 = vpop.f32.mrb[24].mxu0  ;;  %v2481_v56 = vpop.f32.mrb[24].mxu1 }
 0x985   :  { %v2486_v43 = vadd.f32 %v2410_v31, %v6739_v24  ;;  %v2412_v16 = vpop.f32.mrb[25].mxu0  ;;  %v2483_v37 = vpop.f32.mrb[25].mxu1  ;;  %v2488_v47 = vadd.f32 %v2481_v56, %v6741_v54 }
 0x986   :  { %v2487_v1 = vadd.f32 %v2412_v16, %v6747_v39  ;;  %v2489_v9 = vadd.f32 %v2483_v37, %v6749_v62 }
 0x987   :  { %v4075_v22 = vmul.f32 -1.442695, %v2486_v43  ;;  %v4074_v43 = vld [vmem:[%s7112_s9 + $0x2] sm:$0x3] }
 0x988   :  { %v4076_v53 = vmul.f32 -1.442695, %v2487_v1  ;;  %v4077_v26 = vmul.f32 -1.442695, %v2489_v9 }
 0x989   :  { %5511 = vpow2.f32 %v4075_v22 }
 0x98a   :  { %5513 = vpow2.f32 %v4076_v53 }
 0x98b   :  { %5515 = vpow2.f32 %v4077_v26 }
 0x98c   :  { %5517 = vtanh.f32 %v2488_v47 }
 0x993   :  { %v5512_v29 = vpop.eup %5511 }
 0x994   :  { %v5514_v50 = vpop.eup %5513  ;;  %v2493_v17 = vadd.f32 1.0, %v5512_v29 }
 0x995   :  { %v2499_v33 = vadd.f32 1.0, %v5514_v50  ;;  %v5516_v44 = vpop.eup %5515 }
 0x996   :  { %5519 = vrcp.f32 %v2493_v17  ;;  %v5518_v31 = vpop.eup %5517  ;;  %v2506_v22 = vadd.f32 1.0, %v5516_v44 }
 0x997   :  { %5521 = vrcp.f32 %v2499_v33 }
 0x998   :  { %5523 = vrcp.f32 %v2506_v22 }
 0x9a0   :  { %v5520_v16 = vpop.eup %5519 }
 0x9a1   :  { %v5522_v1 = vpop.eup %5521  ;;  %v2510_v37 = vmul.f32 %v5520_v16, %v5518_v31 }
 0x9a2   :  { %v2509_v53 = vmul.f32 %v5522_v1, %v4074_v43  ;;  %v5524_v9 = vpop.eup %5523 }
 0x9a4   :  { %v6758_v56 = vadd.f32 %v2510_v37, %v2509_v53 }
 0x9a6   :  { %5525 = vtanh.f32 %v6758_v56 }
 0x9b0   :  { %v5526_v26 = vpop.eup %5525 }
 0x9b1   :  { %v6761_v47 = vmul.f32 %v5526_v26, %v5524_v9 }
 0x9b3   :  { %7262 = vst [vmem:[#allocation16_spill] sm:$0xff] %v6761_v47  ;;  %2591 = vmatmul.mubr.f32.vlgmr.msra.gmra.mrb[26].mxu0 %v6761_v47  ;;  %2662 = vmatmul.mubr.f32.vlgmr.msra.gmra.mrb[26].mxu1 %v6761_v47 }
 0x9b4   :  { %4953 = vmatpush1.bf16.msra.mxu0 %v6573_v41  ;;  %4985 = vmatpush1.bf16.msra.mxu1 %v6575_v42 }
 0x9b5   :  { %4955 = vmatprep.subr.bf16.mxu0 %v6579_v2  ;;  %4987 = vmatprep.subr.bf16.mxu1 %v6581_v3 }
 0x9b6   :  { %2778 = vmatprep.mubr.f32.mxu0 %v7210_v36  ;;  %2849 = vmatprep.mubr.f32.mxu1 %v7210_v36 }
 0x9b8   :  { %4957 = vmatpush1.bf16.msra.mxu0 %v6587_v18  ;;  %4989 = vmatpush1.bf16.msra.mxu1 %v6589_v32 }
 0x9b9   :  { %4959 = vmatprep.subr.bf16.mxu0 %v6593_v0  ;;  %4991 = vmatprep.subr.bf16.mxu1 %v6595_v49 }
 0x9bc   :  { %4961 = vmatpush1.bf16.msra.mxu0 %v6603_v30  ;;  %4993 = vmatpush1.bf16.msra.mxu1 %v6605_v38 }
 0x9bd   :  { %4963 = vmatprep.subr.bf16.mxu0 %v6609_v27  ;;  %4995 = vmatprep.subr.bf16.mxu1 %v6611_v61 }
 0x9c0   :  { %4965 = vmatpush1.bf16.msra.mxu0 %v6617_v48  ;;  %4997 = vmatpush1.bf16.msra.mxu1 %v6619_v40 }
 0x9c1   :  { %4967 = vmatprep.subr.bf16.mxu0 %v6623_v7  ;;  %4999 = vmatprep.subr.bf16.mxu1 %v6625_v35 }
 0x9c4   :  { %4969 = vmatpush1.bf16.msra.mxu0 %v6629_v14  ;;  %5001 = vmatpush1.bf16.msra.mxu1 %v6631_v10 }
 0x9c5   :  { %4971 = vmatprep.subr.bf16.mxu0 %v6635_v21  ;;  %5003 = vmatprep.subr.bf16.mxu1 %v6637_v11 }
 0x9c8   :  { %4973 = vmatpush1.bf16.msra.mxu0 %v6641_v23  ;;  %5005 = vmatpush1.bf16.msra.mxu1 %v6643_v46 }
 0x9c9   :  { %4975 = vmatprep.subr.bf16.mxu0 %v6647_v55  ;;  %5007 = vmatprep.subr.bf16.mxu1 %v6649_v59 }
 0x9cc   :  { %4977 = vmatpush1.bf16.msra.mxu0 %v6653_v63  ;;  %5009 = vmatpush1.bf16.msra.mxu1 %v6655_v8 }
 0x9cd   :  { %4979 = vmatprep.subr.bf16.mxu0 %v6659_v25  ;;  %5011 = vmatprep.subr.bf16.mxu1 %v6661_v57 }
 0x9d0   :  { %4981 = vmatpush1.bf16.msra.mxu0 %v6665_v45  ;;  %5013 = vmatpush1.bf16.msra.mxu1 %v6667_v60 }
 0x9d1   :  { %5015 = vmatprep.subr.bf16.mxu0 %v6569_v15  ;;  %5047 = vmatprep.subr.bf16.mxu1 %v6571_v19 }
 0xa86   :  { %v2592_v29 = vpop.f32.mrb[26].mxu0  ;;  %v2663_v50 = vpop.f32.mrb[26].mxu1 }
 0xa87   :  { %v2672_v17 = vrot.slane %v2592_v29, 6  ;;  %v2594_v33 = vpop.f32.mrb[27].mxu0  ;;  %v2665_v44 = vpop.f32.mrb[27].mxu1  ;;  %v2674_v9 = vrot.slane %v2663_v50, 6 }
 0xa88   :  { %v2673_v31 = vrot.slane %v2594_v33, 6  ;;  %v2675_v22 = vrot.slane %v2665_v44, 6  ;;  %v2704_v44 = vrot.slane %v6758_v56, 6 }
 0xa89   :  { %v2680_v43 = vadd.f32 %v2672_v17, %v6735_v13  ;;  %v2682_v47 = vadd.f32 %v2674_v9, %v6737_v12 }
 0xa8a   :  { %v2681_v16 = vadd.f32 %v2673_v31, %v6743_v4  ;;  %v2683_v53 = vadd.f32 %v2675_v22, %v6745_v52 }
 0xa8b   :  { %v4078_v1 = vmul.f32 -1.442695, %v2680_v43 }
 0xa8c   :  { %v4079_v37 = vmul.f32 -1.442695, %v2681_v16  ;;  %v4080_v26 = vmul.f32 -1.442695, %v2683_v53 }
 0xa8d   :  { %5527 = vpow2.f32 %v4078_v1 }
 0xa8e   :  { %5529 = vpow2.f32 %v4079_v37 }
 0xa8f   :  { %5531 = vpow2.f32 %v4080_v26 }
 0xa90   :  { %5533 = vtanh.f32 %v2682_v47 }
 0xa97   :  { %v5528_v6 = vpop.eup %5527 }
 0xa98   :  { %v5530_v29 = vpop.eup %5529  ;;  %v2687_v51 = vadd.f32 1.0, %v5528_v6 }
 0xa99   :  { %v2693_v33 = vadd.f32 1.0, %v5530_v29  ;;  %v5532_v17 = vpop.eup %5531 }
 0xa9a   :  { %5535 = vrcp.f32 %v2687_v51  ;;  %v5534_v31 = vpop.eup %5533  ;;  %v2700_v37 = vadd.f32 1.0, %v5532_v17 }
 0xa9b   :  { %5537 = vrcp.f32 %v2693_v33 }
 0xa9c   :  { %5539 = vrcp.f32 %v2700_v37 }
 0xaa4   :  { %v5536_v43 = vpop.eup %5535 }
 0xaa5   :  { %v5538_v16 = vpop.eup %5537  ;;  %v2707_v1 = vmul.f32 %v5536_v43, %v5534_v31 }
 0xaa6   :  { %v2706_v50 = vmul.f32 %v5538_v16, %v2704_v44  ;;  %v5540_v6 = vpop.eup %5539 }
 0xaa8   :  { %v6804_v22 = vadd.f32 %v2707_v1, %v2706_v50 }
 0xaaa   :  { %5541 = vtanh.f32 %v6804_v22 }
 0xab4   :  { %v5542_v53 = vpop.eup %5541 }
 0xab5   :  { %v2710_v47 = vmul.f32 %v5542_v53, %v5540_v6 }
 0xab7   :  { %v2712_v9 = vrot.slane %v2710_v47, 2 }
 0xab9   :  { %2779 = vmatmul.mubr.f32.vlgmr.msra.gmra.mrb[28].mxu0 %v2712_v9  ;;  %2850 = vmatmul.mubr.f32.vlgmr.msra.gmra.mrb[28].mxu1 %v2712_v9 }
 0xaba   :  { %5017 = vmatpush1.bf16.msra.mxu0 %v6573_v41  ;;  %5049 = vmatpush1.bf16.msra.mxu1 %v6575_v42 }
 0xabb   :  { %5019 = vmatprep.subr.bf16.mxu0 %v6579_v2  ;;  %5051 = vmatprep.subr.bf16.mxu1 %v6581_v3 }
 0xabc   :  { %2966 = vmatprep.mubr.f32.mxu0 %v7210_v36  ;;  %3037 = vmatprep.mubr.f32.mxu1 %v7210_v36 }
 0xabe   :  { %5021 = vmatpush1.bf16.msra.mxu0 %v6587_v18  ;;  %5053 = vmatpush1.bf16.msra.mxu1 %v6589_v32 }
 0xabf   :  { %5023 = vmatprep.subr.bf16.mxu0 %v6593_v0  ;;  %5055 = vmatprep.subr.bf16.mxu1 %v6595_v49 }
 0xac2   :  { %5025 = vmatpush1.bf16.msra.mxu0 %v6603_v30  ;;  %5057 = vmatpush1.bf16.msra.mxu1 %v6605_v38 }
 0xac3   :  { %5027 = vmatprep.subr.bf16.mxu0 %v6609_v27  ;;  %5059 = vmatprep.subr.bf16.mxu1 %v6611_v61 }
 0xac6   :  { %5029 = vmatpush1.bf16.msra.mxu0 %v6617_v48  ;;  %5061 = vmatpush1.bf16.msra.mxu1 %v6619_v40 }
 0xac7   :  { %5031 = vmatprep.subr.bf16.mxu0 %v6623_v7  ;;  %5063 = vmatprep.subr.bf16.mxu1 %v6625_v35 }
 0xaca   :  { %5033 = vmatpush1.bf16.msra.mxu0 %v6629_v14  ;;  %5065 = vmatpush1.bf16.msra.mxu1 %v6631_v10 }
 0xacb   :  { %5035 = vmatprep.subr.bf16.mxu0 %v6635_v21  ;;  %5067 = vmatprep.subr.bf16.mxu1 %v6637_v11 }
 0xace   :  { %5037 = vmatpush1.bf16.msra.mxu0 %v6641_v23  ;;  %5069 = vmatpush1.bf16.msra.mxu1 %v6643_v46 }
 0xacf   :  { %5039 = vmatprep.subr.bf16.mxu0 %v6647_v55  ;;  %5071 = vmatprep.subr.bf16.mxu1 %v6649_v59 }
 0xad2   :  { %5041 = vmatpush1.bf16.msra.mxu0 %v6653_v63  ;;  %5073 = vmatpush1.bf16.msra.mxu1 %v6655_v8 }
 0xad3   :  { %5043 = vmatprep.subr.bf16.mxu0 %v6659_v25  ;;  %5075 = vmatprep.subr.bf16.mxu1 %v6661_v57 }
 0xad6   :  { %5045 = vmatpush1.bf16.msra.mxu0 %v6665_v45  ;;  %5077 = vmatpush1.bf16.msra.mxu1 %v6667_v60 }
 0xad7   :  { %5079 = vmatprep.subr.bf16.mxu0 %v6569_v15  ;;  %5111 = vmatprep.subr.bf16.mxu1 %v6571_v19 }
 0xb8c   :  { %v2780_v51 = vpop.f32.mrb[28].mxu0  ;;  %v2851_v56 = vpop.f32.mrb[28].mxu1 }
 0xb8d   :  { %v2860_v26 = vrot.slane %v2780_v51, 4  ;;  %v2782_v29 = vpop.f32.mrb[29].mxu0  ;;  %v2853_v33 = vpop.f32.mrb[29].mxu1  ;;  %v2862_v50 = vrot.slane %v2851_v56, 4 }
 0xb8e   :  { %v2861_v17 = vrot.slane %v2782_v29, 4  ;;  %v2863_v1 = vrot.slane %v2853_v33, 4  ;;  %v2892_v33 = vrot.slane %v6804_v22, 6 }
 0xb8f   :  { %v2868_v31 = vadd.f32 %v2860_v26, %v6739_v24  ;;  %v2870_v53 = vadd.f32 %v2862_v50, %v6741_v54 }
 0xb90   :  { %v2869_v43 = vadd.f32 %v2861_v17, %v6747_v39  ;;  %v2871_v37 = vadd.f32 %v2863_v1, %v6749_v62 }
 0xb91   :  { %v4081_v44 = vmul.f32 -1.442695, %v2868_v31 }
 0xb92   :  { %v4082_v16 = vmul.f32 -1.442695, %v2869_v43  ;;  %v4083_v6 = vmul.f32 -1.442695, %v2871_v37 }
 0xb93   :  { %5543 = vpow2.f32 %v4081_v44 }
 0xb94   :  { %5545 = vpow2.f32 %v4082_v16 }
 0xb95   :  { %5547 = vpow2.f32 %v4083_v6 }
 0xb96   :  { %5549 = vtanh.f32 %v2870_v53 }
 0xb9d   :  { %v5544_v47 = vpop.eup %5543 }
 0xb9e   :  { %v5546_v9 = vpop.eup %5545  ;;  %v2875_v51 = vadd.f32 1.0, %v5544_v47 }
 0xb9f   :  { %v2881_v29 = vadd.f32 1.0, %v5546_v9  ;;  %v5548_v24 = vpop.eup %5547 }
 0xba0   :  { %5551 = vrcp.f32 %v2875_v51  ;;  %v5550_v39 = vpop.eup %5549  ;;  %v2888_v62 = vadd.f32 1.0, %v5548_v24 }
 0xba1   :  { %5553 = vrcp.f32 %v2881_v29 }
 0xba2   :  { %5555 = vrcp.f32 %v2888_v62 }
 0xbaa   :  { %v5552_v26 = vpop.eup %5551 }
 0xbab   :  { %v5554_v17 = vpop.eup %5553  ;;  %v2895_v31 = vmul.f32 %v5552_v26, %v5550_v39 }
 0xbac   :  { %v2894_v56 = vmul.f32 %v5554_v17, %v2892_v33  ;;  %v5556_v54 = vpop.eup %5555 }
 0xbae   :  { %v6846_v43 = vadd.f32 %v2895_v31, %v2894_v56 }
 0xbb0   :  { %5557 = vtanh.f32 %v6846_v43 }
 0xbba   :  { %v5558_v44 = vpop.eup %5557 }
 0xbbb   :  { %v2898_v16 = vmul.f32 %v5558_v44, %v5556_v54 }
 0xbbd   :  { %v2900_v1 = vrot.slane %v2898_v16, 4 }
 0xbbf   :  { %2967 = vmatmul.mubr.f32.vlgmr.msra.gmra.mrb[30].mxu0 %v2900_v1  ;;  %3038 = vmatmul.mubr.f32.vlgmr.msra.gmra.mrb[30].mxu1 %v2900_v1  ;;  %v3080_v1 = vrot.slane %v6846_v43, 6 }
 0xbc0   :  { %5081 = vmatpush1.bf16.msra.mxu0 %v6573_v41  ;;  %5113 = vmatpush1.bf16.msra.mxu1 %v6575_v42 }
 0xbc1   :  { %5083 = vmatprep.subr.bf16.mxu0 %v6579_v2  ;;  %5115 = vmatprep.subr.bf16.mxu1 %v6581_v3 }
 0xbc2   :  { %3170 = vmatprep.mubr.f32.mxu0 %v7210_v36  ;;  %3241 = vmatprep.mubr.f32.mxu1 %v7210_v36 }
 0xbc4   :  { %5085 = vmatpush1.bf16.msra.mxu0 %v6587_v18  ;;  %5117 = vmatpush1.bf16.msra.mxu1 %v6589_v32 }
 0xbc5   :  { %5087 = vmatprep.subr.bf16.mxu0 %v6593_v0  ;;  %5119 = vmatprep.subr.bf16.mxu1 %v6595_v49 }
 0xbc8   :  { %5089 = vmatpush1.bf16.msra.mxu0 %v6603_v30  ;;  %5121 = vmatpush1.bf16.msra.mxu1 %v6605_v38 }
 0xbc9   :  { %5091 = vmatprep.subr.bf16.mxu0 %v6609_v27  ;;  %5123 = vmatprep.subr.bf16.mxu1 %v6611_v61 }
 0xbcc   :  { %5093 = vmatpush1.bf16.msra.mxu0 %v6617_v48  ;;  %5125 = vmatpush1.bf16.msra.mxu1 %v6619_v40 }
 0xbcd   :  { %5095 = vmatprep.subr.bf16.mxu0 %v6623_v7  ;;  %5127 = vmatprep.subr.bf16.mxu1 %v6625_v35 }
 0xbd0   :  { %5097 = vmatpush1.bf16.msra.mxu0 %v6629_v14  ;;  %5129 = vmatpush1.bf16.msra.mxu1 %v6631_v10 }
 0xbd1   :  { %5099 = vmatprep.subr.bf16.mxu0 %v6635_v21  ;;  %5131 = vmatprep.subr.bf16.mxu1 %v6637_v11 }
 0xbd4   :  { %5101 = vmatpush1.bf16.msra.mxu0 %v6641_v23  ;;  %5133 = vmatpush1.bf16.msra.mxu1 %v6643_v46 }
 0xbd5   :  { %5103 = vmatprep.subr.bf16.mxu0 %v6647_v55  ;;  %5135 = vmatprep.subr.bf16.mxu1 %v6649_v59 }
 0xbd8   :  { %5105 = vmatpush1.bf16.msra.mxu0 %v6653_v63  ;;  %5137 = vmatpush1.bf16.msra.mxu1 %v6655_v8 }
 0xbd9   :  { %5107 = vmatprep.subr.bf16.mxu0 %v6659_v25  ;;  %5139 = vmatprep.subr.bf16.mxu1 %v6661_v57 }
 0xbdc   :  { %5109 = vmatpush1.bf16.msra.mxu0 %v6665_v45  ;;  %5141 = vmatpush1.bf16.msra.mxu1 %v6667_v60 }
 0xbdd   :  { %5143 = vmatprep.subr.bf16.mxu0 %v6569_v15  ;;  %5175 = vmatprep.subr.bf16.mxu1 %v6571_v19 }
 0xc92   :  { %v2968_v22 = vpop.f32.mrb[30].mxu0  ;;  %v3039_v37 = vpop.f32.mrb[30].mxu1 }
 0xc93   :  { %v3048_v50 = vrot.slane %v2968_v22, 2  ;;  %v2970_v6 = vpop.f32.mrb[31].mxu0  ;;  %v3041_v53 = vpop.f32.mrb[31].mxu1  ;;  %v3050_v33 = vrot.slane %v3039_v37, 2 }
 0xc94   :  { %v3049_v47 = vrot.slane %v2970_v6, 2  ;;  %v3051_v39 = vrot.slane %v3041_v53, 2 }
 0xc95   :  { %v3056_v9 = vadd.f32 %v3048_v50, %v6735_v13  ;;  %v3058_v31 = vadd.f32 %v3050_v33, %v6737_v12 }
 0xc96   :  { %v3057_v51 = vadd.f32 %v3049_v47, %v6743_v4  ;;  %v3059_v26 = vadd.f32 %v3051_v39, %v6745_v52 }
 0xc97   :  { %v4084_v29 = vmul.f32 -1.442695, %v3056_v9 }
 0xc98   :  { %v4085_v24 = vmul.f32 -1.442695, %v3057_v51  ;;  %v4086_v17 = vmul.f32 -1.442695, %v3059_v26 }
 0xc99   :  { %5559 = vpow2.f32 %v4084_v29 }
 0xc9a   :  { %5561 = vpow2.f32 %v4085_v24 }
 0xc9b   :  { %5563 = vpow2.f32 %v4086_v17 }
 0xc9c   :  { %5565 = vtanh.f32 %v3058_v31 }
 0xca3   :  { %v5560_v62 = vpop.eup %5559 }
 0xca4   :  { %v5562_v56 = vpop.eup %5561  ;;  %v3063_v54 = vadd.f32 1.0, %v5560_v62 }
 0xca5   :  { %v3069_v44 = vadd.f32 1.0, %v5562_v56  ;;  %v5564_v13 = vpop.eup %5563 }
 0xca6   :  { %5567 = vrcp.f32 %v3063_v54  ;;  %v5566_v4 = vpop.eup %5565  ;;  %v3076_v52 = vadd.f32 1.0, %v5564_v13 }
 0xca7   :  { %5569 = vrcp.f32 %v3069_v44 }
 0xca8   :  { %5571 = vrcp.f32 %v3076_v52 }
 0xcb0   :  { %v5568_v16 = vpop.eup %5567 }
 0xcb1   :  { %v5570_v22 = vpop.eup %5569  ;;  %v3083_v50 = vmul.f32 %v5568_v16, %v5566_v4 }
 0xcb2   :  { %v3082_v37 = vmul.f32 %v5570_v22, %v3080_v1  ;;  %v5572_v12 = vpop.eup %5571 }
 0xcb4   :  { %v6888_v6 = vadd.f32 %v3083_v50, %v3082_v37 }
 0xcb6   :  { %5573 = vtanh.f32 %v6888_v6  ;;  %v3272_v50 = vrot.slane %v6888_v6, 6 }
 0xcc0   :  { %v5574_v53 = vpop.eup %5573 }
 0xcc1   :  { %v3086_v47 = vmul.f32 %v5574_v53, %v5572_v12 }
 0xcc3   :  { %v3104_v9 = vrot.slane %v3086_v47, 6 }
 0xcc5   :  { %3171 = vmatmul.mubr.f32.vlgmr.msra.gmra.mrb[32].mxu0 %v3104_v9  ;;  %3242 = vmatmul.mubr.f32.vlgmr.msra.gmra.mrb[32].mxu1 %v3104_v9 }
 0xcc6   :  { %5145 = vmatpush1.bf16.msra.mxu0 %v6573_v41  ;;  %5177 = vmatpush1.bf16.msra.mxu1 %v6575_v42 }
 0xcc7   :  { %5147 = vmatprep.subr.bf16.mxu0 %v6579_v2  ;;  %5179 = vmatprep.subr.bf16.mxu1 %v6581_v3 }
 0xcc8   :  { %3355 = vmatprep.mubr.f32.mxu0 %v7210_v36  ;;  %3426 = vmatprep.mubr.f32.mxu1 %v7210_v36 }
 0xcca   :  { %5149 = vmatpush1.bf16.msra.mxu0 %v6587_v18  ;;  %5181 = vmatpush1.bf16.msra.mxu1 %v6589_v32 }
 0xccb   :  { %5151 = vmatprep.subr.bf16.mxu0 %v6593_v0  ;;  %5183 = vmatprep.subr.bf16.mxu1 %v6595_v49 }
 0xcce   :  { %5153 = vmatpush1.bf16.msra.mxu0 %v6603_v30  ;;  %5185 = vmatpush1.bf16.msra.mxu1 %v6605_v38 }
 0xccf   :  { %5155 = vmatprep.subr.bf16.mxu0 %v6609_v27  ;;  %5187 = vmatprep.subr.bf16.mxu1 %v6611_v61 }
 0xcd2   :  { %5157 = vmatpush1.bf16.msra.mxu0 %v6617_v48  ;;  %5189 = vmatpush1.bf16.msra.mxu1 %v6619_v40 }
 0xcd3   :  { %5159 = vmatprep.subr.bf16.mxu0 %v6623_v7  ;;  %5191 = vmatprep.subr.bf16.mxu1 %v6625_v35 }
 0xcd6   :  { %5161 = vmatpush1.bf16.msra.mxu0 %v6629_v14  ;;  %5193 = vmatpush1.bf16.msra.mxu1 %v6631_v10 }
 0xcd7   :  { %5163 = vmatprep.subr.bf16.mxu0 %v6635_v21  ;;  %5195 = vmatprep.subr.bf16.mxu1 %v6637_v11 }
 0xcda   :  { %5165 = vmatpush1.bf16.msra.mxu0 %v6641_v23  ;;  %5197 = vmatpush1.bf16.msra.mxu1 %v6643_v46 }
 0xcdb   :  { %5167 = vmatprep.subr.bf16.mxu0 %v6647_v55  ;;  %5199 = vmatprep.subr.bf16.mxu1 %v6649_v59 }
 0xcde   :  { %5169 = vmatpush1.bf16.msra.mxu0 %v6653_v63  ;;  %5201 = vmatpush1.bf16.msra.mxu1 %v6655_v8 }
 0xcdf   :  { %5171 = vmatprep.subr.bf16.mxu0 %v6659_v25  ;;  %5203 = vmatprep.subr.bf16.mxu1 %v6661_v57 }
 0xce2   :  { %5173 = vmatpush1.bf16.msra.mxu0 %v6665_v45  ;;  %5205 = vmatpush1.bf16.msra.mxu1 %v6667_v60 }
 0xce3   :  { %5207 = vmatprep.subr.bf16.mxu0 %v6569_v15  ;;  %5239 = vmatprep.subr.bf16.mxu1 %v6571_v19 }
 0xd98   :  { %v3172_v43 = vpop.f32.mrb[32].mxu0  ;;  %v3243_v51 = vpop.f32.mrb[32].mxu1 }
 0xd99   :  { %v3248_v29 = vadd.f32 %v3172_v43, %v6723_v5  ;;  %v3174_v24 = vpop.f32.mrb[33].mxu0  ;;  %v3245_v39 = vpop.f32.mrb[33].mxu1  ;;  %v3250_v56 = vadd.f32 %v3243_v51, %v6725_v58 }
 0xd9a   :  { %v3249_v26 = vadd.f32 %v3174_v24, %v6731_v34  ;;  %v3251_v31 = vadd.f32 %v3245_v39, %v6733_v20 }
 0xd9b   :  { %v4087_v33 = vmul.f32 -1.442695, %v3248_v29 }
 0xd9c   :  { %v4088_v17 = vmul.f32 -1.442695, %v3249_v26  ;;  %v4089_v62 = vmul.f32 -1.442695, %v3251_v31  ;;  %v7263_v31 = vld [vmem:[#allocation14_spill] sm:$0xff] }
 0xd9d   :  { %5575 = vpow2.f32 %v4087_v33 }
 0xd9e   :  { %5577 = vpow2.f32 %v4088_v17 }
 0xd9f   :  { %5579 = vpow2.f32 %v4089_v62 }
 0xda0   :  { %5581 = vtanh.f32 %v3250_v56 }
 0xda7   :  { %v5576_v54 = vpop.eup %5575 }
 0xda8   :  { %v5578_v44 = vpop.eup %5577  ;;  %v3255_v13 = vadd.f32 1.0, %v5576_v54 }
 0xda9   :  { %v3261_v4 = vadd.f32 1.0, %v5578_v44  ;;  %v5580_v16 = vpop.eup %5579 }
 0xdaa   :  { %5583 = vrcp.f32 %v3255_v13  ;;  %v5582_v1 = vpop.eup %5581  ;;  %v3268_v12 = vadd.f32 1.0, %v5580_v16  ;;  %v7264_v13 = vld [vmem:[#allocation15_spill] sm:$0xff] }
 0xdab   :  { %5585 = vrcp.f32 %v3261_v4 }
 0xdac   :  { %5587 = vrcp.f32 %v3268_v12 }
 0xdb4   :  { %v5584_v22 = vpop.eup %5583 }
 0xdb5   :  { %v5586_v52 = vpop.eup %5585  ;;  %v3275_v37 = vmul.f32 %v5584_v22, %v5582_v1 }
 0xdb6   :  { %v3274_v53 = vmul.f32 %v5586_v52, %v3272_v50  ;;  %v5588_v9 = vpop.eup %5587 }
 0xdb8   :  { %v6930_v47 = vadd.f32 %v3275_v37, %v3274_v53 }
 0xdba   :  { %5589 = vtanh.f32 %v6930_v47 }
 0xdc4   :  { %v5590_v43 = vpop.eup %5589 }
 0xdc5   :  { %v3278_v51 = vmul.f32 %v5590_v43, %v5588_v9  ;;  %v3469_v43 = vrot.slane %v6930_v47, 6 }
 0xdc7   :  { %3356 = vmatmul.mubr.f32.vlgmr.msra.gmra.mrb[34].mxu0 %v3278_v51  ;;  %3427 = vmatmul.mubr.f32.vlgmr.msra.gmra.mrb[34].mxu1 %v3278_v51 }
 0xdc8   :  { %5209 = vmatpush1.bf16.msra.mxu0 %v6573_v41  ;;  %5241 = vmatpush1.bf16.msra.mxu1 %v6575_v42 }
 0xdc9   :  { %5211 = vmatprep.subr.bf16.mxu0 %v6579_v2  ;;  %5243 = vmatprep.subr.bf16.mxu1 %v6581_v3 }
 0xdca   :  { %3543 = vmatprep.mubr.f32.mxu0 %v7210_v36  ;;  %3614 = vmatprep.mubr.f32.mxu1 %v7210_v36 }
 0xdcc   :  { %5213 = vmatpush1.bf16.msra.mxu0 %v6587_v18  ;;  %5245 = vmatpush1.bf16.msra.mxu1 %v6589_v32 }
 0xdcd   :  { %5215 = vmatprep.subr.bf16.mxu0 %v6593_v0  ;;  %5247 = vmatprep.subr.bf16.mxu1 %v6595_v49 }
 0xdd0   :  { %5217 = vmatpush1.bf16.msra.mxu0 %v6603_v30  ;;  %5249 = vmatpush1.bf16.msra.mxu1 %v6605_v38 }
 0xdd1   :  { %5219 = vmatprep.subr.bf16.mxu0 %v6609_v27  ;;  %5251 = vmatprep.subr.bf16.mxu1 %v6611_v61 }
 0xdd4   :  { %5221 = vmatpush1.bf16.msra.mxu0 %v6617_v48  ;;  %5253 = vmatpush1.bf16.msra.mxu1 %v6619_v40 }
 0xdd5   :  { %5223 = vmatprep.subr.bf16.mxu0 %v6623_v7  ;;  %5255 = vmatprep.subr.bf16.mxu1 %v6625_v35 }
 0xdd8   :  { %5225 = vmatpush1.bf16.msra.mxu0 %v6629_v14  ;;  %5257 = vmatpush1.bf16.msra.mxu1 %v6631_v10 }
 0xdd9   :  { %5227 = vmatprep.subr.bf16.mxu0 %v6635_v21  ;;  %5259 = vmatprep.subr.bf16.mxu1 %v6637_v11 }
 0xddc   :  { %5229 = vmatpush1.bf16.msra.mxu0 %v6641_v23  ;;  %5261 = vmatpush1.bf16.msra.mxu1 %v6643_v46 }
 0xddd   :  { %5231 = vmatprep.subr.bf16.mxu0 %v6647_v55  ;;  %5263 = vmatprep.subr.bf16.mxu1 %v6649_v59 }
 0xde0   :  { %5233 = vmatpush1.bf16.msra.mxu0 %v6653_v63  ;;  %5265 = vmatpush1.bf16.msra.mxu1 %v6655_v8 }
 0xde1   :  { %5235 = vmatprep.subr.bf16.mxu0 %v6659_v25  ;;  %5267 = vmatprep.subr.bf16.mxu1 %v6661_v57 }
 0xde4   :  { %5237 = vmatpush1.bf16.msra.mxu0 %v6665_v45  ;;  %5269 = vmatpush1.bf16.msra.mxu1 %v6667_v60 }
 0xde5   :  { %5271 = vmatprep.subr.bf16.mxu0 %v6569_v15  ;;  %5303 = vmatprep.subr.bf16.mxu1 %v6571_v19  ;;  %v7265_v19 = vld [vmem:[#allocation13_spill] sm:$0xff] }
 0xe9a   :  { %v3357_v6 = vpop.f32.mrb[34].mxu0  ;;  %v3428_v29 = vpop.f32.mrb[34].mxu1 }
 0xe9b   :  { %v3437_v24 = vrot.slane %v3357_v6, 6  ;;  %v3359_v39 = vpop.f32.mrb[35].mxu0  ;;  %v3430_v26 = vpop.f32.mrb[35].mxu1  ;;  %v3439_v15 = vrot.slane %v3428_v29, 6 }
 0xe9c   :  { %v3438_v33 = vrot.slane %v3359_v39, 6  ;;  %v3440_v44 = vrot.slane %v3430_v26, 6 }
 0xe9d   :  { %v3445_v17 = vadd.f32 %v3437_v24, %v6719_v28  ;;  %v3447_v1 = vadd.f32 %v3439_v15, %v7265_v19  ;;  %v3860_v15 = vld [vmem:[%s7113_s10 + $0x20] sm:$0xff] }
 0xe9e   :  { %v3446_v62 = vadd.f32 %v3438_v33, %v7263_v31  ;;  %v3448_v4 = vadd.f32 %v3440_v44, %v7264_v13  ;;  %v3859_v44 = vld [vmem:[%s7113_s10 + $0x18] sm:$0xff] }
 0xe9f   :  { %v4090_v56 = vmul.f32 -1.442695, %v3445_v17 }
 0xea0   :  { %v4091_v54 = vmul.f32 -1.442695, %v3446_v62  ;;  %v4092_v16 = vmul.f32 -1.442695, %v3448_v4 }
 0xea1   :  { %5591 = vpow2.f32 %v4090_v56  ;;  %v5718_v56 = vmov 0.0|0.0  }
 0xea2   :  { %5593 = vpow2.f32 %v4091_v54  ;;  %v3858_v54 = vld [vmem:[%s7113_s10 + $0x10] sm:$0xff] }
 0xea3   :  { %5595 = vpow2.f32 %v4092_v16  ;;  %v5338_v4 = vpack.c.bf16 %v3859_v44, %v3858_v54  ;;  %v3861_v16 = vld [vmem:[%s7113_s10 + $0x28] sm:$0xff] }
 0xea4   :  { %5597 = vtanh.f32 %v3447_v1  ;;  %v5341_v1 = vpack.c.bf16 %v3861_v16, %v3860_v15  ;;  %v4099_v16 = vld [vmem:[%s7114_s11] ss:$0 sm:$0xff] }
 0xeab   :  { %v5592_v22 = vpop.eup %5591 }
 0xeac   :  { %v5594_v50 = vpop.eup %5593  ;;  %v3452_v52 = vadd.f32 1.0, %v5592_v22  ;;  %v3862_v22 = vld [vmem:[%s7113_s10 + $0x30] sm:$0xff] }
 0xead   :  { %v3458_v37 = vadd.f32 1.0, %v5594_v50  ;;  %v5596_v12 = vpop.eup %5595  ;;  %v3863_v50 = vld [vmem:[%s7113_s10 + $0x38] sm:$0xff] }
 0xeae   :  { %5599 = vrcp.f32 %v3452_v52  ;;  %v5598_v53 = vpop.eup %5597  ;;  %v3465_v24 = vadd.f32 1.0, %v5596_v12  ;;  %v5344_v52 = vpack.c.bf16 %v3863_v50, %v3862_v22  ;;  %v3865_v12 = vld [vmem:[%s7113_s10 + $0x48] sm:$0xff] }
 0xeaf   :  { %5601 = vrcp.f32 %v3458_v37  ;;  %v3864_v37 = vld [vmem:[%s7113_s10 + $0x40] sm:$0xff] }
 0xeb0   :  { %5603 = vrcp.f32 %v3465_v24  ;;  %v3869_v24 = vld [vmem:[%s7113_s10 + $0x68] sm:$0xff] }
 0xeb8   :  { %v5600_v9 = vpop.eup %5599 }
 0xeb9   :  { %v5602_v51 = vpop.eup %5601  ;;  %v3472_v6 = vmul.f32 %v5600_v9, %v5598_v53  ;;  %v5347_v53 = vpack.c.bf16 %v3865_v12, %v3864_v37  ;;  %v3866_v9 = vld [vmem:[%s7113_s10 + $0x50] sm:$0xff]  ;;  %v4100_v37 = vld [vmem:[#allocation2] ss:$0 sm:$0xff] }
 0xeba   :  { %v3471_v29 = vmul.f32 %v5602_v51, %v3469_v43  ;;  %v5604_v26 = vpop.eup %5603  ;;  %v3867_v43 = vld [vmem:[%s7113_s10 + $0x58] sm:$0xff] }
 0xebb   :  { %v5350_v51 = vpack.c.bf16 %v3867_v43, %v3866_v9 }
 0xebc   :  { %v6972_v39 = vadd.f32 %v3472_v6, %v3471_v29  ;;  %v3868_v6 = vld [vmem:[%s7113_s10 + $0x60] sm:$0xff] }
 0xebd   :  { %v5353_v29 = vpack.c.bf16 %v3869_v24, %v3868_v6 }
 0xebe   :  { %5605 = vtanh.f32 %v6972_v39 }
 0xec8   :  { %v5606_v33 = vpop.eup %5605 }
 0xec9   :  { %v3475_v17 = vmul.f32 %v5606_v33, %v5604_v26  ;;  %v3953_v33 = vld [vmem:[%s7115_s12] sm:$0xff] }
 0xecb   :  { %v3477_v62 = vrot.slane %v3475_v17, 2  ;;  %v3954_v17 = vld [vmem:[%s7115_s12 + $0x8] sm:$0xff] }
 0xecd   :  { %3544 = vmatmul.mubr.f32.vlgmr.msra.gmra.mrb[36].mxu0 %v3477_v62  ;;  %3615 = vmatmul.mubr.f32.vlgmr.msra.gmra.mrb[36].mxu1 %v3477_v62  ;;  %v3955_v62 = vld [vmem:[%s7115_s12 + $0x10] sm:$0xff] }
 0xece   :  { %5273 = vmatpush1.bf16.msra.mxu0 %v6573_v41  ;;  %5305 = vmatpush1.bf16.msra.mxu1 %v6575_v42 }
 0xecf   :  { %5275 = vmatprep.subr.bf16.mxu0 %v6579_v2  ;;  %5307 = vmatprep.subr.bf16.mxu1 %v6581_v3 }
 0xed0   :  { %3731 = vmatprep.mubr.f32.mxu0 %v7210_v36  ;;  %3802 = vmatprep.mubr.f32.mxu1 %v7210_v36 }
 0xed2   :  { %5277 = vmatpush1.bf16.msra.mxu0 %v6587_v18  ;;  %5309 = vmatpush1.bf16.msra.mxu1 %v6589_v32 }
 0xed3   :  { %5279 = vmatprep.subr.bf16.mxu0 %v6593_v0  ;;  %5311 = vmatprep.subr.bf16.mxu1 %v6595_v49 }
 0xed6   :  { %5281 = vmatpush1.bf16.msra.mxu0 %v6603_v30  ;;  %5313 = vmatpush1.bf16.msra.mxu1 %v6605_v38 }
 0xed7   :  { %5283 = vmatprep.subr.bf16.mxu0 %v6609_v27  ;;  %5315 = vmatprep.subr.bf16.mxu1 %v6611_v61 }
 0xeda   :  { %5285 = vmatpush1.bf16.msra.mxu0 %v6617_v48  ;;  %5317 = vmatpush1.bf16.msra.mxu1 %v6619_v40 }
 0xedb   :  { %5287 = vmatprep.subr.bf16.mxu0 %v6623_v7  ;;  %5319 = vmatprep.subr.bf16.mxu1 %v6625_v35 }
 0xede   :  { %5289 = vmatpush1.bf16.msra.mxu0 %v6629_v14  ;;  %5321 = vmatpush1.bf16.msra.mxu1 %v6631_v10 }
 0xedf   :  { %5291 = vmatprep.subr.bf16.mxu0 %v6635_v21  ;;  %5323 = vmatprep.subr.bf16.mxu1 %v6637_v11 }
 0xee2   :  { %5293 = vmatpush1.bf16.msra.mxu0 %v6641_v23  ;;  %5325 = vmatpush1.bf16.msra.mxu1 %v6643_v46 }
 0xee3   :  { %5295 = vmatprep.subr.bf16.mxu0 %v6647_v55  ;;  %5327 = vmatprep.subr.bf16.mxu1 %v6649_v59  ;;  %v3657_v55 = vrot.slane %v6972_v39, 6  ;;  %v3870_v39 = vld [vmem:[%s7113_s10 + $0x70] sm:$0xff] }
 0xee6   :  { %5297 = vmatpush1.bf16.msra.mxu0 %v6653_v63  ;;  %5329 = vmatpush1.bf16.msra.mxu1 %v6655_v8 }
 0xee7   :  { %5299 = vmatprep.subr.bf16.mxu0 %v6659_v25  ;;  %5331 = vmatprep.subr.bf16.mxu1 %v6661_v57 }
 0xeea   :  { %5301 = vmatpush1.bf16.msra.mxu0 %v6665_v45  ;;  %5333 = vmatpush1.bf16.msra.mxu1 %v6667_v60 }
 0xeeb   :  { %5334 = vmatprep.subr.bf16.mxu0 %v5718_v56  ;;  %5358 = vmatprep.subr.bf16.mxu1 %v5718_v56 }
 0xfa0   :  { %v3545_v41 = vpop.f32.mrb[36].mxu0  ;;  %v3616_v42 = vpop.f32.mrb[36].mxu1 }
 0xfa1   :  { %v3625_v2 = vrot.slane %v3545_v41, 4  ;;  %v3547_v3 = vpop.f32.mrb[37].mxu0  ;;  %v3618_v18 = vpop.f32.mrb[37].mxu1  ;;  %v3627_v48 = vrot.slane %v3616_v42, 4  ;;  %v5359_v41 = vpack.c.bf16 %v3954_v17, %v3953_v33  ;;  %v3956_v42 = vld [vmem:[%s7115_s12 + $0x18] sm:$0xff] }
 0xfa2   :  { %v3626_v32 = vrot.slane %v3547_v3, 4  ;;  %v3628_v27 = vrot.slane %v3618_v18, 4  ;;  %v3957_v3 = vld [vmem:[%s7115_s12 + $0x20] sm:$0xff]  ;;  %v3958_v18 = vld [vmem:[%s7115_s12 + $0x28] sm:$0xff] }
 0xfa3   :  { %v3633_v0 = vadd.f32 %v3625_v2, %v6723_v5  ;;  %v3635_v7 = vadd.f32 %v3627_v48, %v6725_v58  ;;  %v5362_v2 = vpack.c.bf16 %v3956_v42, %v3955_v62 }
 0xfa4   :  { %v3634_v49 = vadd.f32 %v3626_v32, %v6731_v34  ;;  %v3636_v61 = vadd.f32 %v3628_v27, %v6733_v20  ;;  %v3856_v34 = vld [vmem:[%s7113_s10] sm:$0xff]  ;;  %v3857_v20 = vld [vmem:[%s7113_s10 + $0x8] sm:$0xff]  ;;  %v5365_v32 = vpack.c.bf16 %v3958_v18, %v3957_v3 }
 0xfa5   :  { %v4093_v30 = vmul.f32 -1.442695, %v3633_v0  ;;  %v5335_v47 = vpack.c.bf16 %v3857_v20, %v3856_v34  ;;  %v7266_v20 = vld [vmem:[#allocation16_spill] sm:$0xff] }
 0xfa6   :  { %v4094_v38 = vmul.f32 -1.442695, %v3634_v49  ;;  %v4095_v40 = vmul.f32 -1.442695, %v3636_v61 }
 0xfa7   :  { %5607 = vpow2.f32 %v4093_v30 }
 0xfa8   :  { %5609 = vpow2.f32 %v4094_v38 }
 0xfa9   :  { %5611 = vpow2.f32 %v4095_v40 }
 0xfaa   :  { %5613 = vtanh.f32 %v3635_v7 }
 0xfb1   :  { %v5608_v35 = vpop.eup %5607 }
 0xfb2   :  { %v5610_v14 = vpop.eup %5609  ;;  %v3640_v10 = vadd.f32 1.0, %v5608_v35 }
 0xfb3   :  { %v3646_v21 = vadd.f32 1.0, %v5610_v14  ;;  %v5612_v11 = vpop.eup %5611 }
 0xfb4   :  { %5615 = vrcp.f32 %v3640_v10  ;;  %v5614_v23 = vpop.eup %5613  ;;  %v3653_v8 = vadd.f32 1.0, %v5612_v11 }
 0xfb5   :  { %5617 = vrcp.f32 %v3646_v21 }
 0xfb6   :  { %5619 = vrcp.f32 %v3653_v8 }
 0xfbe   :  { %v5616_v46 = vpop.eup %5615 }
 0xfbf   :  { %v5618_v59 = vpop.eup %5617  ;;  %v3660_v63 = vmul.f32 %v5616_v46, %v5614_v23 }
 0xfc0   :  { %v3659_v25 = vmul.f32 %v5618_v59, %v3657_v55  ;;  %v5620_v45 = vpop.eup %5619 }
 0xfc2   :  { %v7012_v57 = vadd.f32 %v3660_v63, %v3659_v25 }
 0xfc4   :  { %5621 = vtanh.f32 %v7012_v57  ;;  %v3845_v25 = vrot.slane %v7012_v57, 6  ;;  %v3959_v57 = vld [vmem:[%s7115_s12 + $0x30] sm:$0xff] }
 0xfce   :  { %v5622_v60 = vpop.eup %5621 }
 0xfcf   :  { %v3663_v5 = vmul.f32 %v5622_v60, %v5620_v45 }
 0xfd1   :  { %v3665_v58 = vrot.slane %v3663_v5, 4 }
 0xfd3   :  { %3732 = vmatmul.mubr.f32.vlgmr.msra.gmra.mrb[38].mxu0 %v3665_v58  ;;  %3803 = vmatmul.mubr.f32.vlgmr.msra.gmra.mrb[38].mxu1 %v3665_v58 }
 0xfd4   :  { %5336 = vmatpush3.bf16.msra.mxu0 %v5335_v47  ;;  %4160 = vmatprep.mubr.msk.f32.mxu0 %vm5719_vm4, %v7210_v36  ;;  %v3853_v47 = vrot.slane %v7266_v20, 2 }
 0xfd5   :  { %5337 = vmatprep.subr.bf16.mxu0 %v5718_v56  ;;  %4179 = vmatprep.mubr.msk.f32.mxu1 %vm5719_vm4, %v7210_v36  ;;  %v3871_v36 = vld [vmem:[%s7113_s10 + $0x78] sm:$0xff] }
 0xfd6   :  { %v5356_v26 = vpack.c.bf16 %v3871_v36, %v3870_v39  ;;  %5360 = vmatpush3.bf16.msra.mxu1 %v5359_v41 }
 0xfd7   :  { %5361 = vmatprep.subr.bf16.mxu1 %v5718_v56 }
 0xfd8   :  { %5339 = vmatpush3.bf16.msra.mxu0 %v5338_v4  ;;  %v3960_v4 = vld [vmem:[%s7115_s12 + $0x38] sm:$0xff] }
 0xfd9   :  { %5340 = vmatprep.subr.bf16.mxu0 %v5718_v56  ;;  %v5368_v15 = vpack.c.bf16 %v3960_v4, %v3959_v57 }
 0xfda   :  { %5363 = vmatpush3.bf16.msra.mxu1 %v5362_v2 }
 0xfdb   :  { %5364 = vmatprep.subr.bf16.mxu1 %v5718_v56 }
 0xfdc   :  { %5342 = vmatpush3.bf16.msra.mxu0 %v5341_v1 }
 0xfdd   :  { %5343 = vmatprep.subr.bf16.mxu0 %v5718_v56 }
 0xfde   :  { %5366 = vmatpush3.bf16.msra.mxu1 %v5365_v32 }
 0xfdf   :  { %5367 = vmatprep.subr.bf16.mxu1 %v5718_v56 }
 0xfe0   :  { %5345 = vmatpush3.bf16.msra.mxu0 %v5344_v52 }
 0xfe1   :  { %5346 = vmatprep.subr.bf16.mxu0 %v5718_v56 }
 0xfe2   :  { %5369 = vmatpush3.bf16.msra.mxu1 %v5368_v15 }
 0xfe4   :  { %5348 = vmatpush3.bf16.msra.mxu0 %v5347_v53 }
 0xfe5   :  { %5349 = vmatprep.subr.bf16.mxu0 %v5718_v56 }
 0xfe8   :  { %5351 = vmatpush3.bf16.msra.mxu0 %v5350_v51 }
 0xfe9   :  { %5352 = vmatprep.subr.bf16.mxu0 %v5718_v56 }
 0xfec   :  { %5354 = vmatpush3.bf16.msra.mxu0 %v5353_v29 }
 0xfed   :  { %5355 = vmatprep.subr.bf16.mxu0 %v5718_v56 }
 0xff0   :  { %5357 = vmatpush3.bf16.msra.mxu0 %v5356_v26 }
0x10a6   :  { %v3733_v0 = vpop.f32.mrb[38].mxu0  ;;  %v3804_v49 = vpop.f32.mrb[38].mxu1 }
0x10a7   :  { %v3813_v30 = vrot.slane %v3733_v0, 2  ;;  %v3735_v38 = vpop.f32.mrb[39].mxu0  ;;  %v3806_v27 = vpop.f32.mrb[39].mxu1  ;;  %v3815_v21 = vrot.slane %v3804_v49, 2 }
0x10a8   :  { %v3814_v61 = vrot.slane %v3735_v38, 2  ;;  %v3816_v14 = vrot.slane %v3806_v27, 2 }
0x10a9   :  { %v3821_v48 = vadd.f32 %v3813_v30, %v6719_v28  ;;  %v3823_v23 = vadd.f32 %v3815_v21, %v7265_v19 }
0x10aa   :  { %v3822_v40 = vadd.f32 %v3814_v61, %v7263_v31  ;;  %v3824_v10 = vadd.f32 %v3816_v14, %v7264_v13 }
0x10ab   :  { %v4096_v7 = vmul.f32 -1.442695, %v3821_v48 }
0x10ac   :  { %v4097_v35 = vmul.f32 -1.442695, %v3822_v40  ;;  %v4098_v11 = vmul.f32 -1.442695, %v3824_v10 }
0x10ad   :  { %5623 = vpow2.f32 %v4096_v7 }
0x10ae   :  { %5625 = vpow2.f32 %v4097_v35 }
0x10af   :  { %5627 = vpow2.f32 %v4098_v11 }
0x10b0   :  { %5629 = vtanh.f32 %v3823_v23 }
0x10b7   :  { %v5624_v46 = vpop.eup %5623 }
0x10b8   :  { %v5626_v55 = vpop.eup %5625  ;;  %v3828_v59 = vadd.f32 1.0, %v5624_v46 }
0x10b9   :  { %v3834_v63 = vadd.f32 1.0, %v5626_v55  ;;  %v5628_v28 = vpop.eup %5627 }
0x10ba   :  { %5631 = vrcp.f32 %v3828_v59  ;;  %v5630_v31 = vpop.eup %5629  ;;  %v3841_v13 = vadd.f32 1.0, %v5628_v28 }
0x10bb   :  { %5633 = vrcp.f32 %v3834_v63 }
0x10bc   :  { %5635 = vrcp.f32 %v3841_v13 }
0x10c4   :  { %v5632_v8 = vpop.eup %5631 }
0x10c5   :  { %v5634_v45 = vpop.eup %5633  ;;  %v3848_v60 = vmul.f32 %v5632_v8, %v5630_v31 }
0x10c6   :  { %v3847_v5 = vmul.f32 %v5634_v45, %v3845_v25  ;;  %v5636_v19 = vpop.eup %5635 }
0x10c8   :  { %v3849_v58 = vadd.f32 %v3848_v60, %v3847_v5 }
0x10ca   :  { %5637 = vtanh.f32 %v3849_v58 }
0x10d4   :  { %v5638_v34 = vpop.eup %5637 }
0x10d5   :  { %v3851_v56 = vmul.f32 %v5638_v34, %v5636_v19 }
0x10d7   :  { %v3855_v54 = vsel %vm1758_vm0, %v3851_v56, %v3853_v47 }
0x10d8   :  { %v3880_v44 = vrot.slane %v3855_v54, 6 }
0x10da   :  { %4161 = vmatmul.mubr.f32.vlgmr.msra.gmra.mrb[40].mxu0 %v3880_v44 }
0x11ad   :  { %v3948_v1 = vpop.f32.mrb[40].mxu0 }
0x11ae   :  { %v3949_v22 = vadd.f32 %v4099_v16, %v3948_v1  ;;  %v4162_v50 = vpop.f32.mrb[41].mxu0 }
0x11b0   :  { %v3952_v52 = vmax.f32 %v3949_v22, 0.0 }
0x11b2   :  { %4180 = vmatmul.mubr.msk.f32.vlgmr.msra.gmra.mrb[40].mxu1 %vm1758_vm0, %v3952_v52 }
0x1285   :  { %v4037_v12 = vpop.f32.mrb[40].mxu1 }
0x1286   :  { %v4038_v53 = vadd.f32 %v4100_v37, %v4037_v12  ;;  %v4181_v9 = vpop.f32.mrb[41].mxu1 }
0x1288   :  { %4042 = vst.msk [vmem:[%s7117_s14] sm:$0x3] %vm4041_vm5, %v4038_v53 }
0x1289   :  { %4047 = vsyncpa [#allocation4], 1 }
0x128a   :  { %4048 = vsyncpa [#allocation6], 1 }

</bundles_post_ra>
